<compile_context>
chip_gen: v7x
topology: tpu7x:2x2x1
jax: 0.10.0
libtpu: 0.0.40
codegen_flags: <defaults>
</compile_context>

<pallas_src>
import math

import jax
import jax.numpy as jnp
from jax.experimental import pallas as pl
from jax.experimental.pallas import tpu as pltpu

LANE = 128  # TPU lane width; feature dims padded / packed to multiples of this


def _ru(n, m=LANE):
    return ((n + m - 1) // m) * m


# ----------------------------- configuration ------------------------------
class Config:
    vocab_size = 64
    comman_embedding_dim = 32
    num_embeddings_encoder = 32
    num_embeddings_decoder = 32
    num_encoder_layers = 1
    num_decoder_layers = 1
    n_head = 2
    max_len = 16


# ----------------------------- in-kernel helpers ------------------------------
def _ln(x, g, b, d_valid):
    # x: (T, Dp) f32 with zeros in padded lanes; g/b zero-padded so padded
    # lanes of the output stay exactly zero.  Variance uses E[(x-mu)^2] over
    # the valid lanes only (mask built from a lane iota).
    Dp = x.shape[-1]
    lane = jax.lax.broadcasted_iota(jnp.int32, (1, Dp), 1)
    mask = (lane < d_valid).astype(jnp.float32)
    inv_d = 1.0 / float(d_valid)
    mu = jnp.sum(x, axis=-1, keepdims=True) * inv_d
    diff = (x - mu) * mask
    var = jnp.sum(diff * diff, axis=-1, keepdims=True) * inv_d
    return diff * jax.lax.rsqrt(var + 1e-5) * g + b


def _dot(a, w):
    # bf16 operands, f32 accumulation on the MXU.
    return jnp.dot(a.astype(jnp.bfloat16), w, preferred_element_type=jnp.float32)


def _gelu(x):
    # exact (erf) GELU, matching torch.nn.GELU() default
    return 0.5 * x * (1.0 + jax.lax.erf(x * 0.7071067811865476))


def _embed(ids, wte):
    # ids: (T, 1) int32; wte: (Vp, Dcp) f32.  One-hot matmul == exact row
    # gather, done on the MXU (no XLA gather, no HBM round trip).
    T = ids.shape[0]
    Vp = wte.shape[0]
    lane = jax.lax.broadcasted_iota(jnp.int32, (T, Vp), 1)
    onehot = (lane == ids).astype(jnp.float32)
    return jnp.dot(onehot, wte, preferred_element_type=jnp.float32)


def _mha(q, k, v, hmask, *, causal):
    # q: (Tq, 128), k/v: (Tk, 128); heads are contiguous within the 128-lane
    # group (head h in lanes [h*dh, (h+1)*dh)); padded lanes are zero.  The
    # 1/sqrt(dh) scale is folded into the packed q weights.  hmask: (H,1,128)
    # per-head lane mask.  Masked k gives per-head scores; masked v makes each
    # head's output land in its own lane range, so summing over heads
    # reconstructs the concatenated-head layout with no concatenate.
    Tq, P = q.shape
    Tk = k.shape[0]
    H = hmask.shape[0]
    qb = q.astype(jnp.bfloat16)
    kb = k.astype(jnp.bfloat16)
    vb = v.astype(jnp.bfloat16)
    hm = jnp.broadcast_to(hmask, (H, Tk, P))
    kh = jnp.broadcast_to(kb[None], (H, Tk, P)) * hm
    vh = jnp.broadcast_to(vb[None], (H, Tk, P)) * hm
    qh = jnp.broadcast_to(qb[None], (H, Tq, P))
    # one batched score matmul over all heads
    s = jnp.einsum('hqd,hkd->hqk', qh, kh, preferred_element_type=jnp.float32)
    if causal:
        qi = jax.lax.broadcasted_iota(jnp.int32, (Tq, Tk), 0)
        ki = jax.lax.broadcasted_iota(jnp.int32, (Tq, Tk), 1)
        s = s + jnp.where(ki <= qi, 0.0, -1e30).astype(jnp.float32)[None]
    m = jnp.max(s, axis=-1, keepdims=True)
    p = jnp.exp(s - m)
    l = jnp.sum(p, axis=-1, keepdims=True)
    p = (p / l).astype(jnp.bfloat16)          # exact softmax denominator
    oh = jnp.einsum('hqk,hkd->hqd', p, vh, preferred_element_type=jnp.float32)
    return jnp.sum(oh, axis=0)                # heads occupy disjoint lanes
    # TODO(synk): for long sequences switch to flash-style online softmax
    # with a KV grid axis instead of the dense (Tq,Tk) score tile.


def _ln_linear(x, p, d_valid):
    h = _ln(x, p['g'][...], p['b'][...], d_valid)
    return _dot(h, p['w'][...]) + p['bias'][...]


def _block_self(x, p, *, d_valid, causal):
    P = LANE
    h = _ln(x, p['ln1g'][...], p['ln1b'][...], d_valid)
    qkv = _dot(h, p['wqkv'][...]) + p['bqkv'][...]        # fused q|k|v matmul (N=384)
    o = _mha(qkv[:, 0:P], qkv[:, P:2 * P], qkv[:, 2 * P:3 * P],
             p['hmask'][...], causal=causal)
    x = x + _dot(o, p['wpr'][...]) + p['bpr'][...]        # residual in-kernel
    h2 = _ln(x, p['ln2g'][...], p['ln2b'][...], d_valid)
    m = _gelu(_dot(h2, p['wfc'][...]) + p['bfc'][...])
    return x + _dot(m, p['wp2'][...]) + p['bp2'][...]


def _block_cross(x, y, p, *, d_valid):
    P = LANE
    hx = _ln(x, p['ln1g'][...], p['ln1b'][...], d_valid)
    q = _dot(hx, p['wq'][...]) + p['bq'][...]
    kv = _dot(y, p['wkv'][...]) + p['bkv'][...]           # fused k|v matmul (N=256)
    o = _mha(q, kv[:, 0:P], kv[:, P:2 * P], p['hmask'][...], causal=False)
    x = x + _dot(o, p['wpr'][...]) + p['bpr'][...]
    h2 = _ln(x, p['ln2g'][...], p['ln2b'][...], d_valid)
    m = _gelu(_dot(h2, p['wfc'][...]) + p['bfc'][...])
    return x + _dot(m, p['wp2'][...]) + p['bp2'][...]


# ----------------------------- fused kernel ------------------------------
def _make_kernel(treedef, *, Tx, Ty, Dc, De, Dd):
    def kernel(x_ids_ref, y_ids_ref, pos_ref, *refs):
        out_ref = refs[-1]
        W = jax.tree_util.tree_unflatten(treedef, refs[:-1])
        wte = W['wte'][...]                    # (Vp, Dcp) f32, exact lookup
        pos = pos_ref[...]                     # (max_len, Dcp) f32

        # ---------------- encoder (text y) ----------------
        y = _embed(y_ids_ref[...], wte) + pos[:Ty, :]
        y = _ln_linear(y, W['enc_stem'], Dc)              # ln_f0 + proj_cm
        for blk in W['enc_blocks']:
            y = _block_self(y, blk, d_valid=De, causal=False)
        y = _ln_linear(y, W['enc_tail'], De)              # ln_f + proj_c

        # ---------------- decoder (tokens x) ----------------
        x = _embed(x_ids_ref[...], wte) + pos[:Tx, :]
        x = _ln_linear(x, W['dec_stem'], Dc)              # ln_f0 + proj_cm
        for i, blk in enumerate(W['dec_blocks']):
            if i % 2 == 0:
                x = _block_self(x, blk, d_valid=Dd, causal=True)
            else:
                x = _block_cross(x, y, blk, d_valid=Dd)

        # ---------------- decoder tail + tied lm_head ----------------
        t = W['dec_tail']
        x = _ln(x, t['g1'][...], t['b1'][...], Dd)        # ln_f
        x = _dot(x, t['w1'][...]) + t['bias1'][...]       # final_proj
        x = _ln(x, t['g2'][...], t['b2'][...], Dc)        # ln_f2
        out_ref[0, :, :] = _dot(x, W['wlm'][...]).astype(out_ref.dtype)

    return kernel


# ----------------------------- parameter init / packing ---------------------
class _KeyGen:
    def __init__(self, key):
        self.key = key

    def __call__(self):
        self.key, sub = jax.random.split(self.key)
        return sub


def _pad2(a, rows, cols, dtype=None):
    dtype = dtype or a.dtype
    out = jnp.zeros((rows, cols), dtype)
    return out.at[:a.shape[0], :a.shape[1]].set(a.astype(dtype))


def _ln_pad(d, dp):
    g = jnp.zeros((1, dp), jnp.float32).at[0, :d].set(1.0)
    b = jnp.zeros((1, dp), jnp.float32)
    return g, b


def _pack_linear(w_raw, b_raw, d_in_p, d_out_p):
    w = _pad2(w_raw, d_in_p, d_out_p, jnp.float32).astype(jnp.bfloat16)
    b = jnp.zeros((1, d_out_p), jnp.float32).at[0, :w_raw.shape[1]].set(b_raw)
    return w, b


def _pack_parts(ws, bs, d_in_p):
    # Pack each part (q / k / v) into its own 128-lane group with heads
    # contiguous inside the group (lanes [h*dh, (h+1)*dh)).
    P = LANE
    n = len(ws)
    w = jnp.zeros((d_in_p, n * P), jnp.float32)
    b = jnp.zeros((1, n * P), jnp.float32)
    for i, (wi, bi) in enumerate(zip(ws, bs)):
        di, do = wi.shape
        w = w.at[:di, i * P:i * P + do].set(wi)
        b = b.at[0, i * P:i * P + do].set(bi)
    return w.astype(jnp.bfloat16), b


def _head_mask(H, dh):
    m = jnp.zeros((H, 1, LANE), jnp.float32)
    for h in range(H):
        m = m.at[h, 0, h * dh:(h + 1) * dh].set(1.0)
    return m.astype(jnp.bfloat16)


def init_params(cfg, key):
    kg = _KeyGen(key)
    Dc, De, Dd = (cfg.comman_embedding_dim, cfg.num_embeddings_encoder,
                  cfg.num_embeddings_decoder)
    H = cfg.n_head
    Dcp = _ru(Dc)
    Vp = _ru(cfg.vocab_size)
    std = 0.02

    def lin_raw(d_in, d_out):
        return (jax.random.normal(kg(), (d_in, d_out), jnp.float32) * std,
                jnp.zeros((d_out,), jnp.float32))

    # tied token embedding (also the lm_head weight)
    wte = jax.random.normal(kg(), (cfg.vocab_size, Dc), jnp.float32) * std
    wte_pad = _pad2(wte, Vp, Dcp, jnp.float32)
    wlm = wte_pad.T.astype(jnp.bfloat16)                  # (Dcp, Vp)

    # sinusoidal positional embedding
    div_term = jnp.exp(jnp.arange(0, Dc, 2, dtype=jnp.float32)
                       * (-math.log(10000.0) / Dc))
    kpos = jnp.arange(cfg.max_len, dtype=jnp.float32)[:, None]
    pe = jnp.zeros((cfg.max_len, Dc), jnp.float32)
    pe = pe.at[:, 0::2].set(jnp.sin(kpos * div_term))
    pe = pe.at[:, 1::2].set(jnp.cos(kpos * div_term))
    pe_pad = _pad2(pe, cfg.max_len, Dcp, jnp.float32)

    def make_ln_linear(d_in, d_out):
        w, b = lin_raw(d_in, d_out)
        g, beta = _ln_pad(d_in, _ru(d_in))
        wp, bp = _pack_linear(w, b, _ru(d_in), _ru(d_out))
        return {'g': g, 'b': beta, 'w': wp, 'bias': bp}

    def make_self_block(D):
        dh = D // H
        scale = 1.0 / math.sqrt(dh)       # folded into q weights/bias
        Dp, Hm = _ru(D), _ru(4 * D)
        wq, bq = lin_raw(D, D)
        wk, bk = lin_raw(D, D)
        wv, bv = lin_raw(D, D)
        wpr, bpr = lin_raw(D, D)
        wfc, bfc = lin_raw(D, 4 * D)
        wp2, bp2 = lin_raw(4 * D, D)
        g1, b1 = _ln_pad(D, Dp)
        g2, b2 = _ln_pad(D, Dp)
        wqkv_p, bqkv_p = _pack_parts([wq * scale, wk, wv],
                                     [bq * scale, bk, bv], Dp)
        wpr_p, bpr_p = _pack_linear(wpr, bpr, Dp, Dp)
        wfc_p, bfc_p = _pack_linear(wfc, bfc, Dp, Hm)
        wp2_p, bp2_p = _pack_linear(wp2, bp2, Hm, Dp)
        return {'ln1g': g1, 'ln1b': b1, 'wqkv': wqkv_p, 'bqkv': bqkv_p,
                'wpr': wpr_p, 'bpr': bpr_p, 'ln2g': g2, 'ln2b': b2,
                'wfc': wfc_p, 'bfc': bfc_p, 'wp2': wp2_p, 'bp2': bp2_p,
                'hmask': _head_mask(H, dh)}

    def make_cross_block(D):
        dh = D // H
        scale = 1.0 / math.sqrt(dh)
        Dp, Hm = _ru(D), _ru(4 * D)
        wq, bq = lin_raw(D, D)
        wk, bk = lin_raw(D, D)
        wv, bv = lin_raw(D, D)
        wpr, bpr = lin_raw(D, D)
        wfc, bfc = lin_raw(D, 4 * D)
        wp2, bp2 = lin_raw(4 * D, D)
        g1, b1 = _ln_pad(D, Dp)
        g2, b2 = _ln_pad(D, Dp)
        wq_p, bq_p = _pack_parts([wq * scale], [bq * scale], Dp)
        wkv_p, bkv_p = _pack_parts([wk, wv], [bk, bv], Dp)
        wpr_p, bpr_p = _pack_linear(wpr, bpr, Dp, Dp)
        wfc_p, bfc_p = _pack_linear(wfc, bfc, Dp, Hm)
        wp2_p, bp2_p = _pack_linear(wp2, bp2, Hm, Dp)
        return {'ln1g': g1, 'ln1b': b1, 'wq': wq_p, 'bq': bq_p,
                'wkv': wkv_p, 'bkv': bkv_p, 'wpr': wpr_p, 'bpr': bpr_p,
                'ln2g': g2, 'ln2b': b2, 'wfc': wfc_p, 'bfc': bfc_p,
                'wp2': wp2_p, 'bp2': bp2_p, 'hmask': _head_mask(H, dh)}

    params = {
        'wte': wte_pad, 'wlm': wlm, 'pos': pe_pad,
        'enc_stem': make_ln_linear(Dc, De),                # ln_f0 + proj_cm
        'enc_blocks': [make_self_block(De) for _ in range(cfg.num_encoder_layers)],
        'enc_tail': make_ln_linear(De, Dd),                # ln_f + proj_c
        'dec_stem': make_ln_linear(Dc, Dd),                # ln_f0 + proj_cm
        'dec_blocks': [make_self_block(Dd) if i % 2 == 0 else make_cross_block(Dd)
                       for i in range(cfg.num_decoder_layers * 2)],
    }
    # decoder tail: ln_f -> final_proj -> ln_f2 (lm head uses tied wlm)
    wfp, bfp = lin_raw(Dd, Dc)
    g1, b1 = _ln_pad(Dd, _ru(Dd))
    g2, b2 = _ln_pad(Dc, Dcp)
    wfp_p, bfp_p = _pack_linear(wfp, bfp, _ru(Dd), Dcp)
    params['dec_tail'] = {'g1': g1, 'b1': b1, 'w1': wfp_p, 'bias1': bfp_p,
                          'g2': g2, 'b2': b2}
    return params


# ----------------------------- forward pass ------------------------------
def forward(params, x_tokens, y_tokens, cfg):
    Bx, Tx = x_tokens.shape
    By, Ty = y_tokens.shape
    assert Bx == By, "cross-attention requires matching batch sizes"
    Dc, De, Dd = (cfg.comman_embedding_dim, cfg.num_embeddings_encoder,
                  cfg.num_embeddings_decoder)
    Vp = _ru(cfg.vocab_size)

    # token ids as (B*T, 1) int32 so each grid step reads a (T,1) VMEM block
    x_ids = x_tokens.reshape(Bx * Tx, 1).astype(jnp.int32)
    y_ids = y_tokens.reshape(By * Ty, 1).astype(jnp.int32)

    wdict = {k: params[k] for k in
             ('wte', 'wlm', 'enc_stem', 'enc_blocks', 'enc_tail',
              'dec_stem', 'dec_blocks', 'dec_tail')}
    flat, treedef = jax.tree_util.tree_flatten(wdict)

    kernel = _make_kernel(treedef, Tx=Tx, Ty=Ty, Dc=Dc, De=De, Dd=Dd)

    def _full_spec(a):
        nd = a.ndim
        if nd == 2:
            im = lambda b: (0, 0)
        else:
            im = lambda b: (0, 0, 0)
        return pl.BlockSpec(a.shape, im)

    in_specs = ([pl.BlockSpec((Tx, 1), lambda b: (b, 0)),       # x token ids
                 pl.BlockSpec((Ty, 1), lambda b: (b, 0)),       # y token ids
                 _full_spec(params['pos'])]                     # pos (shared)
                + [_full_spec(a) for a in flat])                # weights (shared)

    out = pl.pallas_call(
        kernel,
        grid=(Bx,),                                            # batch-parallel grid
        out_shape=jax.ShapeDtypeStruct((Bx, Tx, Vp), jnp.float32),
        in_specs=in_specs,
        out_specs=pl.BlockSpec((1, Tx, Vp), lambda b: (b, 0, 0)),
        compiler_params=pltpu.CompilerParams(
            dimension_semantics=("parallel",)),                # 2nd TC on v7x
    )(x_ids, y_ids, params['pos'], *flat)
    return out[:, :, :cfg.vocab_size]


# ----------------------------- main ------------------------------
if __name__ == "__main__":
    cfg = Config()
    params = init_params(cfg, jax.random.PRNGKey(0))

    key = jax.random.PRNGKey(0)
    kx, ky = jax.random.split(key)
    x = jax.random.randint(kx, (2, 8), 0, cfg.vocab_size, dtype=jnp.int32)
    y = jax.random.randint(ky, (2, 8), 0, cfg.vocab_size, dtype=jnp.int32)

    fwd = jax.jit(lambda p, a, b: forward(p, a, b, cfg))
    logits = fwd(params, x, y)
    jax.block_until_ready(logits)
    assert logits.shape == (2, 8, cfg.vocab_size)
    assert logits.dtype == jnp.float32
    assert bool(jnp.all(jnp.isfinite(logits)))
    print("KERNEL_OK")
</pallas_src>

<mosaic_0001>
module attributes {stable_mosaic.version = 11 : i64} {
  func.func @kernel(%arg0: i32, %arg1: memref<8x1xi32, #tpu.memory_space<vmem>>, %arg2: memref<8x1xi32, #tpu.memory_space<vmem>>, %arg3: memref<16x128xf32, #tpu.memory_space<vmem>>, %arg4: memref<1x128xf32, #tpu.memory_space<vmem>>, %arg5: memref<1x128xf32, #tpu.memory_space<vmem>>, %arg6: memref<1x128xf32, #tpu.memory_space<vmem>>, %arg7: memref<1x384xf32, #tpu.memory_space<vmem>>, %arg8: memref<2x1x128xbf16, #tpu.memory_space<vmem>>, %arg9: memref<1x128xf32, #tpu.memory_space<vmem>>, %arg10: memref<1x128xf32, #tpu.memory_space<vmem>>, %arg11: memref<1x128xf32, #tpu.memory_space<vmem>>, %arg12: memref<1x128xf32, #tpu.memory_space<vmem>>, %arg13: memref<128x128xbf16, #tpu.memory_space<vmem>>, %arg14: memref<128x128xbf16, #tpu.memory_space<vmem>>, %arg15: memref<128x128xbf16, #tpu.memory_space<vmem>>, %arg16: memref<128x384xbf16, #tpu.memory_space<vmem>>, %arg17: memref<1x128xf32, #tpu.memory_space<vmem>>, %arg18: memref<1x256xf32, #tpu.memory_space<vmem>>, %arg19: memref<1x128xf32, #tpu.memory_space<vmem>>, %arg20: memref<1x128xf32, #tpu.memory_space<vmem>>, %arg21: memref<1x128xf32, #tpu.memory_space<vmem>>, %arg22: memref<2x1x128xbf16, #tpu.memory_space<vmem>>, %arg23: memref<1x128xf32, #tpu.memory_space<vmem>>, %arg24: memref<1x128xf32, #tpu.memory_space<vmem>>, %arg25: memref<1x128xf32, #tpu.memory_space<vmem>>, %arg26: memref<1x128xf32, #tpu.memory_space<vmem>>, %arg27: memref<128x128xbf16, #tpu.memory_space<vmem>>, %arg28: memref<128x256xbf16, #tpu.memory_space<vmem>>, %arg29: memref<128x128xbf16, #tpu.memory_space<vmem>>, %arg30: memref<128x128xbf16, #tpu.memory_space<vmem>>, %arg31: memref<128x128xbf16, #tpu.memory_space<vmem>>, %arg32: memref<1x128xf32, #tpu.memory_space<vmem>>, %arg33: memref<1x128xf32, #tpu.memory_space<vmem>>, %arg34: memref<1x128xf32, #tpu.memory_space<vmem>>, %arg35: memref<128x128xbf16, #tpu.memory_space<vmem>>, %arg36: memref<1x128xf32, #tpu.memory_space<vmem>>, %arg37: memref<1x128xf32, #tpu.memory_space<vmem>>, %arg38: memref<1x128xf32, #tpu.memory_space<vmem>>, %arg39: memref<1x128xf32, #tpu.memory_space<vmem>>, %arg40: memref<1x128xf32, #tpu.memory_space<vmem>>, %arg41: memref<128x128xbf16, #tpu.memory_space<vmem>>, %arg42: memref<1x128xf32, #tpu.memory_space<vmem>>, %arg43: memref<1x128xf32, #tpu.memory_space<vmem>>, %arg44: memref<1x128xf32, #tpu.memory_space<vmem>>, %arg45: memref<1x384xf32, #tpu.memory_space<vmem>>, %arg46: memref<2x1x128xbf16, #tpu.memory_space<vmem>>, %arg47: memref<1x128xf32, #tpu.memory_space<vmem>>, %arg48: memref<1x128xf32, #tpu.memory_space<vmem>>, %arg49: memref<1x128xf32, #tpu.memory_space<vmem>>, %arg50: memref<1x128xf32, #tpu.memory_space<vmem>>, %arg51: memref<128x128xbf16, #tpu.memory_space<vmem>>, %arg52: memref<128x128xbf16, #tpu.memory_space<vmem>>, %arg53: memref<128x128xbf16, #tpu.memory_space<vmem>>, %arg54: memref<128x384xbf16, #tpu.memory_space<vmem>>, %arg55: memref<1x128xf32, #tpu.memory_space<vmem>>, %arg56: memref<1x128xf32, #tpu.memory_space<vmem>>, %arg57: memref<1x128xf32, #tpu.memory_space<vmem>>, %arg58: memref<128x128xbf16, #tpu.memory_space<vmem>>, %arg59: memref<1x128xf32, #tpu.memory_space<vmem>>, %arg60: memref<1x128xf32, #tpu.memory_space<vmem>>, %arg61: memref<1x128xf32, #tpu.memory_space<vmem>>, %arg62: memref<128x128xbf16, #tpu.memory_space<vmem>>, %arg63: memref<128x128xbf16, #tpu.memory_space<vmem>>, %arg64: memref<128x128xf32, #tpu.memory_space<vmem>>, %arg65: memref<1x8x128xf32, #tpu.memory_space<vmem>>) attributes {dimension_semantics = [#tpu.dimension_semantics<parallel>], iteration_bounds = array<i64: 2>, scalar_prefetch = 0 : i64, scratch_operands = 0 : i64, tpu.core_type = #tpu.core_type<tc>, window_params = [{transform_indices = @transform_0, window_bounds = array<i64: 8, 1>}, {transform_indices = @transform_1, window_bounds = array<i64: 8, 1>}, {pipeline_mode = #tpu.pipeline_mode<synchronous>, transform_indices = @transform_2, window_bounds = array<i64: 16, 128>}, {pipeline_mode = #tpu.pipeline_mode<synchronous>, transform_indices = @transform_3, window_bounds = array<i64: 1, 128>}, {pipeline_mode = #tpu.pipeline_mode<synchronous>, transform_indices = @transform_4, window_bounds = array<i64: 1, 128>}, {pipeline_mode = #tpu.pipeline_mode<synchronous>, transform_indices = @transform_5, window_bounds = array<i64: 1, 128>}, {pipeline_mode = #tpu.pipeline_mode<synchronous>, transform_indices = @transform_6, window_bounds = array<i64: 1, 384>}, {pipeline_mode = #tpu.pipeline_mode<synchronous>, transform_indices = @transform_7, window_bounds = array<i64: 2, 1, 128>}, {pipeline_mode = #tpu.pipeline_mode<synchronous>, transform_indices = @transform_8, window_bounds = array<i64: 1, 128>}, {pipeline_mode = #tpu.pipeline_mode<synchronous>, transform_indices = @transform_9, window_bounds = array<i64: 1, 128>}, {pipeline_mode = #tpu.pipeline_mode<synchronous>, transform_indices = @transform_10, window_bounds = array<i64: 1, 128>}, {pipeline_mode = #tpu.pipeline_mode<synchronous>, transform_indices = @transform_11, window_bounds = array<i64: 1, 128>}, {pipeline_mode = #tpu.pipeline_mode<synchronous>, transform_indices = @transform_12, window_bounds = array<i64: 128, 128>}, {pipeline_mode = #tpu.pipeline_mode<synchronous>, transform_indices = @transform_13, window_bounds = array<i64: 128, 128>}, {pipeline_mode = #tpu.pipeline_mode<synchronous>, transform_indices = @transform_14, window_bounds = array<i64: 128, 128>}, {pipeline_mode = #tpu.pipeline_mode<synchronous>, transform_indices = @transform_15, window_bounds = array<i64: 128, 384>}, {pipeline_mode = #tpu.pipeline_mode<synchronous>, transform_indices = @transform_16, window_bounds = array<i64: 1, 128>}, {pipeline_mode = #tpu.pipeline_mode<synchronous>, transform_indices = @transform_17, window_bounds = array<i64: 1, 256>}, {pipeline_mode = #tpu.pipeline_mode<synchronous>, transform_indices = @transform_18, window_bounds = array<i64: 1, 128>}, {pipeline_mode = #tpu.pipeline_mode<synchronous>, transform_indices = @transform_19, window_bounds = array<i64: 1, 128>}, {pipeline_mode = #tpu.pipeline_mode<synchronous>, transform_indices = @transform_20, window_bounds = array<i64: 1, 128>}, {pipeline_mode = #tpu.pipeline_mode<synchronous>, transform_indices = @transform_21, window_bounds = array<i64: 2, 1, 128>}, {pipeline_mode = #tpu.pipeline_mode<synchronous>, transform_indices = @transform_22, window_bounds = array<i64: 1, 128>}, {pipeline_mode = #tpu.pipeline_mode<synchronous>, transform_indices = @transform_23, window_bounds = array<i64: 1, 128>}, {pipeline_mode = #tpu.pipeline_mode<synchronous>, transform_indices = @transform_24, window_bounds = array<i64: 1, 128>}, {pipeline_mode = #tpu.pipeline_mode<synchronous>, transform_indices = @transform_25, window_bounds = array<i64: 1, 128>}, {pipeline_mode = #tpu.pipeline_mode<synchronous>, transform_indices = @transform_26, window_bounds = array<i64: 128, 128>}, {pipeline_mode = #tpu.pipeline_mode<synchronous>, transform_indices = @transform_27, window_bounds = array<i64: 128, 256>}, {pipeline_mode = #tpu.pipeline_mode<synchronous>, transform_indices = @transform_28, window_bounds = array<i64: 128, 128>}, {pipeline_mode = #tpu.pipeline_mode<synchronous>, transform_indices = @transform_29, window_bounds = array<i64: 128, 128>}, {pipeline_mode = #tpu.pipeline_mode<synchronous>, transform_indices = @transform_30, window_bounds = array<i64: 128, 128>}, {pipeline_mode = #tpu.pipeline_mode<synchronous>, transform_indices = @transform_31, window_bounds = array<i64: 1, 128>}, {pipeline_mode = #tpu.pipeline_mode<synchronous>, transform_indices = @transform_32, window_bounds = array<i64: 1, 128>}, {pipeline_mode = #tpu.pipeline_mode<synchronous>, transform_indices = @transform_33, window_bounds = array<i64: 1, 128>}, {pipeline_mode = #tpu.pipeline_mode<synchronous>, transform_indices = @transform_34, window_bounds = array<i64: 128, 128>}, {pipeline_mode = #tpu.pipeline_mode<synchronous>, transform_indices = @transform_35, window_bounds = array<i64: 1, 128>}, {pipeline_mode = #tpu.pipeline_mode<synchronous>, transform_indices = @transform_36, window_bounds = array<i64: 1, 128>}, {pipeline_mode = #tpu.pipeline_mode<synchronous>, transform_indices = @transform_37, window_bounds = array<i64: 1, 128>}, {pipeline_mode = #tpu.pipeline_mode<synchronous>, transform_indices = @transform_38, window_bounds = array<i64: 1, 128>}, {pipeline_mode = #tpu.pipeline_mode<synchronous>, transform_indices = @transform_39, window_bounds = array<i64: 1, 128>}, {pipeline_mode = #tpu.pipeline_mode<synchronous>, transform_indices = @transform_40, window_bounds = array<i64: 128, 128>}, {pipeline_mode = #tpu.pipeline_mode<synchronous>, transform_indices = @transform_41, window_bounds = array<i64: 1, 128>}, {pipeline_mode = #tpu.pipeline_mode<synchronous>, transform_indices = @transform_42, window_bounds = array<i64: 1, 128>}, {pipeline_mode = #tpu.pipeline_mode<synchronous>, transform_indices = @transform_43, window_bounds = array<i64: 1, 128>}, {pipeline_mode = #tpu.pipeline_mode<synchronous>, transform_indices = @transform_44, window_bounds = array<i64: 1, 384>}, {pipeline_mode = #tpu.pipeline_mode<synchronous>, transform_indices = @transform_45, window_bounds = array<i64: 2, 1, 128>}, {pipeline_mode = #tpu.pipeline_mode<synchronous>, transform_indices = @transform_46, window_bounds = array<i64: 1, 128>}, {pipeline_mode = #tpu.pipeline_mode<synchronous>, transform_indices = @transform_47, window_bounds = array<i64: 1, 128>}, {pipeline_mode = #tpu.pipeline_mode<synchronous>, transform_indices = @transform_48, window_bounds = array<i64: 1, 128>}, {pipeline_mode = #tpu.pipeline_mode<synchronous>, transform_indices = @transform_49, window_bounds = array<i64: 1, 128>}, {pipeline_mode = #tpu.pipeline_mode<synchronous>, transform_indices = @transform_50, window_bounds = array<i64: 128, 128>}, {pipeline_mode = #tpu.pipeline_mode<synchronous>, transform_indices = @transform_51, window_bounds = array<i64: 128, 128>}, {pipeline_mode = #tpu.pipeline_mode<synchronous>, transform_indices = @transform_52, window_bounds = array<i64: 128, 128>}, {pipeline_mode = #tpu.pipeline_mode<synchronous>, transform_indices = @transform_53, window_bounds = array<i64: 128, 384>}, {pipeline_mode = #tpu.pipeline_mode<synchronous>, transform_indices = @transform_54, window_bounds = array<i64: 1, 128>}, {pipeline_mode = #tpu.pipeline_mode<synchronous>, transform_indices = @transform_55, window_bounds = array<i64: 1, 128>}, {pipeline_mode = #tpu.pipeline_mode<synchronous>, transform_indices = @transform_56, window_bounds = array<i64: 1, 128>}, {pipeline_mode = #tpu.pipeline_mode<synchronous>, transform_indices = @transform_57, window_bounds = array<i64: 128, 128>}, {pipeline_mode = #tpu.pipeline_mode<synchronous>, transform_indices = @transform_58, window_bounds = array<i64: 1, 128>}, {pipeline_mode = #tpu.pipeline_mode<synchronous>, transform_indices = @transform_59, window_bounds = array<i64: 1, 128>}, {pipeline_mode = #tpu.pipeline_mode<synchronous>, transform_indices = @transform_60, window_bounds = array<i64: 1, 128>}, {pipeline_mode = #tpu.pipeline_mode<synchronous>, transform_indices = @transform_61, window_bounds = array<i64: 128, 128>}, {pipeline_mode = #tpu.pipeline_mode<synchronous>, transform_indices = @transform_62, window_bounds = array<i64: 128, 128>}, {pipeline_mode = #tpu.pipeline_mode<synchronous>, transform_indices = @transform_63, window_bounds = array<i64: 128, 128>}, {transform_indices = @transform_64, window_bounds = array<i64: 1, 8, 128>}]} {
    %c0 = arith.constant 0 : index
    %c0_0 = arith.constant 0 : index
    %0 = vector.load %arg64[%c0, %c0_0] : memref<128x128xf32, #tpu.memory_space<vmem>>, vector<128x128xf32>
    %c0_1 = arith.constant 0 : index
    %c0_2 = arith.constant 0 : index
    %1 = vector.load %arg3[%c0_1, %c0_2] : memref<16x128xf32, #tpu.memory_space<vmem>>, vector<16x128xf32>
    %c0_3 = arith.constant 0 : index
    %c0_4 = arith.constant 0 : index
    %2 = vector.load %arg2[%c0_3, %c0_4] : memref<8x1xi32, #tpu.memory_space<vmem>>, vector<8x1xi32>
    %3 = tpu.iota {dimensions = array<i32: 1>} : vector<8x128xi32>
    %4 = vector.broadcast %2 : vector<8x1xi32> to vector<8x128xi32>
    %5 = arith.cmpi eq, %3, %4 : vector<8x128xi32>
    %6 = arith.extui %5 : vector<8x128xi1> to vector<8x128xi32>
    %7 = arith.sitofp %6 : vector<8x128xi32> to vector<8x128xf32>
    %cst = arith.constant dense<0.000000e+00> : vector<8x128xf32>
    %8 = tpu.matmul %7, %0, %cst {dimension_numbers = #tpu.dot_dimension_numbers<[1], [0], [0], [1], [0, 0, 1, 1], [], []>} : vector<8x128xf32>, vector<128x128xf32>, vector<8x128xf32> -> vector<8x128xf32>
    %9 = vector.extract_strided_slice %1 {offsets = [0, 0], sizes = [8, 128], strides = [1, 1]} : vector<16x128xf32> to vector<8x128xf32>
    %10 = arith.addf %8, %9 : vector<8x128xf32>
    %c0_5 = arith.constant 0 : index
    %c0_6 = arith.constant 0 : index
    %11 = vector.load %arg57[%c0_5, %c0_6] : memref<1x128xf32, #tpu.memory_space<vmem>>, vector<1x128xf32>
    %c0_7 = arith.constant 0 : index
    %c0_8 = arith.constant 0 : index
    %12 = vector.load %arg55[%c0_7, %c0_8] : memref<1x128xf32, #tpu.memory_space<vmem>>, vector<1x128xf32>
    %13 = tpu.iota {dimensions = array<i32: 1>} : vector<1x128xi32>
    %c32_i32 = arith.constant 32 : i32
    %14 = vector.broadcast %c32_i32 : i32 to vector<1x128xi32>
    %15 = arith.cmpi slt, %13, %14 : vector<1x128xi32>
    %16 = arith.extui %15 : vector<1x128xi1> to vector<1x128xi32>
    %17 = arith.sitofp %16 : vector<1x128xi32> to vector<1x128xf32>
    %cst_9 = arith.constant dense<0.000000e+00> : vector<8xf32>
    %18 = vector.multi_reduction <add>, %10, %cst_9 [1] : vector<8x128xf32> to vector<8xf32>
    %19 = vector.shape_cast %18 : vector<8xf32> to vector<8x1xf32>
    %cst_10 = arith.constant 3.125000e-02 : f32
    %20 = vector.broadcast %cst_10 : f32 to vector<8x1xf32>
    %21 = arith.mulf %19, %20 : vector<8x1xf32>
    %22 = vector.broadcast %21 : vector<8x1xf32> to vector<8x128xf32>
    %23 = arith.subf %10, %22 : vector<8x128xf32>
    %24 = vector.broadcast %17 : vector<1x128xf32> to vector<8x128xf32>
    %25 = arith.mulf %23, %24 : vector<8x128xf32>
    %26 = arith.mulf %25, %25 : vector<8x128xf32>
    %cst_11 = arith.constant dense<0.000000e+00> : vector<8xf32>
    %27 = vector.multi_reduction <add>, %26, %cst_11 [1] : vector<8x128xf32> to vector<8xf32>
    %28 = vector.shape_cast %27 : vector<8xf32> to vector<8x1xf32>
    %cst_12 = arith.constant 3.125000e-02 : f32
    %29 = vector.broadcast %cst_12 : f32 to vector<8x1xf32>
    %30 = arith.mulf %28, %29 : vector<8x1xf32>
    %cst_13 = arith.constant 9.99999974E-6 : f32
    %31 = vector.broadcast %cst_13 : f32 to vector<8x1xf32>
    %32 = arith.addf %30, %31 : vector<8x1xf32>
    %33 = math.rsqrt %32 : vector<8x1xf32>
    %34 = vector.broadcast %33 : vector<8x1xf32> to vector<8x128xf32>
    %35 = arith.mulf %25, %34 : vector<8x128xf32>
    %36 = vector.broadcast %11 : vector<1x128xf32> to vector<8x128xf32>
    %37 = arith.mulf %35, %36 : vector<8x128xf32>
    %38 = vector.broadcast %12 : vector<1x128xf32> to vector<8x128xf32>
    %39 = arith.addf %37, %38 : vector<8x128xf32>
    %c0_14 = arith.constant 0 : index
    %c0_15 = arith.constant 0 : index
    %40 = vector.load %arg58[%c0_14, %c0_15] : memref<128x128xbf16, #tpu.memory_space<vmem>>, vector<128x128xbf16>
    %41 = arith.truncf %39 : vector<8x128xf32> to vector<8x128xbf16>
    %cst_16 = arith.constant dense<0.000000e+00> : vector<8x128xf32>
    %42 = tpu.matmul %41, %40, %cst_16 {dimension_numbers = #tpu.dot_dimension_numbers<[1], [0], [0], [1], [0, 0, 1, 1], [], []>} : vector<8x128xbf16>, vector<128x128xbf16>, vector<8x128xf32> -> vector<8x128xf32>
    %c0_17 = arith.constant 0 : index
    %c0_18 = arith.constant 0 : index
    %43 = vector.load %arg56[%c0_17, %c0_18] : memref<1x128xf32, #tpu.memory_space<vmem>>, vector<1x128xf32>
    %44 = vector.broadcast %43 : vector<1x128xf32> to vector<8x128xf32>
    %45 = arith.addf %42, %44 : vector<8x128xf32>
    %c0_19 = arith.constant 0 : index
    %c0_20 = arith.constant 0 : index
    %46 = vector.load %arg48[%c0_19, %c0_20] : memref<1x128xf32, #tpu.memory_space<vmem>>, vector<1x128xf32>
    %c0_21 = arith.constant 0 : index
    %c0_22 = arith.constant 0 : index
    %47 = vector.load %arg47[%c0_21, %c0_22] : memref<1x128xf32, #tpu.memory_space<vmem>>, vector<1x128xf32>
    %48 = tpu.iota {dimensions = array<i32: 1>} : vector<1x128xi32>
    %c32_i32_23 = arith.constant 32 : i32
    %49 = vector.broadcast %c32_i32_23 : i32 to vector<1x128xi32>
    %50 = arith.cmpi slt, %48, %49 : vector<1x128xi32>
    %51 = arith.extui %50 : vector<1x128xi1> to vector<1x128xi32>
    %52 = arith.sitofp %51 : vector<1x128xi32> to vector<1x128xf32>
    %cst_24 = arith.constant dense<0.000000e+00> : vector<8xf32>
    %53 = vector.multi_reduction <add>, %45, %cst_24 [1] : vector<8x128xf32> to vector<8xf32>
    %54 = vector.shape_cast %53 : vector<8xf32> to vector<8x1xf32>
    %cst_25 = arith.constant 3.125000e-02 : f32
    %55 = vector.broadcast %cst_25 : f32 to vector<8x1xf32>
    %56 = arith.mulf %54, %55 : vector<8x1xf32>
    %57 = vector.broadcast %56 : vector<8x1xf32> to vector<8x128xf32>
    %58 = arith.subf %45, %57 : vector<8x128xf32>
    %59 = vector.broadcast %52 : vector<1x128xf32> to vector<8x128xf32>
    %60 = arith.mulf %58, %59 : vector<8x128xf32>
    %61 = arith.mulf %60, %60 : vector<8x128xf32>
    %cst_26 = arith.constant dense<0.000000e+00> : vector<8xf32>
    %62 = vector.multi_reduction <add>, %61, %cst_26 [1] : vector<8x128xf32> to vector<8xf32>
    %63 = vector.shape_cast %62 : vector<8xf32> to vector<8x1xf32>
    %cst_27 = arith.constant 3.125000e-02 : f32
    %64 = vector.broadcast %cst_27 : f32 to vector<8x1xf32>
    %65 = arith.mulf %63, %64 : vector<8x1xf32>
    %cst_28 = arith.constant 9.99999974E-6 : f32
    %66 = vector.broadcast %cst_28 : f32 to vector<8x1xf32>
    %67 = arith.addf %65, %66 : vector<8x1xf32>
    %68 = math.rsqrt %67 : vector<8x1xf32>
    %69 = vector.broadcast %68 : vector<8x1xf32> to vector<8x128xf32>
    %70 = arith.mulf %60, %69 : vector<8x128xf32>
    %71 = vector.broadcast %46 : vector<1x128xf32> to vector<8x128xf32>
    %72 = arith.mulf %70, %71 : vector<8x128xf32>
    %73 = vector.broadcast %47 : vector<1x128xf32> to vector<8x128xf32>
    %74 = arith.addf %72, %73 : vector<8x128xf32>
    %c0_29 = arith.constant 0 : index
    %c0_30 = arith.constant 0 : index
    %75 = vector.load %arg54[%c0_29, %c0_30] : memref<128x384xbf16, #tpu.memory_space<vmem>>, vector<128x384xbf16>
    %76 = arith.truncf %74 : vector<8x128xf32> to vector<8x128xbf16>
    %cst_31 = arith.constant dense<0.000000e+00> : vector<8x384xf32>
    %77 = tpu.matmul %76, %75, %cst_31 {dimension_numbers = #tpu.dot_dimension_numbers<[1], [0], [0], [1], [0, 0, 1, 1], [], []>} : vector<8x128xbf16>, vector<128x384xbf16>, vector<8x384xf32> -> vector<8x384xf32>
    %c0_32 = arith.constant 0 : index
    %c0_33 = arith.constant 0 : index
    %78 = vector.load %arg45[%c0_32, %c0_33] : memref<1x384xf32, #tpu.memory_space<vmem>>, vector<1x384xf32>
    %79 = vector.broadcast %78 : vector<1x384xf32> to vector<8x384xf32>
    %80 = arith.addf %77, %79 : vector<8x384xf32>
    %81 = vector.extract_strided_slice %80 {offsets = [0, 0], sizes = [8, 128], strides = [1, 1]} : vector<8x384xf32> to vector<8x128xf32>
    %82 = vector.extract_strided_slice %80 {offsets = [0, 128], sizes = [8, 128], strides = [1, 1]} : vector<8x384xf32> to vector<8x128xf32>
    %83 = vector.extract_strided_slice %80 {offsets = [0, 256], sizes = [8, 128], strides = [1, 1]} : vector<8x384xf32> to vector<8x128xf32>
    %c0_34 = arith.constant 0 : index
    %c0_35 = arith.constant 0 : index
    %c0_36 = arith.constant 0 : index
    %84 = vector.load %arg46[%c0_34, %c0_35, %c0_36] : memref<2x1x128xbf16, #tpu.memory_space<vmem>>, vector<2x1x128xbf16>
    %85 = arith.truncf %81 : vector<8x128xf32> to vector<8x128xbf16>
    %86 = arith.truncf %82 : vector<8x128xf32> to vector<8x128xbf16>
    %87 = arith.truncf %83 : vector<8x128xf32> to vector<8x128xbf16>
    %88 = vector.shape_cast %84 : vector<2x1x128xbf16> to vector<2x1x128xbf16>
    %89 = vector.broadcast %88 : vector<2x1x128xbf16> to vector<2x8x128xbf16>
    %90 = vector.shape_cast %86 : vector<8x128xbf16> to vector<1x8x128xbf16>
    %91 = vector.shape_cast %90 : vector<1x8x128xbf16> to vector<1x8x128xbf16>
    %92 = vector.broadcast %91 : vector<1x8x128xbf16> to vector<2x8x128xbf16>
    %93 = arith.mulf %92, %89 : vector<2x8x128xbf16>
    %94 = vector.shape_cast %87 : vector<8x128xbf16> to vector<1x8x128xbf16>
    %95 = vector.shape_cast %94 : vector<1x8x128xbf16> to vector<1x8x128xbf16>
    %96 = vector.broadcast %95 : vector<1x8x128xbf16> to vector<2x8x128xbf16>
    %97 = arith.mulf %96, %89 : vector<2x8x128xbf16>
    %98 = vector.shape_cast %85 : vector<8x128xbf16> to vector<1x8x128xbf16>
    %99 = vector.shape_cast %98 : vector<1x8x128xbf16> to vector<1x8x128xbf16>
    %100 = vector.broadcast %99 : vector<1x8x128xbf16> to vector<2x8x128xbf16>
    "tpu.trace_start"() <{level = 10 : i32, message = "hqd,hkd->hqk"}> : () -> ()
    %cst_37 = arith.constant dense<0.000000e+00> : vector<2x8x8xf32>
    %101 = tpu.matmul %100, %93, %cst_37 {dimension_numbers = #tpu.dot_dimension_numbers<[2], [2], [1], [1], [0, 0, 0, 1, 1, 1], [0], [0]>} : vector<2x8x128xbf16>, vector<2x8x128xbf16>, vector<2x8x8xf32> -> vector<2x8x8xf32>
    "tpu.trace_stop"() : () -> ()
    %cst_38 = arith.constant dense<0xFF800000> : vector<2x8xf32>
    %102 = vector.multi_reduction <maximumf>, %101, %cst_38 [2] : vector<2x8x8xf32> to vector<2x8xf32>
    %103 = vector.shape_cast %102 : vector<2x8xf32> to vector<2x8x1xf32>
    %104 = vector.broadcast %103 : vector<2x8x1xf32> to vector<2x8x8xf32>
    %105 = arith.subf %101, %104 : vector<2x8x8xf32>
    %106 = math.exp %105 : vector<2x8x8xf32>
    %cst_39 = arith.constant dense<0.000000e+00> : vector<2x8xf32>
    %107 = vector.multi_reduction <add>, %106, %cst_39 [2] : vector<2x8x8xf32> to vector<2x8xf32>
    %108 = vector.shape_cast %107 : vector<2x8xf32> to vector<2x8x1xf32>
    %109 = vector.broadcast %108 : vector<2x8x1xf32> to vector<2x8x8xf32>
    %110 = arith.divf %106, %109 : vector<2x8x8xf32>
    %111 = arith.truncf %110 : vector<2x8x8xf32> to vector<2x8x8xbf16>
    "tpu.trace_start"() <{level = 10 : i32, message = "hqk,hkd->hqd"}> : () -> ()
    %cst_40 = arith.constant dense<0.000000e+00> : vector<2x8x128xf32>
    %112 = tpu.matmul %111, %97, %cst_40 {dimension_numbers = #tpu.dot_dimension_numbers<[2], [1], [1], [2], [0, 0, 0, 1, 1, 2], [0], [0]>} : vector<2x8x8xbf16>, vector<2x8x128xbf16>, vector<2x8x128xf32> -> vector<2x8x128xf32>
    "tpu.trace_stop"() : () -> ()
    %cst_41 = arith.constant dense<0.000000e+00> : vector<8x128xf32>
    %113 = vector.multi_reduction <add>, %112, %cst_41 [0] : vector<2x8x128xf32> to vector<8x128xf32>
    %c0_42 = arith.constant 0 : index
    %c0_43 = arith.constant 0 : index
    %114 = vector.load %arg53[%c0_42, %c0_43] : memref<128x128xbf16, #tpu.memory_space<vmem>>, vector<128x128xbf16>
    %115 = arith.truncf %113 : vector<8x128xf32> to vector<8x128xbf16>
    %cst_44 = arith.constant dense<0.000000e+00> : vector<8x128xf32>
    %116 = tpu.matmul %115, %114, %cst_44 {dimension_numbers = #tpu.dot_dimension_numbers<[1], [0], [0], [1], [0, 0, 1, 1], [], []>} : vector<8x128xbf16>, vector<128x128xbf16>, vector<8x128xf32> -> vector<8x128xf32>
    %117 = arith.addf %45, %116 : vector<8x128xf32>
    %c0_45 = arith.constant 0 : index
    %c0_46 = arith.constant 0 : index
    %118 = vector.load %arg44[%c0_45, %c0_46] : memref<1x128xf32, #tpu.memory_space<vmem>>, vector<1x128xf32>
    %119 = vector.broadcast %118 : vector<1x128xf32> to vector<8x128xf32>
    %120 = arith.addf %117, %119 : vector<8x128xf32>
    %c0_47 = arith.constant 0 : index
    %c0_48 = arith.constant 0 : index
    %121 = vector.load %arg50[%c0_47, %c0_48] : memref<1x128xf32, #tpu.memory_space<vmem>>, vector<1x128xf32>
    %c0_49 = arith.constant 0 : index
    %c0_50 = arith.constant 0 : index
    %122 = vector.load %arg49[%c0_49, %c0_50] : memref<1x128xf32, #tpu.memory_space<vmem>>, vector<1x128xf32>
    %123 = tpu.iota {dimensions = array<i32: 1>} : vector<1x128xi32>
    %c32_i32_51 = arith.constant 32 : i32
    %124 = vector.broadcast %c32_i32_51 : i32 to vector<1x128xi32>
    %125 = arith.cmpi slt, %123, %124 : vector<1x128xi32>
    %126 = arith.extui %125 : vector<1x128xi1> to vector<1x128xi32>
    %127 = arith.sitofp %126 : vector<1x128xi32> to vector<1x128xf32>
    %cst_52 = arith.constant dense<0.000000e+00> : vector<8xf32>
    %128 = vector.multi_reduction <add>, %120, %cst_52 [1] : vector<8x128xf32> to vector<8xf32>
    %129 = vector.shape_cast %128 : vector<8xf32> to vector<8x1xf32>
    %cst_53 = arith.constant 3.125000e-02 : f32
    %130 = vector.broadcast %cst_53 : f32 to vector<8x1xf32>
    %131 = arith.mulf %129, %130 : vector<8x1xf32>
    %132 = vector.broadcast %131 : vector<8x1xf32> to vector<8x128xf32>
    %133 = arith.subf %120, %132 : vector<8x128xf32>
    %134 = vector.broadcast %127 : vector<1x128xf32> to vector<8x128xf32>
    %135 = arith.mulf %133, %134 : vector<8x128xf32>
    %136 = arith.mulf %135, %135 : vector<8x128xf32>
    %cst_54 = arith.constant dense<0.000000e+00> : vector<8xf32>
    %137 = vector.multi_reduction <add>, %136, %cst_54 [1] : vector<8x128xf32> to vector<8xf32>
    %138 = vector.shape_cast %137 : vector<8xf32> to vector<8x1xf32>
    %cst_55 = arith.constant 3.125000e-02 : f32
    %139 = vector.broadcast %cst_55 : f32 to vector<8x1xf32>
    %140 = arith.mulf %138, %139 : vector<8x1xf32>
    %cst_56 = arith.constant 9.99999974E-6 : f32
    %141 = vector.broadcast %cst_56 : f32 to vector<8x1xf32>
    %142 = arith.addf %140, %141 : vector<8x1xf32>
    %143 = math.rsqrt %142 : vector<8x1xf32>
    %144 = vector.broadcast %143 : vector<8x1xf32> to vector<8x128xf32>
    %145 = arith.mulf %135, %144 : vector<8x128xf32>
    %146 = vector.broadcast %121 : vector<1x128xf32> to vector<8x128xf32>
    %147 = arith.mulf %145, %146 : vector<8x128xf32>
    %148 = vector.broadcast %122 : vector<1x128xf32> to vector<8x128xf32>
    %149 = arith.addf %147, %148 : vector<8x128xf32>
    %c0_57 = arith.constant 0 : index
    %c0_58 = arith.constant 0 : index
    %150 = vector.load %arg51[%c0_57, %c0_58] : memref<128x128xbf16, #tpu.memory_space<vmem>>, vector<128x128xbf16>
    %151 = arith.truncf %149 : vector<8x128xf32> to vector<8x128xbf16>
    %cst_59 = arith.constant dense<0.000000e+00> : vector<8x128xf32>
    %152 = tpu.matmul %151, %150, %cst_59 {dimension_numbers = #tpu.dot_dimension_numbers<[1], [0], [0], [1], [0, 0, 1, 1], [], []>} : vector<8x128xbf16>, vector<128x128xbf16>, vector<8x128xf32> -> vector<8x128xf32>
    %c0_60 = arith.constant 0 : index
    %c0_61 = arith.constant 0 : index
    %153 = vector.load %arg42[%c0_60, %c0_61] : memref<1x128xf32, #tpu.memory_space<vmem>>, vector<1x128xf32>
    %154 = vector.broadcast %153 : vector<1x128xf32> to vector<8x128xf32>
    %155 = arith.addf %152, %154 : vector<8x128xf32>
    %cst_62 = arith.constant 5.000000e-01 : f32
    %156 = vector.broadcast %cst_62 : f32 to vector<8x128xf32>
    %157 = arith.mulf %156, %155 : vector<8x128xf32>
    %cst_63 = arith.constant 0.707106769 : f32
    %158 = vector.broadcast %cst_63 : f32 to vector<8x128xf32>
    %159 = arith.mulf %155, %158 : vector<8x128xf32>
    %160 = math.erf %159 : vector<8x128xf32>
    %cst_64 = arith.constant 1.000000e+00 : f32
    %161 = vector.broadcast %cst_64 : f32 to vector<8x128xf32>
    %162 = arith.addf %161, %160 : vector<8x128xf32>
    %163 = arith.mulf %157, %162 : vector<8x128xf32>
    %c0_65 = arith.constant 0 : index
    %c0_66 = arith.constant 0 : index
    %164 = vector.load %arg52[%c0_65, %c0_66] : memref<128x128xbf16, #tpu.memory_space<vmem>>, vector<128x128xbf16>
    %165 = arith.truncf %163 : vector<8x128xf32> to vector<8x128xbf16>
    %cst_67 = arith.constant dense<0.000000e+00> : vector<8x128xf32>
    %166 = tpu.matmul %165, %164, %cst_67 {dimension_numbers = #tpu.dot_dimension_numbers<[1], [0], [0], [1], [0, 0, 1, 1], [], []>} : vector<8x128xbf16>, vector<128x128xbf16>, vector<8x128xf32> -> vector<8x128xf32>
    %167 = arith.addf %120, %166 : vector<8x128xf32>
    %c0_68 = arith.constant 0 : index
    %c0_69 = arith.constant 0 : index
    %168 = vector.load %arg43[%c0_68, %c0_69] : memref<1x128xf32, #tpu.memory_space<vmem>>, vector<1x128xf32>
    %169 = vector.broadcast %168 : vector<1x128xf32> to vector<8x128xf32>
    %170 = arith.addf %167, %169 : vector<8x128xf32>
    %c0_70 = arith.constant 0 : index
    %c0_71 = arith.constant 0 : index
    %171 = vector.load %arg61[%c0_70, %c0_71] : memref<1x128xf32, #tpu.memory_space<vmem>>, vector<1x128xf32>
    %c0_72 = arith.constant 0 : index
    %c0_73 = arith.constant 0 : index
    %172 = vector.load %arg59[%c0_72, %c0_73] : memref<1x128xf32, #tpu.memory_space<vmem>>, vector<1x128xf32>
    %173 = tpu.iota {dimensions = array<i32: 1>} : vector<1x128xi32>
    %c32_i32_74 = arith.constant 32 : i32
    %174 = vector.broadcast %c32_i32_74 : i32 to vector<1x128xi32>
    %175 = arith.cmpi slt, %173, %174 : vector<1x128xi32>
    %176 = arith.extui %175 : vector<1x128xi1> to vector<1x128xi32>
    %177 = arith.sitofp %176 : vector<1x128xi32> to vector<1x128xf32>
    %cst_75 = arith.constant dense<0.000000e+00> : vector<8xf32>
    %178 = vector.multi_reduction <add>, %170, %cst_75 [1] : vector<8x128xf32> to vector<8xf32>
    %179 = vector.shape_cast %178 : vector<8xf32> to vector<8x1xf32>
    %cst_76 = arith.constant 3.125000e-02 : f32
    %180 = vector.broadcast %cst_76 : f32 to vector<8x1xf32>
    %181 = arith.mulf %179, %180 : vector<8x1xf32>
    %182 = vector.broadcast %181 : vector<8x1xf32> to vector<8x128xf32>
    %183 = arith.subf %170, %182 : vector<8x128xf32>
    %184 = vector.broadcast %177 : vector<1x128xf32> to vector<8x128xf32>
    %185 = arith.mulf %183, %184 : vector<8x128xf32>
    %186 = arith.mulf %185, %185 : vector<8x128xf32>
    %cst_77 = arith.constant dense<0.000000e+00> : vector<8xf32>
    %187 = vector.multi_reduction <add>, %186, %cst_77 [1] : vector<8x128xf32> to vector<8xf32>
    %188 = vector.shape_cast %187 : vector<8xf32> to vector<8x1xf32>
    %cst_78 = arith.constant 3.125000e-02 : f32
    %189 = vector.broadcast %cst_78 : f32 to vector<8x1xf32>
    %190 = arith.mulf %188, %189 : vector<8x1xf32>
    %cst_79 = arith.constant 9.99999974E-6 : f32
    %191 = vector.broadcast %cst_79 : f32 to vector<8x1xf32>
    %192 = arith.addf %190, %191 : vector<8x1xf32>
    %193 = math.rsqrt %192 : vector<8x1xf32>
    %194 = vector.broadcast %193 : vector<8x1xf32> to vector<8x128xf32>
    %195 = arith.mulf %185, %194 : vector<8x128xf32>
    %196 = vector.broadcast %171 : vector<1x128xf32> to vector<8x128xf32>
    %197 = arith.mulf %195, %196 : vector<8x128xf32>
    %198 = vector.broadcast %172 : vector<1x128xf32> to vector<8x128xf32>
    %199 = arith.addf %197, %198 : vector<8x128xf32>
    %c0_80 = arith.constant 0 : index
    %c0_81 = arith.constant 0 : index
    %200 = vector.load %arg62[%c0_80, %c0_81] : memref<128x128xbf16, #tpu.memory_space<vmem>>, vector<128x128xbf16>
    %201 = arith.truncf %199 : vector<8x128xf32> to vector<8x128xbf16>
    %cst_82 = arith.constant dense<0.000000e+00> : vector<8x128xf32>
    %202 = tpu.matmul %201, %200, %cst_82 {dimension_numbers = #tpu.dot_dimension_numbers<[1], [0], [0], [1], [0, 0, 1, 1], [], []>} : vector<8x128xbf16>, vector<128x128xbf16>, vector<8x128xf32> -> vector<8x128xf32>
    %c0_83 = arith.constant 0 : index
    %c0_84 = arith.constant 0 : index
    %203 = vector.load %arg60[%c0_83, %c0_84] : memref<1x128xf32, #tpu.memory_space<vmem>>, vector<1x128xf32>
    %204 = vector.broadcast %203 : vector<1x128xf32> to vector<8x128xf32>
    %205 = arith.addf %202, %204 : vector<8x128xf32>
    %c0_85 = arith.constant 0 : index
    %c0_86 = arith.constant 0 : index
    %206 = vector.load %arg1[%c0_85, %c0_86] : memref<8x1xi32, #tpu.memory_space<vmem>>, vector<8x1xi32>
    %207 = tpu.iota {dimensions = array<i32: 1>} : vector<8x128xi32>
    %208 = vector.broadcast %206 : vector<8x1xi32> to vector<8x128xi32>
    %209 = arith.cmpi eq, %207, %208 : vector<8x128xi32>
    %210 = arith.extui %209 : vector<8x128xi1> to vector<8x128xi32>
    %211 = arith.sitofp %210 : vector<8x128xi32> to vector<8x128xf32>
    %cst_87 = arith.constant dense<0.000000e+00> : vector<8x128xf32>
    %212 = tpu.matmul %211, %0, %cst_87 {dimension_numbers = #tpu.dot_dimension_numbers<[1], [0], [0], [1], [0, 0, 1, 1], [], []>} : vector<8x128xf32>, vector<128x128xf32>, vector<8x128xf32> -> vector<8x128xf32>
    %213 = vector.extract_strided_slice %1 {offsets = [0, 0], sizes = [8, 128], strides = [1, 1]} : vector<16x128xf32> to vector<8x128xf32>
    %214 = arith.addf %212, %213 : vector<8x128xf32>
    %c0_88 = arith.constant 0 : index
    %c0_89 = arith.constant 0 : index
    %215 = vector.load %arg34[%c0_88, %c0_89] : memref<1x128xf32, #tpu.memory_space<vmem>>, vector<1x128xf32>
    %c0_90 = arith.constant 0 : index
    %c0_91 = arith.constant 0 : index
    %216 = vector.load %arg32[%c0_90, %c0_91] : memref<1x128xf32, #tpu.memory_space<vmem>>, vector<1x128xf32>
    %217 = tpu.iota {dimensions = array<i32: 1>} : vector<1x128xi32>
    %c32_i32_92 = arith.constant 32 : i32
    %218 = vector.broadcast %c32_i32_92 : i32 to vector<1x128xi32>
    %219 = arith.cmpi slt, %217, %218 : vector<1x128xi32>
    %220 = arith.extui %219 : vector<1x128xi1> to vector<1x128xi32>
    %221 = arith.sitofp %220 : vector<1x128xi32> to vector<1x128xf32>
    %cst_93 = arith.constant dense<0.000000e+00> : vector<8xf32>
    %222 = vector.multi_reduction <add>, %214, %cst_93 [1] : vector<8x128xf32> to vector<8xf32>
    %223 = vector.shape_cast %222 : vector<8xf32> to vector<8x1xf32>
    %cst_94 = arith.constant 3.125000e-02 : f32
    %224 = vector.broadcast %cst_94 : f32 to vector<8x1xf32>
    %225 = arith.mulf %223, %224 : vector<8x1xf32>
    %226 = vector.broadcast %225 : vector<8x1xf32> to vector<8x128xf32>
    %227 = arith.subf %214, %226 : vector<8x128xf32>
    %228 = vector.broadcast %221 : vector<1x128xf32> to vector<8x128xf32>
    %229 = arith.mulf %227, %228 : vector<8x128xf32>
    %230 = arith.mulf %229, %229 : vector<8x128xf32>
    %cst_95 = arith.constant dense<0.000000e+00> : vector<8xf32>
    %231 = vector.multi_reduction <add>, %230, %cst_95 [1] : vector<8x128xf32> to vector<8xf32>
    %232 = vector.shape_cast %231 : vector<8xf32> to vector<8x1xf32>
    %cst_96 = arith.constant 3.125000e-02 : f32
    %233 = vector.broadcast %cst_96 : f32 to vector<8x1xf32>
    %234 = arith.mulf %232, %233 : vector<8x1xf32>
    %cst_97 = arith.constant 9.99999974E-6 : f32
    %235 = vector.broadcast %cst_97 : f32 to vector<8x1xf32>
    %236 = arith.addf %234, %235 : vector<8x1xf32>
    %237 = math.rsqrt %236 : vector<8x1xf32>
    %238 = vector.broadcast %237 : vector<8x1xf32> to vector<8x128xf32>
    %239 = arith.mulf %229, %238 : vector<8x128xf32>
    %240 = vector.broadcast %215 : vector<1x128xf32> to vector<8x128xf32>
    %241 = arith.mulf %239, %240 : vector<8x128xf32>
    %242 = vector.broadcast %216 : vector<1x128xf32> to vector<8x128xf32>
    %243 = arith.addf %241, %242 : vector<8x128xf32>
    %c0_98 = arith.constant 0 : index
    %c0_99 = arith.constant 0 : index
    %244 = vector.load %arg35[%c0_98, %c0_99] : memref<128x128xbf16, #tpu.memory_space<vmem>>, vector<128x128xbf16>
    %245 = arith.truncf %243 : vector<8x128xf32> to vector<8x128xbf16>
    %cst_100 = arith.constant dense<0.000000e+00> : vector<8x128xf32>
    %246 = tpu.matmul %245, %244, %cst_100 {dimension_numbers = #tpu.dot_dimension_numbers<[1], [0], [0], [1], [0, 0, 1, 1], [], []>} : vector<8x128xbf16>, vector<128x128xbf16>, vector<8x128xf32> -> vector<8x128xf32>
    %c0_101 = arith.constant 0 : index
    %c0_102 = arith.constant 0 : index
    %247 = vector.load %arg33[%c0_101, %c0_102] : memref<1x128xf32, #tpu.memory_space<vmem>>, vector<1x128xf32>
    %248 = vector.broadcast %247 : vector<1x128xf32> to vector<8x128xf32>
    %249 = arith.addf %246, %248 : vector<8x128xf32>
    %c0_103 = arith.constant 0 : index
    %c0_104 = arith.constant 0 : index
    %250 = vector.load %arg10[%c0_103, %c0_104] : memref<1x128xf32, #tpu.memory_space<vmem>>, vector<1x128xf32>
    %c0_105 = arith.constant 0 : index
    %c0_106 = arith.constant 0 : index
    %251 = vector.load %arg9[%c0_105, %c0_106] : memref<1x128xf32, #tpu.memory_space<vmem>>, vector<1x128xf32>
    %252 = tpu.iota {dimensions = array<i32: 1>} : vector<1x128xi32>
    %c32_i32_107 = arith.constant 32 : i32
    %253 = vector.broadcast %c32_i32_107 : i32 to vector<1x128xi32>
    %254 = arith.cmpi slt, %252, %253 : vector<1x128xi32>
    %255 = arith.extui %254 : vector<1x128xi1> to vector<1x128xi32>
    %256 = arith.sitofp %255 : vector<1x128xi32> to vector<1x128xf32>
    %cst_108 = arith.constant dense<0.000000e+00> : vector<8xf32>
    %257 = vector.multi_reduction <add>, %249, %cst_108 [1] : vector<8x128xf32> to vector<8xf32>
    %258 = vector.shape_cast %257 : vector<8xf32> to vector<8x1xf32>
    %cst_109 = arith.constant 3.125000e-02 : f32
    %259 = vector.broadcast %cst_109 : f32 to vector<8x1xf32>
    %260 = arith.mulf %258, %259 : vector<8x1xf32>
    %261 = vector.broadcast %260 : vector<8x1xf32> to vector<8x128xf32>
    %262 = arith.subf %249, %261 : vector<8x128xf32>
    %263 = vector.broadcast %256 : vector<1x128xf32> to vector<8x128xf32>
    %264 = arith.mulf %262, %263 : vector<8x128xf32>
    %265 = arith.mulf %264, %264 : vector<8x128xf32>
    %cst_110 = arith.constant dense<0.000000e+00> : vector<8xf32>
    %266 = vector.multi_reduction <add>, %265, %cst_110 [1] : vector<8x128xf32> to vector<8xf32>
    %267 = vector.shape_cast %266 : vector<8xf32> to vector<8x1xf32>
    %cst_111 = arith.constant 3.125000e-02 : f32
    %268 = vector.broadcast %cst_111 : f32 to vector<8x1xf32>
    %269 = arith.mulf %267, %268 : vector<8x1xf32>
    %cst_112 = arith.constant 9.99999974E-6 : f32
    %270 = vector.broadcast %cst_112 : f32 to vector<8x1xf32>
    %271 = arith.addf %269, %270 : vector<8x1xf32>
    %272 = math.rsqrt %271 : vector<8x1xf32>
    %273 = vector.broadcast %272 : vector<8x1xf32> to vector<8x128xf32>
    %274 = arith.mulf %264, %273 : vector<8x128xf32>
    %275 = vector.broadcast %250 : vector<1x128xf32> to vector<8x128xf32>
    %276 = arith.mulf %274, %275 : vector<8x128xf32>
    %277 = vector.broadcast %251 : vector<1x128xf32> to vector<8x128xf32>
    %278 = arith.addf %276, %277 : vector<8x128xf32>
    %c0_113 = arith.constant 0 : index
    %c0_114 = arith.constant 0 : index
    %279 = vector.load %arg16[%c0_113, %c0_114] : memref<128x384xbf16, #tpu.memory_space<vmem>>, vector<128x384xbf16>
    %280 = arith.truncf %278 : vector<8x128xf32> to vector<8x128xbf16>
    %cst_115 = arith.constant dense<0.000000e+00> : vector<8x384xf32>
    %281 = tpu.matmul %280, %279, %cst_115 {dimension_numbers = #tpu.dot_dimension_numbers<[1], [0], [0], [1], [0, 0, 1, 1], [], []>} : vector<8x128xbf16>, vector<128x384xbf16>, vector<8x384xf32> -> vector<8x384xf32>
    %c0_116 = arith.constant 0 : index
    %c0_117 = arith.constant 0 : index
    %282 = vector.load %arg7[%c0_116, %c0_117] : memref<1x384xf32, #tpu.memory_space<vmem>>, vector<1x384xf32>
    %283 = vector.broadcast %282 : vector<1x384xf32> to vector<8x384xf32>
    %284 = arith.addf %281, %283 : vector<8x384xf32>
    %285 = vector.extract_strided_slice %284 {offsets = [0, 0], sizes = [8, 128], strides = [1, 1]} : vector<8x384xf32> to vector<8x128xf32>
    %286 = vector.extract_strided_slice %284 {offsets = [0, 128], sizes = [8, 128], strides = [1, 1]} : vector<8x384xf32> to vector<8x128xf32>
    %287 = vector.extract_strided_slice %284 {offsets = [0, 256], sizes = [8, 128], strides = [1, 1]} : vector<8x384xf32> to vector<8x128xf32>
    %c0_118 = arith.constant 0 : index
    %c0_119 = arith.constant 0 : index
    %c0_120 = arith.constant 0 : index
    %288 = vector.load %arg8[%c0_118, %c0_119, %c0_120] : memref<2x1x128xbf16, #tpu.memory_space<vmem>>, vector<2x1x128xbf16>
    %289 = arith.truncf %285 : vector<8x128xf32> to vector<8x128xbf16>
    %290 = arith.truncf %286 : vector<8x128xf32> to vector<8x128xbf16>
    %291 = arith.truncf %287 : vector<8x128xf32> to vector<8x128xbf16>
    %292 = vector.shape_cast %288 : vector<2x1x128xbf16> to vector<2x1x128xbf16>
    %293 = vector.broadcast %292 : vector<2x1x128xbf16> to vector<2x8x128xbf16>
    %294 = vector.shape_cast %290 : vector<8x128xbf16> to vector<1x8x128xbf16>
    %295 = vector.shape_cast %294 : vector<1x8x128xbf16> to vector<1x8x128xbf16>
    %296 = vector.broadcast %295 : vector<1x8x128xbf16> to vector<2x8x128xbf16>
    %297 = arith.mulf %296, %293 : vector<2x8x128xbf16>
    %298 = vector.shape_cast %291 : vector<8x128xbf16> to vector<1x8x128xbf16>
    %299 = vector.shape_cast %298 : vector<1x8x128xbf16> to vector<1x8x128xbf16>
    %300 = vector.broadcast %299 : vector<1x8x128xbf16> to vector<2x8x128xbf16>
    %301 = arith.mulf %300, %293 : vector<2x8x128xbf16>
    %302 = vector.shape_cast %289 : vector<8x128xbf16> to vector<1x8x128xbf16>
    %303 = vector.shape_cast %302 : vector<1x8x128xbf16> to vector<1x8x128xbf16>
    %304 = vector.broadcast %303 : vector<1x8x128xbf16> to vector<2x8x128xbf16>
    "tpu.trace_start"() <{level = 10 : i32, message = "hqd,hkd->hqk"}> : () -> ()
    %cst_121 = arith.constant dense<0.000000e+00> : vector<2x8x8xf32>
    %305 = tpu.matmul %304, %297, %cst_121 {dimension_numbers = #tpu.dot_dimension_numbers<[2], [2], [1], [1], [0, 0, 0, 1, 1, 1], [0], [0]>} : vector<2x8x128xbf16>, vector<2x8x128xbf16>, vector<2x8x8xf32> -> vector<2x8x8xf32>
    "tpu.trace_stop"() : () -> ()
    %306 = tpu.iota {dimensions = array<i32: 0>} : vector<8x8xi32>
    %307 = tpu.iota {dimensions = array<i32: 1>} : vector<8x8xi32>
    %308 = arith.cmpi sle, %307, %306 : vector<8x8xi32>
    %cst_122 = arith.constant 0.000000e+00 : f32
    %cst_123 = arith.constant -1.000000e+30 : f32
    %309 = vector.broadcast %cst_122 : f32 to vector<8x8xf32>
    %310 = vector.broadcast %cst_123 : f32 to vector<8x8xf32>
    %311 = arith.select %308, %309, %310 : vector<8x8xi1>, vector<8x8xf32>
    %312 = vector.shape_cast %311 : vector<8x8xf32> to vector<1x8x8xf32>
    %313 = vector.broadcast %312 : vector<1x8x8xf32> to vector<2x8x8xf32>
    %314 = arith.addf %305, %313 : vector<2x8x8xf32>
    %cst_124 = arith.constant dense<0xFF800000> : vector<2x8xf32>
    %315 = vector.multi_reduction <maximumf>, %314, %cst_124 [2] : vector<2x8x8xf32> to vector<2x8xf32>
    %316 = vector.shape_cast %315 : vector<2x8xf32> to vector<2x8x1xf32>
    %317 = vector.broadcast %316 : vector<2x8x1xf32> to vector<2x8x8xf32>
    %318 = arith.subf %314, %317 : vector<2x8x8xf32>
    %319 = math.exp %318 : vector<2x8x8xf32>
    %cst_125 = arith.constant dense<0.000000e+00> : vector<2x8xf32>
    %320 = vector.multi_reduction <add>, %319, %cst_125 [2] : vector<2x8x8xf32> to vector<2x8xf32>
    %321 = vector.shape_cast %320 : vector<2x8xf32> to vector<2x8x1xf32>
    %322 = vector.broadcast %321 : vector<2x8x1xf32> to vector<2x8x8xf32>
    %323 = arith.divf %319, %322 : vector<2x8x8xf32>
    %324 = arith.truncf %323 : vector<2x8x8xf32> to vector<2x8x8xbf16>
    "tpu.trace_start"() <{level = 10 : i32, message = "hqk,hkd->hqd"}> : () -> ()
    %cst_126 = arith.constant dense<0.000000e+00> : vector<2x8x128xf32>
    %325 = tpu.matmul %324, %301, %cst_126 {dimension_numbers = #tpu.dot_dimension_numbers<[2], [1], [1], [2], [0, 0, 0, 1, 1, 2], [0], [0]>} : vector<2x8x8xbf16>, vector<2x8x128xbf16>, vector<2x8x128xf32> -> vector<2x8x128xf32>
    "tpu.trace_stop"() : () -> ()
    %cst_127 = arith.constant dense<0.000000e+00> : vector<8x128xf32>
    %326 = vector.multi_reduction <add>, %325, %cst_127 [0] : vector<2x8x128xf32> to vector<8x128xf32>
    %c0_128 = arith.constant 0 : index
    %c0_129 = arith.constant 0 : index
    %327 = vector.load %arg15[%c0_128, %c0_129] : memref<128x128xbf16, #tpu.memory_space<vmem>>, vector<128x128xbf16>
    %328 = arith.truncf %326 : vector<8x128xf32> to vector<8x128xbf16>
    %cst_130 = arith.constant dense<0.000000e+00> : vector<8x128xf32>
    %329 = tpu.matmul %328, %327, %cst_130 {dimension_numbers = #tpu.dot_dimension_numbers<[1], [0], [0], [1], [0, 0, 1, 1], [], []>} : vector<8x128xbf16>, vector<128x128xbf16>, vector<8x128xf32> -> vector<8x128xf32>
    %330 = arith.addf %249, %329 : vector<8x128xf32>
    %c0_131 = arith.constant 0 : index
    %c0_132 = arith.constant 0 : index
    %331 = vector.load %arg6[%c0_131, %c0_132] : memref<1x128xf32, #tpu.memory_space<vmem>>, vector<1x128xf32>
    %332 = vector.broadcast %331 : vector<1x128xf32> to vector<8x128xf32>
    %333 = arith.addf %330, %332 : vector<8x128xf32>
    %c0_133 = arith.constant 0 : index
    %c0_134 = arith.constant 0 : index
    %334 = vector.load %arg12[%c0_133, %c0_134] : memref<1x128xf32, #tpu.memory_space<vmem>>, vector<1x128xf32>
    %c0_135 = arith.constant 0 : index
    %c0_136 = arith.constant 0 : index
    %335 = vector.load %arg11[%c0_135, %c0_136] : memref<1x128xf32, #tpu.memory_space<vmem>>, vector<1x128xf32>
    %336 = tpu.iota {dimensions = array<i32: 1>} : vector<1x128xi32>
    %c32_i32_137 = arith.constant 32 : i32
    %337 = vector.broadcast %c32_i32_137 : i32 to vector<1x128xi32>
    %338 = arith.cmpi slt, %336, %337 : vector<1x128xi32>
    %339 = arith.extui %338 : vector<1x128xi1> to vector<1x128xi32>
    %340 = arith.sitofp %339 : vector<1x128xi32> to vector<1x128xf32>
    %cst_138 = arith.constant dense<0.000000e+00> : vector<8xf32>
    %341 = vector.multi_reduction <add>, %333, %cst_138 [1] : vector<8x128xf32> to vector<8xf32>
    %342 = vector.shape_cast %341 : vector<8xf32> to vector<8x1xf32>
    %cst_139 = arith.constant 3.125000e-02 : f32
    %343 = vector.broadcast %cst_139 : f32 to vector<8x1xf32>
    %344 = arith.mulf %342, %343 : vector<8x1xf32>
    %345 = vector.broadcast %344 : vector<8x1xf32> to vector<8x128xf32>
    %346 = arith.subf %333, %345 : vector<8x128xf32>
    %347 = vector.broadcast %340 : vector<1x128xf32> to vector<8x128xf32>
    %348 = arith.mulf %346, %347 : vector<8x128xf32>
    %349 = arith.mulf %348, %348 : vector<8x128xf32>
    %cst_140 = arith.constant dense<0.000000e+00> : vector<8xf32>
    %350 = vector.multi_reduction <add>, %349, %cst_140 [1] : vector<8x128xf32> to vector<8xf32>
    %351 = vector.shape_cast %350 : vector<8xf32> to vector<8x1xf32>
    %cst_141 = arith.constant 3.125000e-02 : f32
    %352 = vector.broadcast %cst_141 : f32 to vector<8x1xf32>
    %353 = arith.mulf %351, %352 : vector<8x1xf32>
    %cst_142 = arith.constant 9.99999974E-6 : f32
    %354 = vector.broadcast %cst_142 : f32 to vector<8x1xf32>
    %355 = arith.addf %353, %354 : vector<8x1xf32>
    %356 = math.rsqrt %355 : vector<8x1xf32>
    %357 = vector.broadcast %356 : vector<8x1xf32> to vector<8x128xf32>
    %358 = arith.mulf %348, %357 : vector<8x128xf32>
    %359 = vector.broadcast %334 : vector<1x128xf32> to vector<8x128xf32>
    %360 = arith.mulf %358, %359 : vector<8x128xf32>
    %361 = vector.broadcast %335 : vector<1x128xf32> to vector<8x128xf32>
    %362 = arith.addf %360, %361 : vector<8x128xf32>
    %c0_143 = arith.constant 0 : index
    %c0_144 = arith.constant 0 : index
    %363 = vector.load %arg13[%c0_143, %c0_144] : memref<128x128xbf16, #tpu.memory_space<vmem>>, vector<128x128xbf16>
    %364 = arith.truncf %362 : vector<8x128xf32> to vector<8x128xbf16>
    %cst_145 = arith.constant dense<0.000000e+00> : vector<8x128xf32>
    %365 = tpu.matmul %364, %363, %cst_145 {dimension_numbers = #tpu.dot_dimension_numbers<[1], [0], [0], [1], [0, 0, 1, 1], [], []>} : vector<8x128xbf16>, vector<128x128xbf16>, vector<8x128xf32> -> vector<8x128xf32>
    %c0_146 = arith.constant 0 : index
    %c0_147 = arith.constant 0 : index
    %366 = vector.load %arg4[%c0_146, %c0_147] : memref<1x128xf32, #tpu.memory_space<vmem>>, vector<1x128xf32>
    %367 = vector.broadcast %366 : vector<1x128xf32> to vector<8x128xf32>
    %368 = arith.addf %365, %367 : vector<8x128xf32>
    %cst_148 = arith.constant 5.000000e-01 : f32
    %369 = vector.broadcast %cst_148 : f32 to vector<8x128xf32>
    %370 = arith.mulf %369, %368 : vector<8x128xf32>
    %cst_149 = arith.constant 0.707106769 : f32
    %371 = vector.broadcast %cst_149 : f32 to vector<8x128xf32>
    %372 = arith.mulf %368, %371 : vector<8x128xf32>
    %373 = math.erf %372 : vector<8x128xf32>
    %cst_150 = arith.constant 1.000000e+00 : f32
    %374 = vector.broadcast %cst_150 : f32 to vector<8x128xf32>
    %375 = arith.addf %374, %373 : vector<8x128xf32>
    %376 = arith.mulf %370, %375 : vector<8x128xf32>
    %c0_151 = arith.constant 0 : index
    %c0_152 = arith.constant 0 : index
    %377 = vector.load %arg14[%c0_151, %c0_152] : memref<128x128xbf16, #tpu.memory_space<vmem>>, vector<128x128xbf16>
    %378 = arith.truncf %376 : vector<8x128xf32> to vector<8x128xbf16>
    %cst_153 = arith.constant dense<0.000000e+00> : vector<8x128xf32>
    %379 = tpu.matmul %378, %377, %cst_153 {dimension_numbers = #tpu.dot_dimension_numbers<[1], [0], [0], [1], [0, 0, 1, 1], [], []>} : vector<8x128xbf16>, vector<128x128xbf16>, vector<8x128xf32> -> vector<8x128xf32>
    %380 = arith.addf %333, %379 : vector<8x128xf32>
    %c0_154 = arith.constant 0 : index
    %c0_155 = arith.constant 0 : index
    %381 = vector.load %arg5[%c0_154, %c0_155] : memref<1x128xf32, #tpu.memory_space<vmem>>, vector<1x128xf32>
    %382 = vector.broadcast %381 : vector<1x128xf32> to vector<8x128xf32>
    %383 = arith.addf %380, %382 : vector<8x128xf32>
    %c0_156 = arith.constant 0 : index
    %c0_157 = arith.constant 0 : index
    %384 = vector.load %arg24[%c0_156, %c0_157] : memref<1x128xf32, #tpu.memory_space<vmem>>, vector<1x128xf32>
    %c0_158 = arith.constant 0 : index
    %c0_159 = arith.constant 0 : index
    %385 = vector.load %arg23[%c0_158, %c0_159] : memref<1x128xf32, #tpu.memory_space<vmem>>, vector<1x128xf32>
    %386 = tpu.iota {dimensions = array<i32: 1>} : vector<1x128xi32>
    %c32_i32_160 = arith.constant 32 : i32
    %387 = vector.broadcast %c32_i32_160 : i32 to vector<1x128xi32>
    %388 = arith.cmpi slt, %386, %387 : vector<1x128xi32>
    %389 = arith.extui %388 : vector<1x128xi1> to vector<1x128xi32>
    %390 = arith.sitofp %389 : vector<1x128xi32> to vector<1x128xf32>
    %cst_161 = arith.constant dense<0.000000e+00> : vector<8xf32>
    %391 = vector.multi_reduction <add>, %383, %cst_161 [1] : vector<8x128xf32> to vector<8xf32>
    %392 = vector.shape_cast %391 : vector<8xf32> to vector<8x1xf32>
    %cst_162 = arith.constant 3.125000e-02 : f32
    %393 = vector.broadcast %cst_162 : f32 to vector<8x1xf32>
    %394 = arith.mulf %392, %393 : vector<8x1xf32>
    %395 = vector.broadcast %394 : vector<8x1xf32> to vector<8x128xf32>
    %396 = arith.subf %383, %395 : vector<8x128xf32>
    %397 = vector.broadcast %390 : vector<1x128xf32> to vector<8x128xf32>
    %398 = arith.mulf %396, %397 : vector<8x128xf32>
    %399 = arith.mulf %398, %398 : vector<8x128xf32>
    %cst_163 = arith.constant dense<0.000000e+00> : vector<8xf32>
    %400 = vector.multi_reduction <add>, %399, %cst_163 [1] : vector<8x128xf32> to vector<8xf32>
    %401 = vector.shape_cast %400 : vector<8xf32> to vector<8x1xf32>
    %cst_164 = arith.constant 3.125000e-02 : f32
    %402 = vector.broadcast %cst_164 : f32 to vector<8x1xf32>
    %403 = arith.mulf %401, %402 : vector<8x1xf32>
    %cst_165 = arith.constant 9.99999974E-6 : f32
    %404 = vector.broadcast %cst_165 : f32 to vector<8x1xf32>
    %405 = arith.addf %403, %404 : vector<8x1xf32>
    %406 = math.rsqrt %405 : vector<8x1xf32>
    %407 = vector.broadcast %406 : vector<8x1xf32> to vector<8x128xf32>
    %408 = arith.mulf %398, %407 : vector<8x128xf32>
    %409 = vector.broadcast %384 : vector<1x128xf32> to vector<8x128xf32>
    %410 = arith.mulf %408, %409 : vector<8x128xf32>
    %411 = vector.broadcast %385 : vector<1x128xf32> to vector<8x128xf32>
    %412 = arith.addf %410, %411 : vector<8x128xf32>
    %c0_166 = arith.constant 0 : index
    %c0_167 = arith.constant 0 : index
    %413 = vector.load %arg31[%c0_166, %c0_167] : memref<128x128xbf16, #tpu.memory_space<vmem>>, vector<128x128xbf16>
    %414 = arith.truncf %412 : vector<8x128xf32> to vector<8x128xbf16>
    %cst_168 = arith.constant dense<0.000000e+00> : vector<8x128xf32>
    %415 = tpu.matmul %414, %413, %cst_168 {dimension_numbers = #tpu.dot_dimension_numbers<[1], [0], [0], [1], [0, 0, 1, 1], [], []>} : vector<8x128xbf16>, vector<128x128xbf16>, vector<8x128xf32> -> vector<8x128xf32>
    %c0_169 = arith.constant 0 : index
    %c0_170 = arith.constant 0 : index
    %416 = vector.load %arg21[%c0_169, %c0_170] : memref<1x128xf32, #tpu.memory_space<vmem>>, vector<1x128xf32>
    %417 = vector.broadcast %416 : vector<1x128xf32> to vector<8x128xf32>
    %418 = arith.addf %415, %417 : vector<8x128xf32>
    %c0_171 = arith.constant 0 : index
    %c0_172 = arith.constant 0 : index
    %419 = vector.load %arg28[%c0_171, %c0_172] : memref<128x256xbf16, #tpu.memory_space<vmem>>, vector<128x256xbf16>
    %420 = arith.truncf %205 : vector<8x128xf32> to vector<8x128xbf16>
    %cst_173 = arith.constant dense<0.000000e+00> : vector<8x256xf32>
    %421 = tpu.matmul %420, %419, %cst_173 {dimension_numbers = #tpu.dot_dimension_numbers<[1], [0], [0], [1], [0, 0, 1, 1], [], []>} : vector<8x128xbf16>, vector<128x256xbf16>, vector<8x256xf32> -> vector<8x256xf32>
    %c0_174 = arith.constant 0 : index
    %c0_175 = arith.constant 0 : index
    %422 = vector.load %arg18[%c0_174, %c0_175] : memref<1x256xf32, #tpu.memory_space<vmem>>, vector<1x256xf32>
    %423 = vector.broadcast %422 : vector<1x256xf32> to vector<8x256xf32>
    %424 = arith.addf %421, %423 : vector<8x256xf32>
    %425 = vector.extract_strided_slice %424 {offsets = [0, 0], sizes = [8, 128], strides = [1, 1]} : vector<8x256xf32> to vector<8x128xf32>
    %426 = vector.extract_strided_slice %424 {offsets = [0, 128], sizes = [8, 128], strides = [1, 1]} : vector<8x256xf32> to vector<8x128xf32>
    %c0_176 = arith.constant 0 : index
    %c0_177 = arith.constant 0 : index
    %c0_178 = arith.constant 0 : index
    %427 = vector.load %arg22[%c0_176, %c0_177, %c0_178] : memref<2x1x128xbf16, #tpu.memory_space<vmem>>, vector<2x1x128xbf16>
    %428 = arith.truncf %418 : vector<8x128xf32> to vector<8x128xbf16>
    %429 = arith.truncf %425 : vector<8x128xf32> to vector<8x128xbf16>
    %430 = arith.truncf %426 : vector<8x128xf32> to vector<8x128xbf16>
    %431 = vector.shape_cast %427 : vector<2x1x128xbf16> to vector<2x1x128xbf16>
    %432 = vector.broadcast %431 : vector<2x1x128xbf16> to vector<2x8x128xbf16>
    %433 = vector.shape_cast %429 : vector<8x128xbf16> to vector<1x8x128xbf16>
    %434 = vector.shape_cast %433 : vector<1x8x128xbf16> to vector<1x8x128xbf16>
    %435 = vector.broadcast %434 : vector<1x8x128xbf16> to vector<2x8x128xbf16>
    %436 = arith.mulf %435, %432 : vector<2x8x128xbf16>
    %437 = vector.shape_cast %430 : vector<8x128xbf16> to vector<1x8x128xbf16>
    %438 = vector.shape_cast %437 : vector<1x8x128xbf16> to vector<1x8x128xbf16>
    %439 = vector.broadcast %438 : vector<1x8x128xbf16> to vector<2x8x128xbf16>
    %440 = arith.mulf %439, %432 : vector<2x8x128xbf16>
    %441 = vector.shape_cast %428 : vector<8x128xbf16> to vector<1x8x128xbf16>
    %442 = vector.shape_cast %441 : vector<1x8x128xbf16> to vector<1x8x128xbf16>
    %443 = vector.broadcast %442 : vector<1x8x128xbf16> to vector<2x8x128xbf16>
    "tpu.trace_start"() <{level = 10 : i32, message = "hqd,hkd->hqk"}> : () -> ()
    %cst_179 = arith.constant dense<0.000000e+00> : vector<2x8x8xf32>
    %444 = tpu.matmul %443, %436, %cst_179 {dimension_numbers = #tpu.dot_dimension_numbers<[2], [2], [1], [1], [0, 0, 0, 1, 1, 1], [0], [0]>} : vector<2x8x128xbf16>, vector<2x8x128xbf16>, vector<2x8x8xf32> -> vector<2x8x8xf32>
    "tpu.trace_stop"() : () -> ()
    %cst_180 = arith.constant dense<0xFF800000> : vector<2x8xf32>
    %445 = vector.multi_reduction <maximumf>, %444, %cst_180 [2] : vector<2x8x8xf32> to vector<2x8xf32>
    %446 = vector.shape_cast %445 : vector<2x8xf32> to vector<2x8x1xf32>
    %447 = vector.broadcast %446 : vector<2x8x1xf32> to vector<2x8x8xf32>
    %448 = arith.subf %444, %447 : vector<2x8x8xf32>
    %449 = math.exp %448 : vector<2x8x8xf32>
    %cst_181 = arith.constant dense<0.000000e+00> : vector<2x8xf32>
    %450 = vector.multi_reduction <add>, %449, %cst_181 [2] : vector<2x8x8xf32> to vector<2x8xf32>
    %451 = vector.shape_cast %450 : vector<2x8xf32> to vector<2x8x1xf32>
    %452 = vector.broadcast %451 : vector<2x8x1xf32> to vector<2x8x8xf32>
    %453 = arith.divf %449, %452 : vector<2x8x8xf32>
    %454 = arith.truncf %453 : vector<2x8x8xf32> to vector<2x8x8xbf16>
    "tpu.trace_start"() <{level = 10 : i32, message = "hqk,hkd->hqd"}> : () -> ()
    %cst_182 = arith.constant dense<0.000000e+00> : vector<2x8x128xf32>
    %455 = tpu.matmul %454, %440, %cst_182 {dimension_numbers = #tpu.dot_dimension_numbers<[2], [1], [1], [2], [0, 0, 0, 1, 1, 2], [0], [0]>} : vector<2x8x8xbf16>, vector<2x8x128xbf16>, vector<2x8x128xf32> -> vector<2x8x128xf32>
    "tpu.trace_stop"() : () -> ()
    %cst_183 = arith.constant dense<0.000000e+00> : vector<8x128xf32>
    %456 = vector.multi_reduction <add>, %455, %cst_183 [0] : vector<2x8x128xf32> to vector<8x128xf32>
    %c0_184 = arith.constant 0 : index
    %c0_185 = arith.constant 0 : index
    %457 = vector.load %arg30[%c0_184, %c0_185] : memref<128x128xbf16, #tpu.memory_space<vmem>>, vector<128x128xbf16>
    %458 = arith.truncf %456 : vector<8x128xf32> to vector<8x128xbf16>
    %cst_186 = arith.constant dense<0.000000e+00> : vector<8x128xf32>
    %459 = tpu.matmul %458, %457, %cst_186 {dimension_numbers = #tpu.dot_dimension_numbers<[1], [0], [0], [1], [0, 0, 1, 1], [], []>} : vector<8x128xbf16>, vector<128x128xbf16>, vector<8x128xf32> -> vector<8x128xf32>
    %460 = arith.addf %383, %459 : vector<8x128xf32>
    %c0_187 = arith.constant 0 : index
    %c0_188 = arith.constant 0 : index
    %461 = vector.load %arg20[%c0_187, %c0_188] : memref<1x128xf32, #tpu.memory_space<vmem>>, vector<1x128xf32>
    %462 = vector.broadcast %461 : vector<1x128xf32> to vector<8x128xf32>
    %463 = arith.addf %460, %462 : vector<8x128xf32>
    %c0_189 = arith.constant 0 : index
    %c0_190 = arith.constant 0 : index
    %464 = vector.load %arg26[%c0_189, %c0_190] : memref<1x128xf32, #tpu.memory_space<vmem>>, vector<1x128xf32>
    %c0_191 = arith.constant 0 : index
    %c0_192 = arith.constant 0 : index
    %465 = vector.load %arg25[%c0_191, %c0_192] : memref<1x128xf32, #tpu.memory_space<vmem>>, vector<1x128xf32>
    %466 = tpu.iota {dimensions = array<i32: 1>} : vector<1x128xi32>
    %c32_i32_193 = arith.constant 32 : i32
    %467 = vector.broadcast %c32_i32_193 : i32 to vector<1x128xi32>
    %468 = arith.cmpi slt, %466, %467 : vector<1x128xi32>
    %469 = arith.extui %468 : vector<1x128xi1> to vector<1x128xi32>
    %470 = arith.sitofp %469 : vector<1x128xi32> to vector<1x128xf32>
    %cst_194 = arith.constant dense<0.000000e+00> : vector<8xf32>
    %471 = vector.multi_reduction <add>, %463, %cst_194 [1] : vector<8x128xf32> to vector<8xf32>
    %472 = vector.shape_cast %471 : vector<8xf32> to vector<8x1xf32>
    %cst_195 = arith.constant 3.125000e-02 : f32
    %473 = vector.broadcast %cst_195 : f32 to vector<8x1xf32>
    %474 = arith.mulf %472, %473 : vector<8x1xf32>
    %475 = vector.broadcast %474 : vector<8x1xf32> to vector<8x128xf32>
    %476 = arith.subf %463, %475 : vector<8x128xf32>
    %477 = vector.broadcast %470 : vector<1x128xf32> to vector<8x128xf32>
    %478 = arith.mulf %476, %477 : vector<8x128xf32>
    %479 = arith.mulf %478, %478 : vector<8x128xf32>
    %cst_196 = arith.constant dense<0.000000e+00> : vector<8xf32>
    %480 = vector.multi_reduction <add>, %479, %cst_196 [1] : vector<8x128xf32> to vector<8xf32>
    %481 = vector.shape_cast %480 : vector<8xf32> to vector<8x1xf32>
    %cst_197 = arith.constant 3.125000e-02 : f32
    %482 = vector.broadcast %cst_197 : f32 to vector<8x1xf32>
    %483 = arith.mulf %481, %482 : vector<8x1xf32>
    %cst_198 = arith.constant 9.99999974E-6 : f32
    %484 = vector.broadcast %cst_198 : f32 to vector<8x1xf32>
    %485 = arith.addf %483, %484 : vector<8x1xf32>
    %486 = math.rsqrt %485 : vector<8x1xf32>
    %487 = vector.broadcast %486 : vector<8x1xf32> to vector<8x128xf32>
    %488 = arith.mulf %478, %487 : vector<8x128xf32>
    %489 = vector.broadcast %464 : vector<1x128xf32> to vector<8x128xf32>
    %490 = arith.mulf %488, %489 : vector<8x128xf32>
    %491 = vector.broadcast %465 : vector<1x128xf32> to vector<8x128xf32>
    %492 = arith.addf %490, %491 : vector<8x128xf32>
    %c0_199 = arith.constant 0 : index
    %c0_200 = arith.constant 0 : index
    %493 = vector.load %arg27[%c0_199, %c0_200] : memref<128x128xbf16, #tpu.memory_space<vmem>>, vector<128x128xbf16>
    %494 = arith.truncf %492 : vector<8x128xf32> to vector<8x128xbf16>
    %cst_201 = arith.constant dense<0.000000e+00> : vector<8x128xf32>
    %495 = tpu.matmul %494, %493, %cst_201 {dimension_numbers = #tpu.dot_dimension_numbers<[1], [0], [0], [1], [0, 0, 1, 1], [], []>} : vector<8x128xbf16>, vector<128x128xbf16>, vector<8x128xf32> -> vector<8x128xf32>
    %c0_202 = arith.constant 0 : index
    %c0_203 = arith.constant 0 : index
    %496 = vector.load %arg17[%c0_202, %c0_203] : memref<1x128xf32, #tpu.memory_space<vmem>>, vector<1x128xf32>
    %497 = vector.broadcast %496 : vector<1x128xf32> to vector<8x128xf32>
    %498 = arith.addf %495, %497 : vector<8x128xf32>
    %cst_204 = arith.constant 5.000000e-01 : f32
    %499 = vector.broadcast %cst_204 : f32 to vector<8x128xf32>
    %500 = arith.mulf %499, %498 : vector<8x128xf32>
    %cst_205 = arith.constant 0.707106769 : f32
    %501 = vector.broadcast %cst_205 : f32 to vector<8x128xf32>
    %502 = arith.mulf %498, %501 : vector<8x128xf32>
    %503 = math.erf %502 : vector<8x128xf32>
    %cst_206 = arith.constant 1.000000e+00 : f32
    %504 = vector.broadcast %cst_206 : f32 to vector<8x128xf32>
    %505 = arith.addf %504, %503 : vector<8x128xf32>
    %506 = arith.mulf %500, %505 : vector<8x128xf32>
    %c0_207 = arith.constant 0 : index
    %c0_208 = arith.constant 0 : index
    %507 = vector.load %arg29[%c0_207, %c0_208] : memref<128x128xbf16, #tpu.memory_space<vmem>>, vector<128x128xbf16>
    %508 = arith.truncf %506 : vector<8x128xf32> to vector<8x128xbf16>
    %cst_209 = arith.constant dense<0.000000e+00> : vector<8x128xf32>
    %509 = tpu.matmul %508, %507, %cst_209 {dimension_numbers = #tpu.dot_dimension_numbers<[1], [0], [0], [1], [0, 0, 1, 1], [], []>} : vector<8x128xbf16>, vector<128x128xbf16>, vector<8x128xf32> -> vector<8x128xf32>
    %510 = arith.addf %463, %509 : vector<8x128xf32>
    %c0_210 = arith.constant 0 : index
    %c0_211 = arith.constant 0 : index
    %511 = vector.load %arg19[%c0_210, %c0_211] : memref<1x128xf32, #tpu.memory_space<vmem>>, vector<1x128xf32>
    %512 = vector.broadcast %511 : vector<1x128xf32> to vector<8x128xf32>
    %513 = arith.addf %510, %512 : vector<8x128xf32>
    %c0_212 = arith.constant 0 : index
    %c0_213 = arith.constant 0 : index
    %514 = vector.load %arg39[%c0_212, %c0_213] : memref<1x128xf32, #tpu.memory_space<vmem>>, vector<1x128xf32>
    %c0_214 = arith.constant 0 : index
    %c0_215 = arith.constant 0 : index
    %515 = vector.load %arg36[%c0_214, %c0_215] : memref<1x128xf32, #tpu.memory_space<vmem>>, vector<1x128xf32>
    %516 = tpu.iota {dimensions = array<i32: 1>} : vector<1x128xi32>
    %c32_i32_216 = arith.constant 32 : i32
    %517 = vector.broadcast %c32_i32_216 : i32 to vector<1x128xi32>
    %518 = arith.cmpi slt, %516, %517 : vector<1x128xi32>
    %519 = arith.extui %518 : vector<1x128xi1> to vector<1x128xi32>
    %520 = arith.sitofp %519 : vector<1x128xi32> to vector<1x128xf32>
    %cst_217 = arith.constant dense<0.000000e+00> : vector<8xf32>
    %521 = vector.multi_reduction <add>, %513, %cst_217 [1] : vector<8x128xf32> to vector<8xf32>
    %522 = vector.shape_cast %521 : vector<8xf32> to vector<8x1xf32>
    %cst_218 = arith.constant 3.125000e-02 : f32
    %523 = vector.broadcast %cst_218 : f32 to vector<8x1xf32>
    %524 = arith.mulf %522, %523 : vector<8x1xf32>
    %525 = vector.broadcast %524 : vector<8x1xf32> to vector<8x128xf32>
    %526 = arith.subf %513, %525 : vector<8x128xf32>
    %527 = vector.broadcast %520 : vector<1x128xf32> to vector<8x128xf32>
    %528 = arith.mulf %526, %527 : vector<8x128xf32>
    %529 = arith.mulf %528, %528 : vector<8x128xf32>
    %cst_219 = arith.constant dense<0.000000e+00> : vector<8xf32>
    %530 = vector.multi_reduction <add>, %529, %cst_219 [1] : vector<8x128xf32> to vector<8xf32>
    %531 = vector.shape_cast %530 : vector<8xf32> to vector<8x1xf32>
    %cst_220 = arith.constant 3.125000e-02 : f32
    %532 = vector.broadcast %cst_220 : f32 to vector<8x1xf32>
    %533 = arith.mulf %531, %532 : vector<8x1xf32>
    %cst_221 = arith.constant 9.99999974E-6 : f32
    %534 = vector.broadcast %cst_221 : f32 to vector<8x1xf32>
    %535 = arith.addf %533, %534 : vector<8x1xf32>
    %536 = math.rsqrt %535 : vector<8x1xf32>
    %537 = vector.broadcast %536 : vector<8x1xf32> to vector<8x128xf32>
    %538 = arith.mulf %528, %537 : vector<8x128xf32>
    %539 = vector.broadcast %514 : vector<1x128xf32> to vector<8x128xf32>
    %540 = arith.mulf %538, %539 : vector<8x128xf32>
    %541 = vector.broadcast %515 : vector<1x128xf32> to vector<8x128xf32>
    %542 = arith.addf %540, %541 : vector<8x128xf32>
    %c0_222 = arith.constant 0 : index
    %c0_223 = arith.constant 0 : index
    %543 = vector.load %arg41[%c0_222, %c0_223] : memref<128x128xbf16, #tpu.memory_space<vmem>>, vector<128x128xbf16>
    %544 = arith.truncf %542 : vector<8x128xf32> to vector<8x128xbf16>
    %cst_224 = arith.constant dense<0.000000e+00> : vector<8x128xf32>
    %545 = tpu.matmul %544, %543, %cst_224 {dimension_numbers = #tpu.dot_dimension_numbers<[1], [0], [0], [1], [0, 0, 1, 1], [], []>} : vector<8x128xbf16>, vector<128x128xbf16>, vector<8x128xf32> -> vector<8x128xf32>
    %c0_225 = arith.constant 0 : index
    %c0_226 = arith.constant 0 : index
    %546 = vector.load %arg38[%c0_225, %c0_226] : memref<1x128xf32, #tpu.memory_space<vmem>>, vector<1x128xf32>
    %547 = vector.broadcast %546 : vector<1x128xf32> to vector<8x128xf32>
    %548 = arith.addf %545, %547 : vector<8x128xf32>
    %c0_227 = arith.constant 0 : index
    %c0_228 = arith.constant 0 : index
    %549 = vector.load %arg40[%c0_227, %c0_228] : memref<1x128xf32, #tpu.memory_space<vmem>>, vector<1x128xf32>
    %c0_229 = arith.constant 0 : index
    %c0_230 = arith.constant 0 : index
    %550 = vector.load %arg37[%c0_229, %c0_230] : memref<1x128xf32, #tpu.memory_space<vmem>>, vector<1x128xf32>
    %551 = tpu.iota {dimensions = array<i32: 1>} : vector<1x128xi32>
    %c32_i32_231 = arith.constant 32 : i32
    %552 = vector.broadcast %c32_i32_231 : i32 to vector<1x128xi32>
    %553 = arith.cmpi slt, %551, %552 : vector<1x128xi32>
    %554 = arith.extui %553 : vector<1x128xi1> to vector<1x128xi32>
    %555 = arith.sitofp %554 : vector<1x128xi32> to vector<1x128xf32>
    %cst_232 = arith.constant dense<0.000000e+00> : vector<8xf32>
    %556 = vector.multi_reduction <add>, %548, %cst_232 [1] : vector<8x128xf32> to vector<8xf32>
    %557 = vector.shape_cast %556 : vector<8xf32> to vector<8x1xf32>
    %cst_233 = arith.constant 3.125000e-02 : f32
    %558 = vector.broadcast %cst_233 : f32 to vector<8x1xf32>
    %559 = arith.mulf %557, %558 : vector<8x1xf32>
    %560 = vector.broadcast %559 : vector<8x1xf32> to vector<8x128xf32>
    %561 = arith.subf %548, %560 : vector<8x128xf32>
    %562 = vector.broadcast %555 : vector<1x128xf32> to vector<8x128xf32>
    %563 = arith.mulf %561, %562 : vector<8x128xf32>
    %564 = arith.mulf %563, %563 : vector<8x128xf32>
    %cst_234 = arith.constant dense<0.000000e+00> : vector<8xf32>
    %565 = vector.multi_reduction <add>, %564, %cst_234 [1] : vector<8x128xf32> to vector<8xf32>
    %566 = vector.shape_cast %565 : vector<8xf32> to vector<8x1xf32>
    %cst_235 = arith.constant 3.125000e-02 : f32
    %567 = vector.broadcast %cst_235 : f32 to vector<8x1xf32>
    %568 = arith.mulf %566, %567 : vector<8x1xf32>
    %cst_236 = arith.constant 9.99999974E-6 : f32
    %569 = vector.broadcast %cst_236 : f32 to vector<8x1xf32>
    %570 = arith.addf %568, %569 : vector<8x1xf32>
    %571 = math.rsqrt %570 : vector<8x1xf32>
    %572 = vector.broadcast %571 : vector<8x1xf32> to vector<8x128xf32>
    %573 = arith.mulf %563, %572 : vector<8x128xf32>
    %574 = vector.broadcast %549 : vector<1x128xf32> to vector<8x128xf32>
    %575 = arith.mulf %573, %574 : vector<8x128xf32>
    %576 = vector.broadcast %550 : vector<1x128xf32> to vector<8x128xf32>
    %577 = arith.addf %575, %576 : vector<8x128xf32>
    %c0_237 = arith.constant 0 : index
    %c0_238 = arith.constant 0 : index
    %578 = vector.load %arg63[%c0_237, %c0_238] : memref<128x128xbf16, #tpu.memory_space<vmem>>, vector<128x128xbf16>
    %579 = arith.truncf %577 : vector<8x128xf32> to vector<8x128xbf16>
    %cst_239 = arith.constant dense<0.000000e+00> : vector<8x128xf32>
    %580 = tpu.matmul %579, %578, %cst_239 {dimension_numbers = #tpu.dot_dimension_numbers<[1], [0], [0], [1], [0, 0, 1, 1], [], []>} : vector<8x128xbf16>, vector<128x128xbf16>, vector<8x128xf32> -> vector<8x128xf32>
    %c0_240 = arith.constant 0 : index
    %c0_241 = arith.constant 0 : index
    %c0_242 = arith.constant 0 : index
    %581 = vector.load %arg65[%c0_240, %c0_241, %c0_242] : memref<1x8x128xf32, #tpu.memory_space<vmem>>, vector<1x8x128xf32>
    %582 = vector.shape_cast %581 : vector<1x8x128xf32> to vector<8x128xf32>
    %583 = vector.shape_cast %580 : vector<8x128xf32> to vector<1x8x128xf32>
    tpu.vector_store %arg65[%c0_240, %c0_241, %c0_242], %583 {strides = array<i32>} : memref<1x8x128xf32, #tpu.memory_space<vmem>>, vector<1x8x128xf32>,
    return
  }
  func.func @transform_0(%arg0: i32) -> (i32, i32) {
    %c0_i32 = arith.constant 0 : i32
    %c0_i32_0 = arith.constant 0 : i32
    return %arg0, %c0_i32 : i32, i32
  }
  func.func @transform_1(%arg0: i32) -> (i32, i32) {
    %c0_i32 = arith.constant 0 : i32
    %c0_i32_0 = arith.constant 0 : i32
    return %arg0, %c0_i32 : i32, i32
  }
  func.func @transform_2(%arg0: i32) -> (i32, i32) {
    %c0_i32 = arith.constant 0 : i32
    %c0_i32_0 = arith.constant 0 : i32
    %c0_i32_1 = arith.constant 0 : i32
    return %c0_i32, %c0_i32_0 : i32, i32
  }
  func.func @transform_3(%arg0: i32) -> (i32, i32) {
    %c0_i32 = arith.constant 0 : i32
    %c0_i32_0 = arith.constant 0 : i32
    %c0_i32_1 = arith.constant 0 : i32
    return %c0_i32, %c0_i32_0 : i32, i32
  }
  func.func @transform_4(%arg0: i32) -> (i32, i32) {
    %c0_i32 = arith.constant 0 : i32
    %c0_i32_0 = arith.constant 0 : i32
    %c0_i32_1 = arith.constant 0 : i32
    return %c0_i32, %c0_i32_0 : i32, i32
  }
  func.func @transform_5(%arg0: i32) -> (i32, i32) {
    %c0_i32 = arith.constant 0 : i32
    %c0_i32_0 = arith.constant 0 : i32
    %c0_i32_1 = arith.constant 0 : i32
    return %c0_i32, %c0_i32_0 : i32, i32
  }
  func.func @transform_6(%arg0: i32) -> (i32, i32) {
    %c0_i32 = arith.constant 0 : i32
    %c0_i32_0 = arith.constant 0 : i32
    %c0_i32_1 = arith.constant 0 : i32
    return %c0_i32, %c0_i32_0 : i32, i32
  }
  func.func @transform_7(%arg0: i32) -> (i32, i32, i32) {
    %c0_i32 = arith.constant 0 : i32
    %c0_i32_0 = arith.constant 0 : i32
    %c0_i32_1 = arith.constant 0 : i32
    %c0_i32_2 = arith.constant 0 : i32
    return %c0_i32, %c0_i32_0, %c0_i32_1 : i32, i32, i32
  }
  func.func @transform_8(%arg0: i32) -> (i32, i32) {
    %c0_i32 = arith.constant 0 : i32
    %c0_i32_0 = arith.constant 0 : i32
    %c0_i32_1 = arith.constant 0 : i32
    return %c0_i32, %c0_i32_0 : i32, i32
  }
  func.func @transform_9(%arg0: i32) -> (i32, i32) {
    %c0_i32 = arith.constant 0 : i32
    %c0_i32_0 = arith.constant 0 : i32
    %c0_i32_1 = arith.constant 0 : i32
    return %c0_i32, %c0_i32_0 : i32, i32
  }
  func.func @transform_10(%arg0: i32) -> (i32, i32) {
    %c0_i32 = arith.constant 0 : i32
    %c0_i32_0 = arith.constant 0 : i32
    %c0_i32_1 = arith.constant 0 : i32
    return %c0_i32, %c0_i32_0 : i32, i32
  }
  func.func @transform_11(%arg0: i32) -> (i32, i32) {
    %c0_i32 = arith.constant 0 : i32
    %c0_i32_0 = arith.constant 0 : i32
    %c0_i32_1 = arith.constant 0 : i32
    return %c0_i32, %c0_i32_0 : i32, i32
  }
  func.func @transform_12(%arg0: i32) -> (i32, i32) {
    %c0_i32 = arith.constant 0 : i32
    %c0_i32_0 = arith.constant 0 : i32
    %c0_i32_1 = arith.constant 0 : i32
    return %c0_i32, %c0_i32_0 : i32, i32
  }
  func.func @transform_13(%arg0: i32) -> (i32, i32) {
    %c0_i32 = arith.constant 0 : i32
    %c0_i32_0 = arith.constant 0 : i32
    %c0_i32_1 = arith.constant 0 : i32
    return %c0_i32, %c0_i32_0 : i32, i32
  }
  func.func @transform_14(%arg0: i32) -> (i32, i32) {
    %c0_i32 = arith.constant 0 : i32
    %c0_i32_0 = arith.constant 0 : i32
    %c0_i32_1 = arith.constant 0 : i32
    return %c0_i32, %c0_i32_0 : i32, i32
  }
  func.func @transform_15(%arg0: i32) -> (i32, i32) {
    %c0_i32 = arith.constant 0 : i32
    %c0_i32_0 = arith.constant 0 : i32
    %c0_i32_1 = arith.constant 0 : i32
    return %c0_i32, %c0_i32_0 : i32, i32
  }
  func.func @transform_16(%arg0: i32) -> (i32, i32) {
    %c0_i32 = arith.constant 0 : i32
    %c0_i32_0 = arith.constant 0 : i32
    %c0_i32_1 = arith.constant 0 : i32
    return %c0_i32, %c0_i32_0 : i32, i32
  }
  func.func @transform_17(%arg0: i32) -> (i32, i32) {
    %c0_i32 = arith.constant 0 : i32
    %c0_i32_0 = arith.constant 0 : i32
    %c0_i32_1 = arith.constant 0 : i32
    return %c0_i32, %c0_i32_0 : i32, i32
  }
  func.func @transform_18(%arg0: i32) -> (i32, i32) {
    %c0_i32 = arith.constant 0 : i32
    %c0_i32_0 = arith.constant 0 : i32
    %c0_i32_1 = arith.constant 0 : i32
    return %c0_i32, %c0_i32_0 : i32, i32
  }
  func.func @transform_19(%arg0: i32) -> (i32, i32) {
    %c0_i32 = arith.constant 0 : i32
    %c0_i32_0 = arith.constant 0 : i32
    %c0_i32_1 = arith.constant 0 : i32
    return %c0_i32, %c0_i32_0 : i32, i32
  }
  func.func @transform_20(%arg0: i32) -> (i32, i32) {
    %c0_i32 = arith.constant 0 : i32
    %c0_i32_0 = arith.constant 0 : i32
    %c0_i32_1 = arith.constant 0 : i32
    return %c0_i32, %c0_i32_0 : i32, i32
  }
  func.func @transform_21(%arg0: i32) -> (i32, i32, i32) {
    %c0_i32 = arith.constant 0 : i32
    %c0_i32_0 = arith.constant 0 : i32
    %c0_i32_1 = arith.constant 0 : i32
    %c0_i32_2 = arith.constant 0 : i32
    return %c0_i32, %c0_i32_0, %c0_i32_1 : i32, i32, i32
  }
  func.func @transform_22(%arg0: i32) -> (i32, i32) {
    %c0_i32 = arith.constant 0 : i32
    %c0_i32_0 = arith.constant 0 : i32
    %c0_i32_1 = arith.constant 0 : i32
    return %c0_i32, %c0_i32_0 : i32, i32
  }
  func.func @transform_23(%arg0: i32) -> (i32, i32) {
    %c0_i32 = arith.constant 0 : i32
    %c0_i32_0 = arith.constant 0 : i32
    %c0_i32_1 = arith.constant 0 : i32
    return %c0_i32, %c0_i32_0 : i32, i32
  }
  func.func @transform_24(%arg0: i32) -> (i32, i32) {
    %c0_i32 = arith.constant 0 : i32
    %c0_i32_0 = arith.constant 0 : i32
    %c0_i32_1 = arith.constant 0 : i32
    return %c0_i32, %c0_i32_0 : i32, i32
  }
  func.func @transform_25(%arg0: i32) -> (i32, i32) {
    %c0_i32 = arith.constant 0 : i32
    %c0_i32_0 = arith.constant 0 : i32
    %c0_i32_1 = arith.constant 0 : i32
    return %c0_i32, %c0_i32_0 : i32, i32
  }
  func.func @transform_26(%arg0: i32) -> (i32, i32) {
    %c0_i32 = arith.constant 0 : i32
    %c0_i32_0 = arith.constant 0 : i32
    %c0_i32_1 = arith.constant 0 : i32
    return %c0_i32, %c0_i32_0 : i32, i32
  }
  func.func @transform_27(%arg0: i32) -> (i32, i32) {
    %c0_i32 = arith.constant 0 : i32
    %c0_i32_0 = arith.constant 0 : i32
    %c0_i32_1 = arith.constant 0 : i32
    return %c0_i32, %c0_i32_0 : i32, i32
  }
  func.func @transform_28(%arg0: i32) -> (i32, i32) {
    %c0_i32 = arith.constant 0 : i32
    %c0_i32_0 = arith.constant 0 : i32
    %c0_i32_1 = arith.constant 0 : i32
    return %c0_i32, %c0_i32_0 : i32, i32
  }
  func.func @transform_29(%arg0: i32) -> (i32, i32) {
    %c0_i32 = arith.constant 0 : i32
    %c0_i32_0 = arith.constant 0 : i32
    %c0_i32_1 = arith.constant 0 : i32
    return %c0_i32, %c0_i32_0 : i32, i32
  }
  func.func @transform_30(%arg0: i32) -> (i32, i32) {
    %c0_i32 = arith.constant 0 : i32
    %c0_i32_0 = arith.constant 0 : i32
    %c0_i32_1 = arith.constant 0 : i32
    return %c0_i32, %c0_i32_0 : i32, i32
  }
  func.func @transform_31(%arg0: i32) -> (i32, i32) {
    %c0_i32 = arith.constant 0 : i32
    %c0_i32_0 = arith.constant 0 : i32
    %c0_i32_1 = arith.constant 0 : i32
    return %c0_i32, %c0_i32_0 : i32, i32
  }
  func.func @transform_32(%arg0: i32) -> (i32, i32) {
    %c0_i32 = arith.constant 0 : i32
    %c0_i32_0 = arith.constant 0 : i32
    %c0_i32_1 = arith.constant 0 : i32
    return %c0_i32, %c0_i32_0 : i32, i32
  }
  func.func @transform_33(%arg0: i32) -> (i32, i32) {
    %c0_i32 = arith.constant 0 : i32
    %c0_i32_0 = arith.constant 0 : i32
    %c0_i32_1 = arith.constant 0 : i32
    return %c0_i32, %c0_i32_0 : i32, i32
  }
  func.func @transform_34(%arg0: i32) -> (i32, i32) {
    %c0_i32 = arith.constant 0 : i32
    %c0_i32_0 = arith.constant 0 : i32
    %c0_i32_1 = arith.constant 0 : i32
    return %c0_i32, %c0_i32_0 : i32, i32
  }
  func.func @transform_35(%arg0: i32) -> (i32, i32) {
    %c0_i32 = arith.constant 0 : i32
    %c0_i32_0 = arith.constant 0 : i32
    %c0_i32_1 = arith.constant 0 : i32
    return %c0_i32, %c0_i32_0 : i32, i32
  }
  func.func @transform_36(%arg0: i32) -> (i32, i32) {
    %c0_i32 = arith.constant 0 : i32
    %c0_i32_0 = arith.constant 0 : i32
    %c0_i32_1 = arith.constant 0 : i32
    return %c0_i32, %c0_i32_0 : i32, i32
  }
  func.func @transform_37(%arg0: i32) -> (i32, i32) {
    %c0_i32 = arith.constant 0 : i32
    %c0_i32_0 = arith.constant 0 : i32
    %c0_i32_1 = arith.constant 0 : i32
    return %c0_i32, %c0_i32_0 : i32, i32
  }
  func.func @transform_38(%arg0: i32) -> (i32, i32) {
    %c0_i32 = arith.constant 0 : i32
    %c0_i32_0 = arith.constant 0 : i32
    %c0_i32_1 = arith.constant 0 : i32
    return %c0_i32, %c0_i32_0 : i32, i32
  }
  func.func @transform_39(%arg0: i32) -> (i32, i32) {
    %c0_i32 = arith.constant 0 : i32
    %c0_i32_0 = arith.constant 0 : i32
    %c0_i32_1 = arith.constant 0 : i32
    return %c0_i32, %c0_i32_0 : i32, i32
  }
  func.func @transform_40(%arg0: i32) -> (i32, i32) {
    %c0_i32 = arith.constant 0 : i32
    %c0_i32_0 = arith.constant 0 : i32
    %c0_i32_1 = arith.constant 0 : i32
    return %c0_i32, %c0_i32_0 : i32, i32
  }
  func.func @transform_41(%arg0: i32) -> (i32, i32) {
    %c0_i32 = arith.constant 0 : i32
    %c0_i32_0 = arith.constant 0 : i32
    %c0_i32_1 = arith.constant 0 : i32
    return %c0_i32, %c0_i32_0 : i32, i32
  }
  func.func @transform_42(%arg0: i32) -> (i32, i32) {
    %c0_i32 = arith.constant 0 : i32
    %c0_i32_0 = arith.constant 0 : i32
    %c0_i32_1 = arith.constant 0 : i32
    return %c0_i32, %c0_i32_0 : i32, i32
  }
  func.func @transform_43(%arg0: i32) -> (i32, i32) {
    %c0_i32 = arith.constant 0 : i32
    %c0_i32_0 = arith.constant 0 : i32
    %c0_i32_1 = arith.constant 0 : i32
    return %c0_i32, %c0_i32_0 : i32, i32
  }
  func.func @transform_44(%arg0: i32) -> (i32, i32) {
    %c0_i32 = arith.constant 0 : i32
    %c0_i32_0 = arith.constant 0 : i32
    %c0_i32_1 = arith.constant 0 : i32
    return %c0_i32, %c0_i32_0 : i32, i32
  }
  func.func @transform_45(%arg0: i32) -> (i32, i32, i32) {
    %c0_i32 = arith.constant 0 : i32
    %c0_i32_0 = arith.constant 0 : i32
    %c0_i32_1 = arith.constant 0 : i32
    %c0_i32_2 = arith.constant 0 : i32
    return %c0_i32, %c0_i32_0, %c0_i32_1 : i32, i32, i32
  }
  func.func @transform_46(%arg0: i32) -> (i32, i32) {
    %c0_i32 = arith.constant 0 : i32
    %c0_i32_0 = arith.constant 0 : i32
    %c0_i32_1 = arith.constant 0 : i32
    return %c0_i32, %c0_i32_0 : i32, i32
  }
  func.func @transform_47(%arg0: i32) -> (i32, i32) {
    %c0_i32 = arith.constant 0 : i32
    %c0_i32_0 = arith.constant 0 : i32
    %c0_i32_1 = arith.constant 0 : i32
    return %c0_i32, %c0_i32_0 : i32, i32
  }
  func.func @transform_48(%arg0: i32) -> (i32, i32) {
    %c0_i32 = arith.constant 0 : i32
    %c0_i32_0 = arith.constant 0 : i32
    %c0_i32_1 = arith.constant 0 : i32
    return %c0_i32, %c0_i32_0 : i32, i32
  }
  func.func @transform_49(%arg0: i32) -> (i32, i32) {
    %c0_i32 = arith.constant 0 : i32
    %c0_i32_0 = arith.constant 0 : i32
    %c0_i32_1 = arith.constant 0 : i32
    return %c0_i32, %c0_i32_0 : i32, i32
  }
  func.func @transform_50(%arg0: i32) -> (i32, i32) {
    %c0_i32 = arith.constant 0 : i32
    %c0_i32_0 = arith.constant 0 : i32
    %c0_i32_1 = arith.constant 0 : i32
    return %c0_i32, %c0_i32_0 : i32, i32
  }
  func.func @transform_51(%arg0: i32) -> (i32, i32) {
    %c0_i32 = arith.constant 0 : i32
    %c0_i32_0 = arith.constant 0 : i32
    %c0_i32_1 = arith.constant 0 : i32
    return %c0_i32, %c0_i32_0 : i32, i32
  }
  func.func @transform_52(%arg0: i32) -> (i32, i32) {
    %c0_i32 = arith.constant 0 : i32
    %c0_i32_0 = arith.constant 0 : i32
    %c0_i32_1 = arith.constant 0 : i32
    return %c0_i32, %c0_i32_0 : i32, i32
  }
  func.func @transform_53(%arg0: i32) -> (i32, i32) {
    %c0_i32 = arith.constant 0 : i32
    %c0_i32_0 = arith.constant 0 : i32
    %c0_i32_1 = arith.constant 0 : i32
    return %c0_i32, %c0_i32_0 : i32, i32
  }
  func.func @transform_54(%arg0: i32) -> (i32, i32) {
    %c0_i32 = arith.constant 0 : i32
    %c0_i32_0 = arith.constant 0 : i32
    %c0_i32_1 = arith.constant 0 : i32
    return %c0_i32, %c0_i32_0 : i32, i32
  }
  func.func @transform_55(%arg0: i32) -> (i32, i32) {
    %c0_i32 = arith.constant 0 : i32
    %c0_i32_0 = arith.constant 0 : i32
    %c0_i32_1 = arith.constant 0 : i32
    return %c0_i32, %c0_i32_0 : i32, i32
  }
  func.func @transform_56(%arg0: i32) -> (i32, i32) {
    %c0_i32 = arith.constant 0 : i32
    %c0_i32_0 = arith.constant 0 : i32
    %c0_i32_1 = arith.constant 0 : i32
    return %c0_i32, %c0_i32_0 : i32, i32
  }
  func.func @transform_57(%arg0: i32) -> (i32, i32) {
    %c0_i32 = arith.constant 0 : i32
    %c0_i32_0 = arith.constant 0 : i32
    %c0_i32_1 = arith.constant 0 : i32
    return %c0_i32, %c0_i32_0 : i32, i32
  }
  func.func @transform_58(%arg0: i32) -> (i32, i32) {
    %c0_i32 = arith.constant 0 : i32
    %c0_i32_0 = arith.constant 0 : i32
    %c0_i32_1 = arith.constant 0 : i32
    return %c0_i32, %c0_i32_0 : i32, i32
  }
  func.func @transform_59(%arg0: i32) -> (i32, i32) {
    %c0_i32 = arith.constant 0 : i32
    %c0_i32_0 = arith.constant 0 : i32
    %c0_i32_1 = arith.constant 0 : i32
    return %c0_i32, %c0_i32_0 : i32, i32
  }
  func.func @transform_60(%arg0: i32) -> (i32, i32) {
    %c0_i32 = arith.constant 0 : i32
    %c0_i32_0 = arith.constant 0 : i32
    %c0_i32_1 = arith.constant 0 : i32
    return %c0_i32, %c0_i32_0 : i32, i32
  }
  func.func @transform_61(%arg0: i32) -> (i32, i32) {
    %c0_i32 = arith.constant 0 : i32
    %c0_i32_0 = arith.constant 0 : i32
    %c0_i32_1 = arith.constant 0 : i32
    return %c0_i32, %c0_i32_0 : i32, i32
  }
  func.func @transform_62(%arg0: i32) -> (i32, i32) {
    %c0_i32 = arith.constant 0 : i32
    %c0_i32_0 = arith.constant 0 : i32
    %c0_i32_1 = arith.constant 0 : i32
    return %c0_i32, %c0_i32_0 : i32, i32
  }
  func.func @transform_63(%arg0: i32) -> (i32, i32) {
    %c0_i32 = arith.constant 0 : i32
    %c0_i32_0 = arith.constant 0 : i32
    %c0_i32_1 = arith.constant 0 : i32
    return %c0_i32, %c0_i32_0 : i32, i32
  }
  func.func @transform_64(%arg0: i32) -> (i32, i32, i32) {
    %c0_i32 = arith.constant 0 : i32
    %c0_i32_0 = arith.constant 0 : i32
    %c0_i32_1 = arith.constant 0 : i32
    return %arg0, %c0_i32, %c0_i32_0 : i32, i32, i32
  }
}

</mosaic_0001>

<bundles_post_ra>
// kernel: _lambda_.1
= control target key start
LH: loop header
LB: loop body
LE: loop exit
PB: predicated region body
PF: predicated region fallthrough
CT: control target
= control target key end

     0   :  { %s10347_s6 = smov 1   ;;  %s10348_s10 = smov 2   ;;  %s12204_s0 = inlined_call_operand.smem [shape: u32[65], index: -1, kind: input, shape index: {}] }
   0x1   :  { %s10488_s5 = sld [smem:[%s12204_s0]]   ;;  %s10349_s14 = smov 3  }
   0x2   :  { %s10493_s9 = sld [smem:[%s12204_s0 + %s10347_s6]]   ;;  %s10350_s18 = smov 4  }
   0x3   :  { %s10498_s13 = sld [smem:[%s12204_s0 + %s10348_s10]]   ;;  %s10351_s22 = smov 5  }
   0x4   :  { %s10503_s17 = sld [smem:[%s12204_s0 + %s10349_s14]]   ;;  %s10352_s26 = smov 6  }
   0x5   :  { %s10508_s21 = sld [smem:[%s12204_s0 + %s10350_s18]]   ;;  %s10353_s30 = smov 7  }
   0x6   :  { %s10513_s25 = sld [smem:[%s12204_s0 + %s10351_s22]]   ;;  %s10354_s4 = smov 8  }
   0x7   :  { %12307 = sst [smem:[#allocation119_spill]] %s10488_s5  ;;  %s10355_s10 = smov 9  }
   0x8   :  { %12308 = sst [smem:[#allocation120_spill]] %s10493_s9  ;;  %s10356_s15 = smov 10  }
   0x9   :  { %12309 = sst [smem:[#allocation121_spill]] %s10498_s13  ;;  %s10357_s20 = smov 11  }
   0xa   :  { %12310 = sst [smem:[#allocation122_spill]] %s10503_s17  ;;  %s10359_s1 = smov 13  }
   0xb   :  { %12311 = sst [smem:[#allocation123_spill]] %s10508_s21  ;;  %s10360_s7 = smov 14  }
   0xc   :  { %s10518_s29 = sld [smem:[%s12204_s0 + %s10352_s26]]   ;;  %s10358_s26 = smov 12  }
   0xd   :  { %s10523_s3 = sld [smem:[%s12204_s0 + %s10353_s30]]   ;;  %s10362_s22 = smov 16  }
   0xe   :  { %s10528_s8 = sld [smem:[%s12204_s0 + %s10354_s4]]   ;;  %s10363_s28 = smov 17  }
   0xf   :  { %s10533_s14 = sld [smem:[%s12204_s0 + %s10355_s10]]  }
  0x10   :  { %s10538_s19 = sld [smem:[%s12204_s0 + %s10356_s15]]   ;;  %s10361_s15 = smov 15  }
  0x11   :  { %s10543_s24 = sld [smem:[%s12204_s0 + %s10357_s20]]  }
  0x12   :  { %12312 = sst [smem:[#allocation124_spill]] %s10518_s29 }
  0x13   :  { %12313 = sst [smem:[#allocation125_spill]] %s10523_s3 }
  0x14   :  { %12314 = sst [smem:[#allocation126_spill]] %s10528_s8 }
  0x15   :  { %12315 = sst [smem:[#allocation127_spill]] %s10533_s14 }
  0x16   :  { %12316 = sst [smem:[#allocation128_spill]] %s10538_s19 }
  0x17   :  { %s10548_s30 = sld [smem:[%s12204_s0 + %s10358_s26]]  }
  0x18   :  { %s10553_s6 = sld [smem:[%s12204_s0 + %s10359_s1]]  }
  0x19   :  { %s10558_s12 = sld [smem:[%s12204_s0 + %s10360_s7]]   ;;  %s10364_s7 = smov 18  }
  0x1a   :  { %s10563_s20 = sld [smem:[%s12204_s0 + %s10361_s15]]   ;;  %s10365_s15 = smov 19  }
  0x1b   :  { %s10568_s27 = sld [smem:[%s12204_s0 + %s10362_s22]]   ;;  %s10366_s22 = smov 20  }
  0x1c   :  { %s10573_s4 = sld [smem:[%s12204_s0 + %s10363_s28]]   ;;  %s10367_s28 = smov 21  }
  0x1d   :  { %12317 = sst [smem:[#allocation129_spill]] %s10548_s30 }
  0x1e   :  { %12318 = sst [smem:[#allocation130_spill]] %s10553_s6 }
  0x1f   :  { %12319 = sst [smem:[#allocation131_spill]] %s10558_s12 }
  0x20   :  { %s10578_s3 = sld [smem:[%s12204_s0 + %s10364_s7]]   ;;  %s10368_s7 = smov 22  }
  0x21   :  { %12320 = sst [smem:[#allocation132_spill]] %s10568_s27 }
  0x22   :  { %12321 = sst [smem:[#allocation133_spill]] %s10573_s4 }
  0x23   :  { %s10583_s29 = sld [smem:[%s12204_s0 + %s10365_s15]]   ;;  %s10369_s15 = smov 23  }
  0x24   :  { %s10588_s5 = sld [smem:[%s12204_s0 + %s10366_s22]]   ;;  %s10370_s22 = smov 24  }
  0x25   :  { %s10593_s9 = sld [smem:[%s12204_s0 + %s10367_s28]]   ;;  %s10371_s28 = smov 25  }
  0x26   :  { %12322 = sst [smem:[#allocation134_spill]] %s10578_s3 }
  0x27   :  { %s10598_s3 = sld [smem:[%s12204_s0 + %s10368_s7]]   ;;  %s10372_s7 = smov 26  }
  0x28   :  { %s10603_s27 = sld [smem:[%s12204_s0 + %s10369_s15]]   ;;  %s10373_s15 = smov 27  }
  0x29   :  { %s10618_s12 = sld [smem:[%s12204_s0 + %s10372_s7]]   ;;  %s10376_s7 = smov 30  }
  0x2a   :  { %12323 = sst [smem:[#allocation135_spill]] %s10588_s5 }
  0x2b   :  { %12324 = sst [smem:[#allocation136_spill]] %s10593_s9 }
  0x2c   :  { %s10608_s5 = sld [smem:[%s12204_s0 + %s10370_s22]]   ;;  %s10374_s22 = smov 28  }
  0x2d   :  { %12325 = sst [smem:[#allocation137_spill]] %s10598_s3 }
  0x2e   :  { %12326 = sst [smem:[#allocation138_spill]] %s10603_s27 }
  0x2f   :  { %s10613_s9 = sld [smem:[%s12204_s0 + %s10371_s28]]   ;;  %s10375_s28 = smov 29  }
  0x30   :  { %12329 = sst [smem:[#allocation141_spill]] %s10618_s12 }
  0x31   :  { %s10623_s27 = sld [smem:[%s12204_s0 + %s10373_s15]]   ;;  %s10377_s15 = smov 31  }
  0x32   :  { %12327 = sst [smem:[#allocation139_spill]] %s10608_s5 }
  0x33   :  { %s10628_s30 = sld [smem:[%s12204_s0 + %s10374_s22]]   ;;  %s10378_s22 = smov 32  }
  0x34   :  { %s10638_s19 = sld [smem:[%s12204_s0 + %s10376_s7]]   ;;  %s10380_s7 = smov 34  }
  0x35   :  { %12328 = sst [smem:[#allocation140_spill]] %s10613_s9 }
  0x36   :  { %s10633_s9 = sld [smem:[%s12204_s0 + %s10375_s28]]   ;;  %s10379_s28 = smov 33  }
  0x37   :  { %12330 = sst [smem:[#allocation142_spill]] %s10623_s27 }
  0x38   :  { %s10643_s27 = sld [smem:[%s12204_s0 + %s10377_s15]]   ;;  %s10381_s15 = smov 35  }
  0x39   :  { %s10648_s8 = sld [smem:[%s12204_s0 + %s10378_s22]]   ;;  %s10382_s22 = smov 36  }
  0x3a   :  { %s10658_s21 = sld [smem:[%s12204_s0 + %s10380_s7]]   ;;  %s10384_s7 = smov 38  }
  0x3b   :  { %s10668_s13 = sld [smem:[%s12204_s0 + %s10382_s22]]   ;;  %s10386_s22 = smov 40  }
  0x3c   :  { %12331 = sst [smem:[#allocation143_spill]] %s10633_s9 }
  0x3d   :  { %s10653_s9 = sld [smem:[%s12204_s0 + %s10379_s28]]   ;;  %s10383_s28 = smov 37  }
  0x3e   :  { %12332 = sst [smem:[#allocation144_spill]] %s10643_s27 }
  0x3f   :  { %12333 = sst [smem:[#allocation145_spill]] %s10648_s8 }
  0x40   :  { %12335 = sst [smem:[#allocation147_spill]] %s10658_s21 }
  0x41   :  { %s10663_s27 = sld [smem:[%s12204_s0 + %s10381_s15]]   ;;  %s10385_s15 = smov 39  }
  0x42   :  { %12337 = sst [smem:[#allocation149_spill]] %s10668_s13 }
  0x43   :  { %12334 = sst [smem:[#allocation146_spill]] %s10653_s9 }
  0x44   :  { %s10673_s9 = sld [smem:[%s12204_s0 + %s10383_s28]]   ;;  %s10387_s28 = smov 41  }
  0x45   :  { %s10678_s21 = sld [smem:[%s12204_s0 + %s10384_s7]]   ;;  %s10388_s7 = smov 42  }
  0x46   :  { %s10688_s13 = sld [smem:[%s12204_s0 + %s10386_s22]]   ;;  %s10390_s22 = smov 44  }
  0x47   :  { %12336 = sst [smem:[#allocation148_spill]] %s10663_s27 }
  0x48   :  { %s10683_s27 = sld [smem:[%s12204_s0 + %s10385_s15]]   ;;  %s10389_s15 = smov 43  }
  0x4a   :  { %12338 = sst [smem:[#allocation150_spill]] %s10673_s9 }
  0x4b   :  { %12339 = sst [smem:[#allocation151_spill]] %s10678_s21 }
  0x4c   :  { %12341 = sst [smem:[#allocation153_spill]] %s10688_s13 }
  0x4d   :  { %s10693_s9 = sld [smem:[%s12204_s0 + %s10387_s28]]   ;;  %s10391_s28 = smov 45  }
  0x4e   :  { %12340 = sst [smem:[#allocation152_spill]] %s10683_s27 }
  0x4f   :  { %s10698_s21 = sld [smem:[%s12204_s0 + %s10388_s7]]   ;;  %s10392_s7 = smov 46  }
  0x50   :  { %s10703_s27 = sld [smem:[%s12204_s0 + %s10389_s15]]   ;;  %s10393_s15 = smov 47  }
  0x51   :  { %s10708_s13 = sld [smem:[%s12204_s0 + %s10390_s22]]   ;;  %s10394_s22 = smov 48  }
  0x53   :  { %12342 = sst [smem:[#allocation154_spill]] %s10693_s9 }
  0x54   :  { %s10713_s9 = sld [smem:[%s12204_s0 + %s10391_s28]]   ;;  %s10395_s28 = smov 49  }
  0x55   :  { %12343 = sst [smem:[#allocation155_spill]] %s10698_s21 }
  0x56   :  { %12344 = sst [smem:[#allocation156_spill]] %s10703_s27 }
  0x57   :  { %12345 = sst [smem:[#allocation157_spill]] %s10708_s13 }
  0x58   :  { %s10718_s21 = sld [smem:[%s12204_s0 + %s10392_s7]]   ;;  %s10396_s7 = smov 50  }
  0x59   :  { %s10723_s27 = sld [smem:[%s12204_s0 + %s10393_s15]]   ;;  %s10397_s15 = smov 51  }
  0x5a   :  { %12346 = sst [smem:[#allocation158_spill]] %s10713_s9 }
  0x5b   :  { %s10728_s13 = sld [smem:[%s12204_s0 + %s10394_s22]]   ;;  %s10398_s22 = smov 52  }
  0x5c   :  { %s10733_s9 = sld [smem:[%s12204_s0 + %s10395_s28]]   ;;  %s10399_s28 = smov 53  }
  0x5e   :  { %12347 = sst [smem:[#allocation159_spill]] %s10718_s21 }
  0x5f   :  { %12348 = sst [smem:[#allocation160_spill]] %s10723_s27 }
  0x60   :  { %s10738_s21 = sld [smem:[%s12204_s0 + %s10396_s7]]   ;;  %s10400_s7 = smov 54  }
  0x61   :  { %12349 = sst [smem:[#allocation161_spill]] %s10728_s13 }
  0x62   :  { %12350 = sst [smem:[#allocation162_spill]] %s10733_s9 }
  0x63   :  { %s10743_s27 = sld [smem:[%s12204_s0 + %s10397_s15]]   ;;  %s10401_s15 = smov 55  }
  0x64   :  { %s10748_s13 = sld [smem:[%s12204_s0 + %s10398_s22]]   ;;  %s10402_s22 = smov 56  }
  0x65   :  { %s10753_s9 = sld [smem:[%s12204_s0 + %s10399_s28]]   ;;  %s10403_s28 = smov 57  }
  0x66   :  { %12351 = sst [smem:[#allocation163_spill]] %s10738_s21 }
  0x67   :  { %s10758_s21 = sld [smem:[%s12204_s0 + %s10400_s7]]   ;;  %s10404_s7 = smov 58  }
  0x69   :  { %12352 = sst [smem:[#allocation164_spill]] %s10743_s27 }
  0x6a   :  { %12353 = sst [smem:[#allocation165_spill]] %s10748_s13 }
  0x6b   :  { %12354 = sst [smem:[#allocation166_spill]] %s10753_s9 }
  0x6c   :  { %s10763_s27 = sld [smem:[%s12204_s0 + %s10401_s15]]   ;;  %s10405_s15 = smov 59  }
  0x6d   :  { %12355 = sst [smem:[#allocation167_spill]] %s10758_s21 }
  0x6e   :  { %s10768_s13 = sld [smem:[%s12204_s0 + %s10402_s22]]   ;;  %s10406_s22 = smov 60  }
  0x6f   :  { %s10773_s9 = sld [smem:[%s12204_s0 + %s10403_s28]]   ;;  %s10407_s28 = smov 61  }
  0x70   :  { %s10778_s21 = sld [smem:[%s12204_s0 + %s10404_s7]]   ;;  %s10408_s7 = smov 62  }
  0x72   :  { %12356 = sst [smem:[#allocation168_spill]] %s10763_s27 }
  0x73   :  { %s10783_s27 = sld [smem:[%s12204_s0 + %s10405_s15]]   ;;  %s10409_s15 = smov 63  }
  0x74   :  { %12357 = sst [smem:[#allocation169_spill]] %s10768_s13 }
  0x75   :  { %12358 = sst [smem:[#allocation170_spill]] %s10773_s9 }
  0x76   :  { %12359 = sst [smem:[#allocation171_spill]] %s10778_s21 }
  0x77   :  { %s10788_s13 = sld [smem:[%s12204_s0 + %s10406_s22]]   ;;  %s10410_s22 = smov 64  }
  0x78   :  { %s10793_s9 = sld [smem:[%s12204_s0 + %s10407_s28]]  }
  0x79   :  { %12360 = sst [smem:[#allocation172_spill]] %s10783_s27 }
  0x7a   :  { %s10798_s21 = sld [smem:[%s12204_s0 + %s10408_s7]]  }
  0x7b   :  { %s10803_s27 = sld [smem:[%s12204_s0 + %s10409_s15]]  }
  0x7d   :  { %12361 = sst [smem:[#allocation173_spill]] %s10788_s13 }
  0x7e   :  { %s10808_s13 = sld [smem:[%s12204_s0 + %s10410_s22]]  }
  0x7f   :  { %134 = vsyncpa [#allocation3], 0 }
  0x80   :  { %135 = vsyncpa [#allocation6], 0 }
  0x81   :  { %136 = vsyncpa [#allocation9], 0 }
  0x82   :  { %137 = vsyncpa [#allocation12], 0 }
  0x83   :  { %138 = vsyncpa [#allocation15], 0 }
  0x84   :  { %139 = vsyncpa [#allocation18], 0 }
  0x85   :  { %140 = vsyncpa [#allocation21], 0 }
  0x86   :  { %141 = vsyncpa [#allocation24], 0 }
  0x87   :  { %142 = vsyncpa [#allocation27], 0 }
  0x88   :  { %143 = vsyncpa [#allocation30], 0 }
  0x89   :  { %144 = vsyncpa [#allocation33], 0 }
  0x8a   :  { %145 = vsyncpa [#allocation36], 0 }
  0x8b   :  { %146 = vsyncpa [#allocation39], 0 }
  0x8c   :  { %147 = vsyncpa [#allocation42], 0 }
  0x8d   :  { %148 = vsyncpa [#allocation45], 0 }
  0x8e   :  { %149 = vsyncpa [#allocation48], 0 }
  0x8f   :  { %150 = vsyncpa [#allocation51], 0 }
  0x90   :  { %151 = vsyncpa [#allocation54], 0 }
  0x91   :  { %152 = vsyncpa [#allocation57], 0 }
  0x92   :  { %153 = vsyncpa [#allocation60], 0 }
  0x93   :  { %154 = vsyncpa [#allocation63], 0 }
  0x94   :  { %155 = vsyncpa [#allocation66], 0 }
  0x95   :  { %156 = vsyncpa [#allocation69], 0 }
  0x96   :  { %157 = vsyncpa [#allocation72], 0 }
  0x97   :  { %158 = vsyncpa [#allocation75], 0 }
  0x98   :  { %159 = vsyncpa [#allocation78], 0 }
  0x99   :  { %160 = vsyncpa [#allocation81], 0 }
  0x9a   :  { %161 = vsyncpa [#allocation84], 0 }
  0x9b   :  { %162 = vsyncpa [#allocation87], 0 }
  0x9c   :  { %163 = vsyncpa [#allocation4], 0 }
  0x9d   :  { %165 = vsyncpa [#allocation4 + $0x1], 0  ;;  %s10810_s0 = smov 0   ;;  %s10812_s28 = smov 0  }
  0x9e   :  { %s10814_s1 = smov 0   ;;  %s10816_s2 = smov 0  }
  0x9f LB: > { %s12362_s14 = sld [smem:[#allocation127_spill]]  ;;  %s12363_s12 = sld [smem:[#allocation141_spill]]  ;;  %s10345_s2 = sphi %s10816_s2, %s12431_s2   ;;  %s10341_s1 = sphi %s10814_s1, %s12433_s1   ;;  %s10337_s28 = sphi %s10812_s28, %s12435_s28   ;;  %s10333_s0 = sphi %s10810_s0, %s12434_s0  }
  0xa0   : > { %s12364_s8 = sld [smem:[#allocation145_spill]]  ;;  %s12365_s5 = sld [smem:[#allocation139_spill]] }
  0xa1   : > { %s12366_s4 = sld [smem:[#allocation133_spill]]  ;;  %s12367_s3 = sld [smem:[#allocation137_spill]] }
  0xa2   : > { %s12368_s6 = sld [smem:[#allocation130_spill]]  ;;  %12370 = sst [smem:[#allocation174_spill]] %s10341_s1 }
  0xa3   : > { %s12369_s17 = sld [smem:[#allocation122_spill]]  ;;  %s10831_s7 = sadd.s32 4294967295, %s10345_s2  }
  0xa4   : > { %s6836_s10 = sadd.s32 4294967294, %s10345_s2   ;;  %s10835_s11 = sadd.s32 1, %s10345_s2  }
  0xa5   : > { %12371 = sst [smem:[#allocation175_spill]] %s10835_s11  ;;  %s1532_s15 = sadd.s32 1, %s10341_s1 }
  0xa6   : > { %s1529_s16 = ssub.s32 %s10345_s2, %s10835_s11  ;;  %p1542_p0 = scmp.ne.s32.totalorder %s10341_s1, %s10337_s28 }
  0xa7   : > { %p1530_p1 = scmp.eq.s32.totalorder %s1529_s16, 0  ;;  %p1543_p2 = scmp.eq.s32.totalorder %s10831_s7, 1 }
  0xa8   : > { %p1548_p3 = scmp.ne.s32.totalorder %s10337_s28, %s10333_s0  ;;  %p1549_p4 = scmp.eq.s32.totalorder %s6836_s10, 1 }
  0xa9   : > { %s10846_s18 = scalar_select %p1530_p1, %s10341_s1, %s1532_s15  }
  0xaa   : > { %p10848_p5 = por %p1543_p2, %p1542_p0  ;;  %p10852_p6 = por %p1549_p4, %p1548_p3 }
  0xab   : > { %12372 = sst [smem:[#allocation176_spill]] %s10846_s18  ;;  %p6837_p7 = scmp.ge.s32.totalorder %s10345_s2, 1 }
  0xac   : > { %s12373_s22 = scalar_select %p10848_p5, 1, 0 }
  0xad   : > { %s12374_s23 = scalar_select %p10852_p6, 1, 0 }
  0xae   : > { %p1556_p8 = scmp.lt.s32.totalorder %s10345_s2, 3 }
  0xaf   : > { %12375 = sst [smem:[#allocation177_spill]] %s12374_s23 }
  0xb0   : > { %p10858_p9 = pnand %p6837_p7, %p1556_p8 }
  0xb1   : > { %p8173_p10 = scmp.eq.s32.totalorder (!%p10858_p9), %s10831_s7, 0  ;;  %s10411_s10 = smov (!%p10858_p9), [#allocation5]  }
  0xb2   : > { %1560 = sbr.rel (%p10858_p9) target bundleno = 1573 (0x625), region = 12  ;;  %s1582_s15 = sshll.u32 (!%p10858_p9), %s10411_s10, 4  ;;  %s1583_s15 = int_to_ptr.vmem [resolvable:$true] %s1582_s15 }
  0xb3   : > { %s10412_s16 = smov (!%p10858_p9), [#allocation8]   ;;  %s8711_s1 = scalar_lea.hbm (!%p10858_p9), %s12369_s17, 16 }
  0xb4   : > { %s1604_s18 = sshll.u32 (!%p10858_p9), %s10412_s16, 4  ;;  %p8712_p11 = scmp.ne.s32.totalorder (!%p10858_p9), %s12369_s17, %s8711_s1  ;;  %s1605_s18 = int_to_ptr.vmem [resolvable:$true] %s1604_s18 }
  0xb5   : > { %p8717_p0 = scmp.lt.u32.totalorder (!%p10858_p9), %s8711_s1, %s12369_s17 }
  0xb6   : > { %p8713_p12 = pnand (!%p10858_p9), %p8712_p11, %p8173_p10 }
  0xb8   : > { %p8714_p13 = pneg (!%p10858_p9), %p8713_p12 }
  0xba   : > { %p8719_p1 = pnand %p8717_p0, %p8714_p13 }
  0xbc   : > { %8722 = shalt.err (!%p8719_p1)
}
  0xbd   : > { %s8723_s11 = scalar_lea.vmem %s1583_s15, 16  ;;  %s8729_s23 = scalar_lea.vmem %s1583_s15, 32 }
  0xbe   : > { %p8724_p2 = scmp.ne.s32.totalorder %s1583_s15, %s8723_s11  ;;  %p8730_p7 = scmp.lt.s32.totalorder %s1583_s15, %s1583_s15 }
  0xbf   : > { %p8731_p8 = scmp.lt.s32.totalorder %s8729_s23, %s8723_s11 }
  0xc0   : > { %p8725_p3 = pnand %p8724_p2, %p8173_p10 }
  0xc1   : > { %p8732_p6 = por %p8731_p8, %p8730_p7 }
  0xc2   : > { %p8726_p4 = pneg %p8725_p3 }
  0xc4   : > { %p8733_p5 = pnand %p8732_p6, %p8726_p4 }
  0xc6   : > { %8736 = shalt.err (!%p8733_p5)
}
  0xc7   : > { %7946 = dma.hbm_to_vmem [thread:$0]  (%p8173_p10), %s12369_s17, 16, %s1583_s15, [#allocation6]  }
  0xc8   : > { %s8737_s1 = scalar_lea.hbm %s10513_s25, 16 }
  0xc9   : > { %p8738_p11 = scmp.ne.s32.totalorder %s10513_s25, %s8737_s1  ;;  %p8743_p0 = scmp.lt.u32.totalorder %s8737_s1, %s10513_s25 }
  0xcb   : > { %p8739_p12 = pnand %p8738_p11, %p8173_p10 }
  0xcd   : > { %p8740_p13 = pneg %p8739_p12 }
  0xcf   : > { %p8745_p1 = pnand %p8743_p0, %p8740_p13 }
  0xd1   : > { %8748 = shalt.err (!%p8745_p1)
}
  0xd2   : > { %s8749_s11 = scalar_lea.vmem %s1605_s18, 16  ;;  %s8755_s23 = scalar_lea.vmem %s1605_s18, 32 }
  0xd3   : > { %p8750_p5 = scmp.ne.s32.totalorder %s1605_s18, %s8749_s11  ;;  %p8756_p3 = scmp.lt.s32.totalorder %s1605_s18, %s1605_s18 }
  0xd4   : > { %p8757_p4 = scmp.lt.s32.totalorder %s8755_s23, %s8749_s11 }
  0xd5   : > { %p8751_p6 = pnand %p8750_p5, %p8173_p10 }
  0xd6   : > { %p8758_p7 = por %p8757_p4, %p8756_p3 }
  0xd7   : > { %p8752_p2 = pneg %p8751_p6 }
  0xd9   : > { %p8759_p8 = pnand %p8758_p7, %p8752_p2 }
  0xdb   : > { %8762 = shalt.err (!%p8759_p8)
}
  0xdc   : > { %7950 = dma.hbm_to_vmem [thread:$0]  (%p8173_p10), %s10513_s25, 16, %s1605_s18, [#allocation9]  }
  0xdd   : > { %s10413_s10 = smov [#allocation11]   ;;  %s10414_s16 = smov [#allocation14]  }
  0xde   : > { %s1632_s15 = sshll.u32 %s10413_s10, 4  ;;  %s1654_s1 = sshll.u32 %s10414_s16, 4  ;;  %s1633_s15 = int_to_ptr.vmem [resolvable:$true] %s1632_s15  ;;  %s1655_s1 = int_to_ptr.vmem [resolvable:$true] %s1654_s1 }
  0xdf   : > { %s8763_s17 = scalar_lea.hbm %s12362_s14, 16 }
  0xe0   : > { %p8764_p11 = scmp.ne.s32.totalorder %s12362_s14, %s8763_s17  ;;  %p8769_p0 = scmp.lt.u32.totalorder %s8763_s17, %s12362_s14 }
  0xe2   : > { %p8765_p12 = pnand %p8764_p11, %p8173_p10 }
  0xe4   : > { %p8766_p13 = pneg %p8765_p12 }
  0xe6   : > { %p8771_p1 = pnand %p8769_p0, %p8766_p13 }
  0xe8   : > { %8774 = shalt.err (!%p8771_p1)
}
  0xe9   : > { %s8775_s11 = scalar_lea.vmem %s1633_s15, 16  ;;  %s8781_s18 = scalar_lea.vmem %s1633_s15, 32 }
  0xea   : > { %p8776_p5 = scmp.ne.s32.totalorder %s1633_s15, %s8775_s11  ;;  %p8782_p3 = scmp.lt.s32.totalorder %s1633_s15, %s1633_s15 }
  0xeb   : > { %p8783_p4 = scmp.lt.s32.totalorder %s8781_s18, %s8775_s11 }
  0xec   : > { %p8777_p6 = pnand %p8776_p5, %p8173_p10 }
  0xed   : > { %p8784_p7 = por %p8783_p4, %p8782_p3 }
  0xee   : > { %p8778_p2 = pneg %p8777_p6 }
  0xf0   : > { %p8785_p8 = pnand %p8784_p7, %p8778_p2 }
  0xf2   : > { %8788 = shalt.err (!%p8785_p8)
}
  0xf3   : > { %7954 = dma.hbm_to_vmem [thread:$0]  (%p8173_p10), %s12362_s14, 16, %s1633_s15, [#allocation12]  }
  0xf4   : > { %s8789_s17 = scalar_lea.hbm %s10543_s24, 16 }
  0xf5   : > { %p8790_p11 = scmp.ne.s32.totalorder %s10543_s24, %s8789_s17  ;;  %p8795_p0 = scmp.lt.u32.totalorder %s8789_s17, %s10543_s24 }
  0xf7   : > { %p8791_p12 = pnand %p8790_p11, %p8173_p10 }
  0xf9   : > { %p8792_p13 = pneg %p8791_p12 }
  0xfb   : > { %p8797_p1 = pnand %p8795_p0, %p8792_p13 }
  0xfd   : > { %8800 = shalt.err (!%p8797_p1)
}
  0xfe   : > { %s8801_s23 = scalar_lea.vmem %s1655_s1, 16  ;;  %s8807_s10 = scalar_lea.vmem %s1655_s1, 32 }
  0xff   : > { %p8802_p5 = scmp.ne.s32.totalorder %s1655_s1, %s8801_s23  ;;  %p8808_p3 = scmp.lt.s32.totalorder %s1655_s1, %s1655_s1 }
 0x100   : > { %p8809_p4 = scmp.lt.s32.totalorder %s8807_s10, %s8801_s23 }
 0x101   : > { %p8803_p6 = pnand %p8802_p5, %p8173_p10 }
 0x102   : > { %p8810_p7 = por %p8809_p4, %p8808_p3 }
 0x103   : > { %p8804_p2 = pneg %p8803_p6 }
 0x105   : > { %p8811_p8 = pnand %p8810_p7, %p8804_p2 }
 0x107   : > { %8814 = shalt.err (!%p8811_p8)
}
 0x108   : > { %7958 = dma.hbm_to_vmem [thread:$0]  (%p8173_p10), %s10543_s24, 16, %s1655_s1, [#allocation15]  }
 0x109   : > { %s10415_s15 = smov [#allocation17]   ;;  %s10416_s11 = smov [#allocation20]  }
 0x10a   : > { %s1677_s16 = sshll.u32 %s10415_s15, 4  ;;  %s1703_s18 = sshll.u32 %s10416_s11, 4  ;;  %s1678_s16 = int_to_ptr.vmem [resolvable:$true] %s1677_s16  ;;  %s1704_s18 = int_to_ptr.vmem [resolvable:$true] %s1703_s18 }
 0x10b   : > { %s8815_s17 = scalar_lea.hbm %s12368_s6, 1024 }
 0x10c   : > { %p8816_p11 = scmp.ne.s32.totalorder %s12368_s6, %s8815_s17  ;;  %p8821_p0 = scmp.lt.u32.totalorder %s8815_s17, %s12368_s6 }
 0x10e   : > { %p8817_p12 = pnand %p8816_p11, %p8173_p10 }
 0x110   : > { %p8818_p13 = pneg %p8817_p12 }
 0x112   : > { %p8823_p1 = pnand %p8821_p0, %p8818_p13 }
 0x114   : > { %8826 = shalt.err (!%p8823_p1)
}
 0x115   : > { %s8827_s23 = scalar_lea.vmem %s1678_s16, 1024  ;;  %p8834_p3 = scmp.lt.s32.totalorder %s1678_s16, %s1678_s16 }
 0x116   : > { %p8828_p5 = scmp.ne.s32.totalorder %s1678_s16, %s8827_s23  ;;  %p8835_p4 = scmp.lt.s32.totalorder %s8827_s23, %s8827_s23 }
 0x118   : > { %p8829_p6 = pnand %p8828_p5, %p8173_p10  ;;  %p8836_p7 = por %p8835_p4, %p8834_p3 }
 0x11a   : > { %p8830_p2 = pneg %p8829_p6 }
 0x11c   : > { %p8837_p8 = pnand %p8836_p7, %p8830_p2 }
 0x11e   : > { %8840 = shalt.err (!%p8837_p8)
}
 0x11f   : > { %s12255_s1 = smov 64   ;;  %s12257_s10 = smov 4  }
 0x120   : > { %7962 = dma.hbm_to_vmem [thread:$0]  (%p8173_p10), %s12368_s6, 1024, %s1678_s16, [#allocation18], %s12255_s1, %s12255_s1, %s12257_s10  }
 0x121   : > { %s8841_s15 = scalar_lea.hbm %s10563_s20, 3072 }
 0x122   : > { %p8842_p11 = scmp.ne.s32.totalorder %s10563_s20, %s8841_s15  ;;  %p8847_p0 = scmp.lt.u32.totalorder %s8841_s15, %s10563_s20 }
 0x124   : > { %p8843_p12 = pnand %p8842_p11, %p8173_p10 }
 0x126   : > { %p8844_p13 = pneg %p8843_p12 }
 0x128   : > { %p8849_p1 = pnand %p8847_p0, %p8844_p13 }
 0x12a   : > { %8852 = shalt.err (!%p8849_p1)
}
 0x12b   : > { %s8853_s11 = scalar_lea.vmem %s1704_s18, 3072  ;;  %p8860_p3 = scmp.lt.s32.totalorder %s1704_s18, %s1704_s18 }
 0x12c   : > { %p8854_p5 = scmp.ne.s32.totalorder %s1704_s18, %s8853_s11  ;;  %p8861_p4 = scmp.lt.s32.totalorder %s8853_s11, %s8853_s11 }
 0x12e   : > { %p8855_p6 = pnand %p8854_p5, %p8173_p10  ;;  %p8862_p7 = por %p8861_p4, %p8860_p3 }
 0x130   : > { %p8856_p2 = pneg %p8855_p6 }
 0x132   : > { %p8863_p8 = pnand %p8862_p7, %p8856_p2 }
 0x134   : > { %8866 = shalt.err (!%p8863_p8)
}
 0x135   : > { %s10419_s16 = smov 192   ;;  %s10420_s17 = smov 12  }
 0x136   : > { %7966 = dma.hbm_to_vmem [thread:$0]  (%p8173_p10), %s10563_s20, 3072, %s1704_s18, [#allocation21], %s10419_s16, %s10419_s16, %s10420_s17  }
 0x137   : > { %s10421_s23 = smov [#allocation23]   ;;  %s10422_s1 = smov [#allocation26]  }
 0x138   : > { %s1728_s15 = sshll.u32 %s10421_s23, 4  ;;  %s1750_s10 = sshll.u32 %s10422_s1, 4  ;;  %s1729_s15 = int_to_ptr.vmem [resolvable:$true] %s1728_s15  ;;  %s1751_s10 = int_to_ptr.vmem [resolvable:$true] %s1750_s10 }
 0x139   : > { %s8867_s6 = scalar_lea.hbm %s12366_s4, 32 }
 0x13a   : > { %p8868_p11 = scmp.ne.s32.totalorder %s12366_s4, %s8867_s6  ;;  %p8873_p0 = scmp.lt.u32.totalorder %s8867_s6, %s12366_s4 }
 0x13c   : > { %p8869_p12 = pnand %p8868_p11, %p8173_p10 }
 0x13e   : > { %p8870_p13 = pneg %p8869_p12 }
 0x140   : > { %p8875_p1 = pnand %p8873_p0, %p8870_p13 }
 0x142   : > { %8878 = shalt.err (!%p8875_p1)
}
 0x143   : > { %s8879_s11 = scalar_lea.vmem %s1729_s15, 32  ;;  %p8886_p3 = scmp.lt.s32.totalorder %s1729_s15, %s1729_s15 }
 0x144   : > { %p8880_p5 = scmp.ne.s32.totalorder %s1729_s15, %s8879_s11  ;;  %p8887_p4 = scmp.lt.s32.totalorder %s8879_s11, %s8879_s11 }
 0x146   : > { %p8881_p6 = pnand %p8880_p5, %p8173_p10  ;;  %p8888_p7 = por %p8887_p4, %p8886_p3 }
 0x148   : > { %p8882_p2 = pneg %p8881_p6 }
 0x14a   : > { %p8889_p8 = pnand %p8888_p7, %p8882_p2 }
 0x14c   : > { %8892 = shalt.err (!%p8889_p8)
}
 0x14d   : > { %7970 = dma.hbm_to_vmem [thread:$0]  (%p8173_p10), %s12366_s4, 32, %s1729_s15, [#allocation24]  }
 0x14e   : > { %s8893_s6 = scalar_lea.hbm %s10583_s29, 16 }
 0x14f   : > { %p8894_p11 = scmp.ne.s32.totalorder %s10583_s29, %s8893_s6  ;;  %p8899_p0 = scmp.lt.u32.totalorder %s8893_s6, %s10583_s29 }
 0x151   : > { %p8895_p12 = pnand %p8894_p11, %p8173_p10 }
 0x153   : > { %p8896_p13 = pneg %p8895_p12 }
 0x155   : > { %p8901_p1 = pnand %p8899_p0, %p8896_p13 }
 0x157   : > { %8904 = shalt.err (!%p8901_p1)
}
 0x158   : > { %s8905_s18 = scalar_lea.vmem %s1751_s10, 16  ;;  %s8911_s1 = scalar_lea.vmem %s1751_s10, 32 }
 0x159   : > { %p8906_p5 = scmp.ne.s32.totalorder %s1751_s10, %s8905_s18  ;;  %p8912_p3 = scmp.lt.s32.totalorder %s1751_s10, %s1751_s10 }
 0x15a   : > { %p8913_p4 = scmp.lt.s32.totalorder %s8911_s1, %s8905_s18 }
 0x15b   : > { %p8907_p6 = pnand %p8906_p5, %p8173_p10 }
 0x15c   : > { %p8914_p7 = por %p8913_p4, %p8912_p3 }
 0x15d   : > { %p8908_p2 = pneg %p8907_p6 }
 0x15f   : > { %p8915_p8 = pnand %p8914_p7, %p8908_p2 }
 0x161   : > { %8918 = shalt.err (!%p8915_p8)
}
 0x162   : > { %7974 = dma.hbm_to_vmem [thread:$0]  (%p8173_p10), %s10583_s29, 16, %s1751_s10, [#allocation27]  }
 0x163   : > { %s10423_s16 = smov [#allocation29]   ;;  %s10424_s23 = smov [#allocation32]  }
 0x164   : > { %s1775_s17 = sshll.u32 %s10423_s16, 4  ;;  %s1797_s15 = sshll.u32 %s10424_s23, 4  ;;  %s1776_s17 = int_to_ptr.vmem [resolvable:$true] %s1775_s17  ;;  %s1798_s15 = int_to_ptr.vmem [resolvable:$true] %s1797_s15 }
 0x165   : > { %s8919_s11 = scalar_lea.hbm %s12367_s3, 16 }
 0x166   : > { %p8920_p11 = scmp.ne.s32.totalorder %s12367_s3, %s8919_s11  ;;  %p8925_p0 = scmp.lt.u32.totalorder %s8919_s11, %s12367_s3 }
 0x168   : > { %p8921_p12 = pnand %p8920_p11, %p8173_p10 }
 0x16a   : > { %p8922_p13 = pneg %p8921_p12 }
 0x16c   : > { %p8927_p1 = pnand %p8925_p0, %p8922_p13 }
 0x16e   : > { %8930 = shalt.err (!%p8927_p1)
}
 0x16f   : > { %s8931_s6 = scalar_lea.vmem %s1776_s17, 16  ;;  %s8937_s10 = scalar_lea.vmem %s1776_s17, 32 }
 0x170   : > { %p8932_p5 = scmp.ne.s32.totalorder %s1776_s17, %s8931_s6  ;;  %p8938_p3 = scmp.lt.s32.totalorder %s1776_s17, %s1776_s17 }
 0x171   : > { %p8939_p4 = scmp.lt.s32.totalorder %s8937_s10, %s8931_s6 }
 0x172   : > { %p8933_p6 = pnand %p8932_p5, %p8173_p10 }
 0x173   : > { %p8940_p7 = por %p8939_p4, %p8938_p3 }
 0x174   : > { %p8934_p2 = pneg %p8933_p6 }
 0x176   : > { %p8941_p8 = pnand %p8940_p7, %p8934_p2 }
 0x178   : > { %8944 = shalt.err (!%p8941_p8)
}
 0x179   : > { %7978 = dma.hbm_to_vmem [thread:$0]  (%p8173_p10), %s12367_s3, 16, %s1776_s17, [#allocation30]  }
 0x17a   : > { %s8945_s18 = scalar_lea.hbm %s12365_s5, 16 }
 0x17b   : > { %p8946_p11 = scmp.ne.s32.totalorder %s12365_s5, %s8945_s18  ;;  %p8951_p0 = scmp.lt.u32.totalorder %s8945_s18, %s12365_s5 }
 0x17d   : > { %p8947_p12 = pnand %p8946_p11, %p8173_p10 }
 0x17f   : > { %p8948_p13 = pneg %p8947_p12 }
 0x181   : > { %p8953_p1 = pnand %p8951_p0, %p8948_p13 }
 0x183   : > { %8956 = shalt.err (!%p8953_p1)
}
 0x184   : > { %s8957_s1 = scalar_lea.vmem %s1798_s15, 16  ;;  %s8963_s16 = scalar_lea.vmem %s1798_s15, 32 }
 0x185   : > { %p8958_p5 = scmp.ne.s32.totalorder %s1798_s15, %s8957_s1  ;;  %p8964_p3 = scmp.lt.s32.totalorder %s1798_s15, %s1798_s15 }
 0x186   : > { %p8965_p4 = scmp.lt.s32.totalorder %s8963_s16, %s8957_s1 }
 0x187   : > { %p8959_p6 = pnand %p8958_p5, %p8173_p10 }
 0x188   : > { %p8966_p7 = por %p8965_p4, %p8964_p3 }
 0x189   : > { %p8960_p2 = pneg %p8959_p6 }
 0x18b   : > { %p8967_p8 = pnand %p8966_p7, %p8960_p2 }
 0x18d   : > { %8970 = shalt.err (!%p8967_p8)
}
 0x18e   : > { %7982 = dma.hbm_to_vmem [thread:$0]  (%p8173_p10), %s12365_s5, 16, %s1798_s15, [#allocation33]  }
 0x18f   : > { %s10425_s17 = smov [#allocation35]   ;;  %s10426_s11 = smov [#allocation38]  }
 0x190   : > { %s1818_s23 = sshll.u32 %s10425_s17, 4  ;;  %s1844_s6 = sshll.u32 %s10426_s11, 4  ;;  %s1819_s23 = int_to_ptr.vmem [resolvable:$true] %s1818_s23  ;;  %s1845_s6 = int_to_ptr.vmem [resolvable:$true] %s1844_s6 }
 0x191   : > { %s8971_s10 = scalar_lea.hbm %s12363_s12, 1024 }
 0x192   : > { %p8972_p11 = scmp.ne.s32.totalorder %s12363_s12, %s8971_s10  ;;  %p8977_p0 = scmp.lt.u32.totalorder %s8971_s10, %s12363_s12 }
 0x194   : > { %p8973_p12 = pnand %p8972_p11, %p8173_p10 }
 0x196   : > { %p8974_p13 = pneg %p8973_p12 }
 0x198   : > { %p8979_p1 = pnand %p8977_p0, %p8974_p13 }
 0x19a   : > { %8982 = shalt.err (!%p8979_p1)
}
 0x19b   : > { %s8983_s18 = scalar_lea.vmem %s1819_s23, 1024  ;;  %p8990_p3 = scmp.lt.s32.totalorder %s1819_s23, %s1819_s23 }
 0x19c   : > { %p8984_p5 = scmp.ne.s32.totalorder %s1819_s23, %s8983_s18  ;;  %p8991_p4 = scmp.lt.s32.totalorder %s8983_s18, %s8983_s18 }
 0x19e   : > { %p8985_p6 = pnand %p8984_p5, %p8173_p10  ;;  %p8992_p7 = por %p8991_p4, %p8990_p3 }
 0x1a0   : > { %p8986_p2 = pneg %p8985_p6 }
 0x1a2   : > { %p8993_p8 = pnand %p8992_p7, %p8986_p2 }
 0x1a4   : > { %8996 = shalt.err (!%p8993_p8)
}
 0x1a5   : > { %s12377_s15 = smov 4   ;;  %s12378_s1 = smov 64  }
 0x1a6   : > { %7986 = dma.hbm_to_vmem [thread:$0]  (%p8173_p10), %s12363_s12, 1024, %s1819_s23, [#allocation36], %s12378_s1, %s12378_s1, %s12377_s15  }
 0x1a7   : > { %s8997_s16 = scalar_lea.hbm %s10628_s30, 1024 }
 0x1a8   : > { %p8998_p11 = scmp.ne.s32.totalorder %s10628_s30, %s8997_s16  ;;  %p9003_p0 = scmp.lt.u32.totalorder %s8997_s16, %s10628_s30 }
 0x1aa   : > { %p8999_p12 = pnand %p8998_p11, %p8173_p10 }
 0x1ac   : > { %p9000_p13 = pneg %p8999_p12 }
 0x1ae   : > { %p9005_p1 = pnand %p9003_p0, %p9000_p13 }
 0x1b0   : > { %9008 = shalt.err (!%p9005_p1)
}
 0x1b1   : > { %s9009_s17 = scalar_lea.vmem %s1845_s6, 1024  ;;  %p9016_p3 = scmp.lt.s32.totalorder %s1845_s6, %s1845_s6 }
 0x1b2   : > { %p9010_p5 = scmp.ne.s32.totalorder %s1845_s6, %s9009_s17  ;;  %p9017_p4 = scmp.lt.s32.totalorder %s9009_s17, %s9009_s17 }
 0x1b4   : > { %p9011_p6 = pnand %p9010_p5, %p8173_p10  ;;  %p9018_p7 = por %p9017_p4, %p9016_p3 }
 0x1b6   : > { %p9012_p2 = pneg %p9011_p6 }
 0x1b8   : > { %p9019_p8 = pnand %p9018_p7, %p9012_p2 }
 0x1ba   : > { %9022 = shalt.err (!%p9019_p8)
}
 0x1bb   : > { %7990 = dma.hbm_to_vmem [thread:$0]  (%p8173_p10), %s10628_s30, 1024, %s1845_s6, [#allocation39], %s12378_s1, %s12378_s1, %s12377_s15  }
 0x1bc   : > { %s10427_s23 = smov [#allocation41]   ;;  %s10428_s10 = smov [#allocation44]  }
 0x1bd   : > { %s1870_s11 = sshll.u32 %s10427_s23, 4  ;;  %s1895_s18 = sshll.u32 %s10428_s10, 4  ;;  %s1871_s11 = int_to_ptr.vmem [resolvable:$true] %s1870_s11  ;;  %s1896_s18 = int_to_ptr.vmem [resolvable:$true] %s1895_s18 }
 0x1be   : > { %s9023_s16 = scalar_lea.hbm %s10638_s19, 1024 }
 0x1bf   : > { %p9024_p11 = scmp.ne.s32.totalorder %s10638_s19, %s9023_s16  ;;  %p9029_p0 = scmp.lt.u32.totalorder %s9023_s16, %s10638_s19 }
 0x1c1   : > { %p9025_p12 = pnand %p9024_p11, %p8173_p10 }
 0x1c3   : > { %p9026_p13 = pneg %p9025_p12 }
 0x1c5   : > { %p9031_p1 = pnand %p9029_p0, %p9026_p13 }
 0x1c7   : > { %9034 = shalt.err (!%p9031_p1)
}
 0x1c8   : > { %s9035_s17 = scalar_lea.vmem %s1871_s11, 1024  ;;  %p9042_p3 = scmp.lt.s32.totalorder %s1871_s11, %s1871_s11 }
 0x1c9   : > { %p9036_p5 = scmp.ne.s32.totalorder %s1871_s11, %s9035_s17  ;;  %p9043_p4 = scmp.lt.s32.totalorder %s9035_s17, %s9035_s17 }
 0x1cb   : > { %p9037_p6 = pnand %p9036_p5, %p8173_p10  ;;  %p9044_p7 = por %p9043_p4, %p9042_p3 }
 0x1cd   : > { %p9038_p2 = pneg %p9037_p6 }
 0x1cf   : > { %p9045_p8 = pnand %p9044_p7, %p9038_p2 }
 0x1d1   : > { %9048 = shalt.err (!%p9045_p8)
}
 0x1d2   : > { %7994 = dma.hbm_to_vmem [thread:$0]  (%p8173_p10), %s10638_s19, 1024, %s1871_s11, [#allocation42], %s12378_s1, %s12378_s1, %s12377_s15  }
 0x1d3   : > { %s9049_s6 = scalar_lea.hbm %s12364_s8, 16 }
 0x1d4   : > { %p9050_p11 = scmp.ne.s32.totalorder %s12364_s8, %s9049_s6  ;;  %p9055_p0 = scmp.lt.u32.totalorder %s9049_s6, %s12364_s8 }
 0x1d6   : > { %p9051_p12 = pnand %p9050_p11, %p8173_p10 }
 0x1d8   : > { %p9052_p13 = pneg %p9051_p12 }
 0x1da   : > { %p9057_p1 = pnand %p9055_p0, %p9052_p13 }
 0x1dc   : > { %9060 = shalt.err (!%p9057_p1)
}
 0x1dd   : > { %s9061_s23 = scalar_lea.vmem %s1896_s18, 16  ;;  %s9067_s10 = scalar_lea.vmem %s1896_s18, 32 }
 0x1de   : > { %p9062_p5 = scmp.ne.s32.totalorder %s1896_s18, %s9061_s23  ;;  %p9068_p3 = scmp.lt.s32.totalorder %s1896_s18, %s1896_s18 }
 0x1df   : > { %p9069_p4 = scmp.lt.s32.totalorder %s9067_s10, %s9061_s23 }
 0x1e0   : > { %p9063_p6 = pnand %p9062_p5, %p8173_p10 }
 0x1e1   : > { %p9070_p7 = por %p9069_p4, %p9068_p3 }
 0x1e2   : > { %p9064_p2 = pneg %p9063_p6 }
 0x1e4   : > { %p9071_p8 = pnand %p9070_p7, %p9064_p2 }
 0x1e6   : > { %9074 = shalt.err (!%p9071_p8)
}
 0x1e7   : > { %s12379_s11 = sld [smem:[#allocation147_spill]]  ;;  %s10429_s16 = smov [#allocation47]  }
 0x1e8   : > { %7998 = dma.hbm_to_vmem [thread:$0]  (%p8173_p10), %s12364_s8, 16, %s1896_s18, [#allocation45]  }
 0x1e9   : > { %s1916_s17 = sshll.u32 %s10429_s16, 4  ;;  %s10430_s6 = smov [#allocation50]   ;;  %s1917_s17 = int_to_ptr.vmem [resolvable:$true] %s1916_s17 }
 0x1ea   : > { %s1941_s3 = sshll.u32 %s10430_s6, 4  ;;  %s1942_s3 = int_to_ptr.vmem [resolvable:$true] %s1941_s3 }
 0x1ed   : > { %s9075_s4 = scalar_lea.hbm %s12379_s11, 1024 }
 0x1ee   : > { %p9076_p11 = scmp.ne.s32.totalorder %s12379_s11, %s9075_s4  ;;  %p9081_p0 = scmp.lt.u32.totalorder %s9075_s4, %s12379_s11 }
 0x1f0   : > { %p9077_p12 = pnand %p9076_p11, %p8173_p10 }
 0x1f2   : > { %p9078_p13 = pneg %p9077_p12 }
 0x1f4   : > { %p9083_p1 = pnand %p9081_p0, %p9078_p13 }
 0x1f6   : > { %9086 = shalt.err (!%p9083_p1)
}
 0x1f7   : > { %s9087_s23 = scalar_lea.vmem %s1917_s17, 1024  ;;  %p9094_p3 = scmp.lt.s32.totalorder %s1917_s17, %s1917_s17 }
 0x1f8   : > { %p9088_p5 = scmp.ne.s32.totalorder %s1917_s17, %s9087_s23  ;;  %p9095_p4 = scmp.lt.s32.totalorder %s9087_s23, %s9087_s23 }
 0x1fa   : > { %p9089_p6 = pnand %p9088_p5, %p8173_p10  ;;  %p9096_p7 = por %p9095_p4, %p9094_p3 }
 0x1fc   : > { %p9090_p2 = pneg %p9089_p6 }
 0x1fe   : > { %p9097_p8 = pnand %p9096_p7, %p9090_p2 }
 0x200   : > { %9100 = shalt.err (!%p9097_p8)
}
 0x201   : > { %s12380_s4 = sld [smem:[#allocation149_spill]] }
 0x202   : > { %8002 = dma.hbm_to_vmem [thread:$0]  (%p8173_p10), %s12379_s11, 1024, %s1917_s17, [#allocation48], %s12378_s1, %s12378_s1, %s12377_s15  }
 0x207   : > { %s9101_s18 = scalar_lea.hbm %s12380_s4, 16 }
 0x208   : > { %p9102_p11 = scmp.ne.s32.totalorder %s12380_s4, %s9101_s18  ;;  %p9107_p0 = scmp.lt.u32.totalorder %s9101_s18, %s12380_s4 }
 0x20a   : > { %p9103_p12 = pnand %p9102_p11, %p8173_p10 }
 0x20c   : > { %p9104_p13 = pneg %p9103_p12 }
 0x20e   : > { %p9109_p1 = pnand %p9107_p0, %p9104_p13 }
 0x210   : > { %9112 = shalt.err (!%p9109_p1)
}
 0x211   : > { %s9113_s10 = scalar_lea.vmem %s1942_s3, 16  ;;  %s9119_s16 = scalar_lea.vmem %s1942_s3, 32 }
 0x212   : > { %p9114_p5 = scmp.ne.s32.totalorder %s1942_s3, %s9113_s10  ;;  %p9120_p3 = scmp.lt.s32.totalorder %s1942_s3, %s1942_s3 }
 0x213   : > { %p9121_p4 = scmp.lt.s32.totalorder %s9119_s16, %s9113_s10 }
 0x214   : > { %p9115_p6 = pnand %p9114_p5, %p8173_p10 }
 0x215   : > { %p9122_p7 = por %p9121_p4, %p9120_p3 }
 0x216   : > { %p9116_p2 = pneg %p9115_p6 }
 0x218   : > { %p9123_p8 = pnand %p9122_p7, %p9116_p2 }
 0x21a   : > { %9126 = shalt.err (!%p9123_p8)
}
 0x21b   : > { %s12381_s17 = sld [smem:[#allocation151_spill]]  ;;  %s10431_s6 = smov [#allocation53]  }
 0x21c   : > { %8006 = dma.hbm_to_vmem [thread:$0]  (%p8173_p10), %s12380_s4, 16, %s1942_s3, [#allocation51]  }
 0x21d   : > { %s1963_s23 = sshll.u32 %s10431_s6, 4  ;;  %s10432_s18 = smov [#allocation56]   ;;  %s1964_s23 = int_to_ptr.vmem [resolvable:$true] %s1963_s23 }
 0x21e   : > { %s1984_s5 = sshll.u32 %s10432_s18, 4  ;;  %s1985_s5 = int_to_ptr.vmem [resolvable:$true] %s1984_s5 }
 0x221   : > { %s9127_s8 = scalar_lea.hbm %s12381_s17, 16 }
 0x222   : > { %p9128_p11 = scmp.ne.s32.totalorder %s12381_s17, %s9127_s8  ;;  %p9133_p0 = scmp.lt.u32.totalorder %s9127_s8, %s12381_s17 }
 0x224   : > { %p9129_p12 = pnand %p9128_p11, %p8173_p10 }
 0x226   : > { %p9130_p13 = pneg %p9129_p12 }
 0x228   : > { %p9135_p1 = pnand %p9133_p0, %p9130_p13 }
 0x22a   : > { %9138 = shalt.err (!%p9135_p1)
}
 0x22b   : > { %s9139_s10 = scalar_lea.vmem %s1964_s23, 16  ;;  %s9145_s3 = scalar_lea.vmem %s1964_s23, 32 }
 0x22c   : > { %p9140_p5 = scmp.ne.s32.totalorder %s1964_s23, %s9139_s10  ;;  %p9146_p3 = scmp.lt.s32.totalorder %s1964_s23, %s1964_s23 }
 0x22d   : > { %p9147_p4 = scmp.lt.s32.totalorder %s9145_s3, %s9139_s10 }
 0x22e   : > { %p9141_p6 = pnand %p9140_p5, %p8173_p10 }
 0x22f   : > { %p9148_p7 = por %p9147_p4, %p9146_p3 }
 0x230   : > { %p9142_p2 = pneg %p9141_p6 }
 0x232   : > { %p9149_p8 = pnand %p9148_p7, %p9142_p2 }
 0x234   : > { %9152 = shalt.err (!%p9149_p8)
}
 0x235   : > { %s12382_s16 = sld [smem:[#allocation153_spill]] }
 0x236   : > { %8010 = dma.hbm_to_vmem [thread:$0]  (%p8173_p10), %s12381_s17, 16, %s1964_s23, [#allocation54]  }
 0x23b   : > { %s9153_s8 = scalar_lea.hbm %s12382_s16, 1024 }
 0x23c   : > { %p9154_p11 = scmp.ne.s32.totalorder %s12382_s16, %s9153_s8  ;;  %p9159_p0 = scmp.lt.u32.totalorder %s9153_s8, %s12382_s16 }
 0x23e   : > { %p9155_p12 = pnand %p9154_p11, %p8173_p10 }
 0x240   : > { %p9156_p13 = pneg %p9155_p12 }
 0x242   : > { %p9161_p1 = pnand %p9159_p0, %p9156_p13 }
 0x244   : > { %9164 = shalt.err (!%p9161_p1)
}
 0x245   : > { %s9165_s6 = scalar_lea.vmem %s1985_s5, 1024  ;;  %p9172_p3 = scmp.lt.s32.totalorder %s1985_s5, %s1985_s5 }
 0x246   : > { %p9166_p5 = scmp.ne.s32.totalorder %s1985_s5, %s9165_s6  ;;  %p9173_p4 = scmp.lt.s32.totalorder %s9165_s6, %s9165_s6 }
 0x248   : > { %p9167_p6 = pnand %p9166_p5, %p8173_p10  ;;  %p9174_p7 = por %p9173_p4, %p9172_p3 }
 0x24a   : > { %p9168_p2 = pneg %p9167_p6 }
 0x24c   : > { %p9175_p8 = pnand %p9174_p7, %p9168_p2 }
 0x24e   : > { %9178 = shalt.err (!%p9175_p8)
}
 0x24f   : > { %s12383_s23 = sld [smem:[#allocation155_spill]]  ;;  %s10433_s18 = smov [#allocation59]  }
 0x250   : > { %8014 = dma.hbm_to_vmem [thread:$0]  (%p8173_p10), %s12382_s16, 1024, %s1985_s5, [#allocation57], %s12378_s1, %s12378_s1, %s12377_s15  }
 0x251   : > { %s2009_s10 = sshll.u32 %s10433_s18, 4  ;;  %s10434_s3 = smov [#allocation62]   ;;  %s2010_s10 = int_to_ptr.vmem [resolvable:$true] %s2009_s10 }
 0x252   : > { %s2031_s8 = sshll.u32 %s10434_s3, 4  ;;  %s2032_s8 = int_to_ptr.vmem [resolvable:$true] %s2031_s8 }
 0x255   : > { %s9179_s6 = scalar_lea.hbm %s12383_s23, 16 }
 0x256   : > { %p9180_p11 = scmp.ne.s32.totalorder %s12383_s23, %s9179_s6  ;;  %p9185_p0 = scmp.lt.u32.totalorder %s9179_s6, %s12383_s23 }
 0x258   : > { %p9181_p12 = pnand %p9180_p11, %p8173_p10 }
 0x25a   : > { %p9182_p13 = pneg %p9181_p12 }
 0x25c   : > { %p9187_p1 = pnand %p9185_p0, %p9182_p13 }
 0x25e   : > { %9190 = shalt.err (!%p9187_p1)
}
 0x25f   : > { %s9191_s4 = scalar_lea.vmem %s2010_s10, 16  ;;  %s9197_s5 = scalar_lea.vmem %s2010_s10, 32 }
 0x260   : > { %p9192_p5 = scmp.ne.s32.totalorder %s2010_s10, %s9191_s4  ;;  %p9198_p3 = scmp.lt.s32.totalorder %s2010_s10, %s2010_s10 }
 0x261   : > { %p9199_p4 = scmp.lt.s32.totalorder %s9197_s5, %s9191_s4 }
 0x262   : > { %p9193_p6 = pnand %p9192_p5, %p8173_p10 }
 0x263   : > { %p9200_p7 = por %p9199_p4, %p9198_p3 }
 0x264   : > { %p9194_p2 = pneg %p9193_p6 }
 0x266   : > { %p9201_p8 = pnand %p9200_p7, %p9194_p2 }
 0x268   : > { %9204 = shalt.err (!%p9201_p8)
}
 0x269   : > { %s12384_s18 = sld [smem:[#allocation157_spill]] }
 0x26a   : > { %8018 = dma.hbm_to_vmem [thread:$0]  (%p8173_p10), %s12383_s23, 16, %s2010_s10, [#allocation60]  }
 0x26f   : > { %s9205_s3 = scalar_lea.hbm %s12384_s18, 48 }
 0x270   : > { %p9206_p11 = scmp.ne.s32.totalorder %s12384_s18, %s9205_s3  ;;  %p9211_p0 = scmp.lt.u32.totalorder %s9205_s3, %s12384_s18 }
 0x272   : > { %p9207_p12 = pnand %p9206_p11, %p8173_p10 }
 0x274   : > { %p9208_p13 = pneg %p9207_p12 }
 0x276   : > { %p9213_p1 = pnand %p9211_p0, %p9208_p13 }
 0x278   : > { %9216 = shalt.err (!%p9213_p1)
}
 0x279   : > { %s9217_s4 = scalar_lea.vmem %s2032_s8, 48  ;;  %s9223_s6 = scalar_lea.vmem %s2032_s8, 64 }
 0x27a   : > { %p9218_p5 = scmp.ne.s32.totalorder %s2032_s8, %s9217_s4  ;;  %p9224_p3 = scmp.lt.s32.totalorder %s2032_s8, %s2032_s8 }
 0x27b   : > { %p9225_p4 = scmp.lt.s32.totalorder %s9223_s6, %s9217_s4 }
 0x27c   : > { %p9219_p6 = pnand %p9218_p5, %p8173_p10 }
 0x27d   : > { %p9226_p7 = por %p9225_p4, %p9224_p3 }
 0x27e   : > { %p9220_p2 = pneg %p9219_p6 }
 0x280   : > { %p9227_p8 = pnand %p9226_p7, %p9220_p2 }
 0x282   : > { %9230 = shalt.err (!%p9227_p8)
}
 0x283   : > { %s12385_s10 = sld [smem:[#allocation160_spill]]  ;;  %s10435_s5 = smov [#allocation65]  }
 0x284   : > { %8022 = dma.hbm_to_vmem [thread:$0]  (%p8173_p10), %s12384_s18, 48, %s2032_s8, [#allocation63]  }
 0x285   : > { %s2056_s3 = sshll.u32 %s10435_s5, 4  ;;  %s10436_s11 = smov [#allocation68]   ;;  %s2057_s3 = int_to_ptr.vmem [resolvable:$true] %s2056_s3 }
 0x286   : > { %s2078_s12 = sshll.u32 %s10436_s11, 4  ;;  %s2079_s12 = int_to_ptr.vmem [resolvable:$true] %s2078_s12 }
 0x289   : > { %s9231_s14 = scalar_lea.hbm %s12385_s10, 16 }
 0x28a   : > { %p9232_p11 = scmp.ne.s32.totalorder %s12385_s10, %s9231_s14  ;;  %p9237_p0 = scmp.lt.u32.totalorder %s9231_s14, %s12385_s10 }
 0x28c   : > { %p9233_p12 = pnand %p9232_p11, %p8173_p10 }
 0x28e   : > { %p9234_p13 = pneg %p9233_p12 }
 0x290   : > { %p9239_p1 = pnand %p9237_p0, %p9234_p13 }
 0x292   : > { %9242 = shalt.err (!%p9239_p1)
}
 0x293   : > { %s9243_s4 = scalar_lea.vmem %s2057_s3, 16  ;;  %s9249_s8 = scalar_lea.vmem %s2057_s3, 32 }
 0x294   : > { %p9244_p5 = scmp.ne.s32.totalorder %s2057_s3, %s9243_s4  ;;  %p9250_p3 = scmp.lt.s32.totalorder %s2057_s3, %s2057_s3 }
 0x295   : > { %p9251_p4 = scmp.lt.s32.totalorder %s9249_s8, %s9243_s4 }
 0x296   : > { %p9245_p6 = pnand %p9244_p5, %p8173_p10 }
 0x297   : > { %p9252_p7 = por %p9251_p4, %p9250_p3 }
 0x298   : > { %p9246_p2 = pneg %p9245_p6 }
 0x29a   : > { %p9253_p8 = pnand %p9252_p7, %p9246_p2 }
 0x29c   : > { %9256 = shalt.err (!%p9253_p8)
}
 0x29d   : > { %s12386_s11 = sld [smem:[#allocation162_spill]] }
 0x29e   : > { %8026 = dma.hbm_to_vmem [thread:$0]  (%p8173_p10), %s12385_s10, 16, %s2057_s3, [#allocation66]  }
 0x2a3   : > { %s9257_s14 = scalar_lea.hbm %s12386_s11, 16 }
 0x2a4   : > { %p9258_p11 = scmp.ne.s32.totalorder %s12386_s11, %s9257_s14  ;;  %p9263_p0 = scmp.lt.u32.totalorder %s9257_s14, %s12386_s11 }
 0x2a6   : > { %p9259_p12 = pnand %p9258_p11, %p8173_p10 }
 0x2a8   : > { %p9260_p13 = pneg %p9259_p12 }
 0x2aa   : > { %p9265_p1 = pnand %p9263_p0, %p9260_p13 }
 0x2ac   : > { %9268 = shalt.err (!%p9265_p1)
}
 0x2ad   : > { %s9269_s6 = scalar_lea.vmem %s2079_s12, 16  ;;  %s9275_s5 = scalar_lea.vmem %s2079_s12, 32 }
 0x2ae   : > { %p9270_p5 = scmp.ne.s32.totalorder %s2079_s12, %s9269_s6  ;;  %p9276_p3 = scmp.lt.s32.totalorder %s2079_s12, %s2079_s12 }
 0x2af   : > { %p9277_p4 = scmp.lt.s32.totalorder %s9275_s5, %s9269_s6 }
 0x2b0   : > { %p9271_p6 = pnand %p9270_p5, %p8173_p10 }
 0x2b1   : > { %p9278_p7 = por %p9277_p4, %p9276_p3 }
 0x2b2   : > { %p9272_p2 = pneg %p9271_p6 }
 0x2b4   : > { %p9279_p8 = pnand %p9278_p7, %p9272_p2 }
 0x2b6   : > { %9282 = shalt.err (!%p9279_p8)
}
 0x2b7   : > { %s12387_s3 = sld [smem:[#allocation164_spill]]  ;;  %s10437_s4 = smov [#allocation71]  }
 0x2b8   : > { %8030 = dma.hbm_to_vmem [thread:$0]  (%p8173_p10), %s12386_s11, 16, %s2079_s12, [#allocation69]  }
 0x2b9   : > { %s2101_s8 = sshll.u32 %s10437_s4, 4  ;;  %s10438_s14 = smov [#allocation74]   ;;  %s2102_s8 = int_to_ptr.vmem [resolvable:$true] %s2101_s8 }
 0x2ba   : > { %s2131_s10 = sshll.u32 %s10438_s14, 4  ;;  %s2132_s10 = int_to_ptr.vmem [resolvable:$true] %s2131_s10 }
 0x2bd   : > { %s9283_s16 = scalar_lea.hbm %s12387_s3, 1024 }
 0x2be   : > { %p9284_p11 = scmp.ne.s32.totalorder %s12387_s3, %s9283_s16  ;;  %p9289_p0 = scmp.lt.u32.totalorder %s9283_s16, %s12387_s3 }
 0x2c0   : > { %p9285_p12 = pnand %p9284_p11, %p8173_p10 }
 0x2c2   : > { %p9286_p13 = pneg %p9285_p12 }
 0x2c4   : > { %p9291_p1 = pnand %p9289_p0, %p9286_p13 }
 0x2c6   : > { %9294 = shalt.err (!%p9291_p1)
}
 0x2c7   : > { %s9295_s6 = scalar_lea.vmem %s2102_s8, 1024  ;;  %p9302_p3 = scmp.lt.s32.totalorder %s2102_s8, %s2102_s8 }
 0x2c8   : > { %p9296_p5 = scmp.ne.s32.totalorder %s2102_s8, %s9295_s6  ;;  %p9303_p4 = scmp.lt.s32.totalorder %s9295_s6, %s9295_s6 }
 0x2ca   : > { %p9297_p6 = pnand %p9296_p5, %p8173_p10  ;;  %p9304_p7 = por %p9303_p4, %p9302_p3 }
 0x2cc   : > { %p9298_p2 = pneg %p9297_p6 }
 0x2ce   : > { %p9305_p8 = pnand %p9304_p7, %p9298_p2 }
 0x2d0   : > { %9308 = shalt.err (!%p9305_p8)
}
 0x2d1   : > { %s12388_s12 = sld [smem:[#allocation167_spill]] }
 0x2d2   : > { %8034 = dma.hbm_to_vmem [thread:$0]  (%p8173_p10), %s12387_s3, 1024, %s2102_s8, [#allocation72], %s12378_s1, %s12378_s1, %s12377_s15  }
 0x2d7   : > { %s9309_s16 = scalar_lea.hbm %s12388_s12, 16 }
 0x2d8   : > { %p9310_p11 = scmp.ne.s32.totalorder %s12388_s12, %s9309_s16  ;;  %p9315_p0 = scmp.lt.u32.totalorder %s9309_s16, %s12388_s12 }
 0x2da   : > { %p9311_p12 = pnand %p9310_p11, %p8173_p10 }
 0x2dc   : > { %p9312_p13 = pneg %p9311_p12 }
 0x2de   : > { %p9317_p1 = pnand %p9315_p0, %p9312_p13 }
 0x2e0   : > { %9320 = shalt.err (!%p9317_p1)
}
 0x2e1   : > { %s9321_s5 = scalar_lea.vmem %s2132_s10, 16  ;;  %s9327_s4 = scalar_lea.vmem %s2132_s10, 32 }
 0x2e2   : > { %p9322_p5 = scmp.ne.s32.totalorder %s2132_s10, %s9321_s5  ;;  %p9328_p3 = scmp.lt.s32.totalorder %s2132_s10, %s2132_s10 }
 0x2e3   : > { %p9329_p4 = scmp.lt.s32.totalorder %s9327_s4, %s9321_s5 }
 0x2e4   : > { %p9323_p6 = pnand %p9322_p5, %p8173_p10 }
 0x2e5   : > { %p9330_p7 = por %p9329_p4, %p9328_p3 }
 0x2e6   : > { %p9324_p2 = pneg %p9323_p6 }
 0x2e8   : > { %p9331_p8 = pnand %p9330_p7, %p9324_p2 }
 0x2ea   : > { %9334 = shalt.err (!%p9331_p8)
}
 0x2eb   : > { %s12389_s8 = sld [smem:[#allocation169_spill]]  ;;  %s10439_s14 = smov [#allocation77]  }
 0x2ec   : > { %8038 = dma.hbm_to_vmem [thread:$0]  (%p8173_p10), %s12388_s12, 16, %s2132_s10, [#allocation75]  }
 0x2ed   : > { %s2153_s6 = sshll.u32 %s10439_s14, 4  ;;  %s10440_s16 = smov [#allocation80]   ;;  %s2154_s6 = int_to_ptr.vmem [resolvable:$true] %s2153_s6 }
 0x2ee   : > { %s2177_s3 = sshll.u32 %s10440_s16, 4  ;;  %s2178_s3 = int_to_ptr.vmem [resolvable:$true] %s2177_s3 }
 0x2f1   : > { %s9335_s11 = scalar_lea.hbm %s12389_s8, 16 }
 0x2f2   : > { %p9336_p11 = scmp.ne.s32.totalorder %s12389_s8, %s9335_s11  ;;  %p9341_p0 = scmp.lt.u32.totalorder %s9335_s11, %s12389_s8 }
 0x2f4   : > { %p9337_p12 = pnand %p9336_p11, %p8173_p10 }
 0x2f6   : > { %p9338_p13 = pneg %p9337_p12 }
 0x2f8   : > { %p9343_p1 = pnand %p9341_p0, %p9338_p13 }
 0x2fa   : > { %9346 = shalt.err (!%p9343_p1)
}
 0x2fb   : > { %s9347_s5 = scalar_lea.vmem %s2154_s6, 16  ;;  %s9353_s10 = scalar_lea.vmem %s2154_s6, 32 }
 0x2fc   : > { %p9348_p5 = scmp.ne.s32.totalorder %s2154_s6, %s9347_s5  ;;  %p9354_p3 = scmp.lt.s32.totalorder %s2154_s6, %s2154_s6 }
 0x2fd   : > { %p9355_p4 = scmp.lt.s32.totalorder %s9353_s10, %s9347_s5 }
 0x2fe   : > { %p9349_p6 = pnand %p9348_p5, %p8173_p10 }
 0x2ff   : > { %p9356_p7 = por %p9355_p4, %p9354_p3 }
 0x300   : > { %p9350_p2 = pneg %p9349_p6 }
 0x302   : > { %p9357_p8 = pnand %p9356_p7, %p9350_p2 }
 0x304   : > { %9360 = shalt.err (!%p9357_p8)
}
 0x305   : > { %s12390_s4 = sld [smem:[#allocation171_spill]] }
 0x306   : > { %8042 = dma.hbm_to_vmem [thread:$0]  (%p8173_p10), %s12389_s8, 16, %s2154_s6, [#allocation78]  }
 0x30b   : > { %s9361_s11 = scalar_lea.hbm %s12390_s4, 16 }
 0x30c   : > { %p9362_p11 = scmp.ne.s32.totalorder %s12390_s4, %s9361_s11  ;;  %p9367_p0 = scmp.lt.u32.totalorder %s9361_s11, %s12390_s4 }
 0x30e   : > { %p9363_p12 = pnand %p9362_p11, %p8173_p10 }
 0x310   : > { %p9364_p13 = pneg %p9363_p12 }
 0x312   : > { %p9369_p1 = pnand %p9367_p0, %p9364_p13 }
 0x314   : > { %9372 = shalt.err (!%p9369_p1)
}
 0x315   : > { %s9373_s14 = scalar_lea.vmem %s2178_s3, 16  ;;  %s9379_s16 = scalar_lea.vmem %s2178_s3, 32 }
 0x316   : > { %p9374_p5 = scmp.ne.s32.totalorder %s2178_s3, %s9373_s14  ;;  %p9380_p3 = scmp.lt.s32.totalorder %s2178_s3, %s2178_s3 }
 0x317   : > { %p9381_p4 = scmp.lt.s32.totalorder %s9379_s16, %s9373_s14 }
 0x318   : > { %p9375_p6 = pnand %p9374_p5, %p8173_p10 }
 0x319   : > { %p9382_p7 = por %p9381_p4, %p9380_p3 }
 0x31a   : > { %p9376_p2 = pneg %p9375_p6 }
 0x31c   : > { %p9383_p8 = pnand %p9382_p7, %p9376_p2 }
 0x31e   : > { %9386 = shalt.err (!%p9383_p8)
}
 0x31f   : > { %s12391_s6 = sld [smem:[#allocation173_spill]]  ;;  %s10441_s5 = smov [#allocation83]  }
 0x320   : > { %8046 = dma.hbm_to_vmem [thread:$0]  (%p8173_p10), %s12390_s4, 16, %s2178_s3, [#allocation81]  }
 0x321   : > { %s2199_s10 = sshll.u32 %s10441_s5, 4  ;;  %s2200_s10 = int_to_ptr.vmem [resolvable:$true] %s2199_s10 }
 0x325   : > { %s9387_s11 = scalar_lea.hbm %s12391_s6, 16 }
 0x326   : > { %p9388_p11 = scmp.ne.s32.totalorder %s12391_s6, %s9387_s11  ;;  %p9393_p0 = scmp.lt.u32.totalorder %s9387_s11, %s12391_s6 }
 0x328   : > { %p9389_p12 = pnand %p9388_p11, %p8173_p10 }
 0x32a   : > { %p9390_p13 = pneg %p9389_p12 }
 0x32c   : > { %p9395_p1 = pnand %p9393_p0, %p9390_p13 }
 0x32e   : > { %9398 = shalt.err (!%p9395_p1)
}
 0x32f   : > { %s9399_s14 = scalar_lea.vmem %s2200_s10, 16  ;;  %s9405_s16 = scalar_lea.vmem %s2200_s10, 32 }
 0x330   : > { %p9400_p5 = scmp.ne.s32.totalorder %s2200_s10, %s9399_s14  ;;  %p9406_p3 = scmp.lt.s32.totalorder %s2200_s10, %s2200_s10 }
 0x331   : > { %p9407_p4 = scmp.lt.s32.totalorder %s9405_s16, %s9399_s14 }
 0x332   : > { %p9401_p6 = pnand %p9400_p5, %p8173_p10 }
 0x333   : > { %p9408_p7 = por %p9407_p4, %p9406_p3 }
 0x334   : > { %p9402_p2 = pneg %p9401_p6 }
 0x336   : > { %p9409_p8 = pnand %p9408_p7, %p9402_p2 }
 0x338   : > { %9412 = shalt.err (!%p9409_p8)
}
 0x339   : > { %s12392_s3 = sld [smem:[#allocation121_spill]]  ;;  %s10442_s5 = smov [#allocation2]  }
 0x33a   : > { %8050 = dma.hbm_to_vmem [thread:$0]  (%p8173_p10), %s12391_s6, 16, %s2200_s10, [#allocation84]  }
 0x33b   : > { %s1568_s11 = sshll.u32 %s10442_s5, 4  ;;  %s1569_s11 = int_to_ptr.vmem [resolvable:$true] %s1568_s11 }
 0x33f   : > { %s9413_s4 = scalar_lea.hbm %s12392_s3, 256 }
 0x340   : > { %p9414_p11 = scmp.ne.s32.totalorder %s12392_s3, %s9413_s4  ;;  %p9419_p0 = scmp.lt.u32.totalorder %s9413_s4, %s12392_s3 }
 0x342   : > { %p9415_p12 = pnand %p9414_p11, %p8173_p10 }
 0x344   : > { %p9416_p13 = pneg %p9415_p12 }
 0x346   : > { %p9421_p1 = pnand %p9419_p0, %p9416_p13 }
 0x348   : > { %9424 = shalt.err (!%p9421_p1)
}
 0x349   : > { %s9425_s14 = scalar_lea.vmem %s1569_s11, 256  ;;  %p9432_p3 = scmp.lt.s32.totalorder %s1569_s11, %s1569_s11 }
 0x34a   : > { %p9426_p5 = scmp.ne.s32.totalorder %s1569_s11, %s9425_s14  ;;  %p9433_p4 = scmp.lt.s32.totalorder %s9425_s14, %s9425_s14 }
 0x34c   : > { %p9427_p6 = pnand %p9426_p5, %p8173_p10  ;;  %p9434_p7 = por %p9433_p4, %p9432_p3 }
 0x34e   : > { %p9428_p2 = pneg %p9427_p6 }
 0x350   : > { %p9435_p8 = pnand %p9434_p7, %p9428_p2 }
 0x352   : > { %9438 = shalt.err (!%p9435_p8)
}
 0x353   : > { %s12277_s10 = smov 128   ;;  %s12393_s16 = sld [smem:[#allocation123_spill]] }
 0x354   : > { %s12279_s4 = smov 8   ;;  %s10445_s5 = smov [#allocation7]  }
 0x355   : > { %7944 = dma.hbm_to_vmem [thread:$0]  (%p8173_p10), %s12392_s3, 256, %s1569_s11, [#allocation3], %s12277_s10, %s12277_s10, %s12279_s4  }
 0x356   : > { %s1593_s6 = sshll.u32 %s10445_s5, 4  ;;  %s10446_s8 = smov [#allocation10]   ;;  %s1594_s6 = int_to_ptr.vmem [resolvable:$true] %s1593_s6 }
 0x357   : > { %s1621_s14 = sshll.u32 %s10446_s8, 4  ;;  %s11169_s14 = int_to_ptr.vmem [resolvable:$true] %s1621_s14 }
 0x359   : > { %s9439_s12 = scalar_lea.hbm %s12393_s16, 16 }
 0x35a   : > { %p9440_p11 = scmp.ne.s32.totalorder %s12393_s16, %s9439_s12  ;;  %p9445_p0 = scmp.lt.u32.totalorder %s9439_s12, %s12393_s16 }
 0x35c   : > { %p9441_p12 = pnand %p9440_p11, %p8173_p10 }
 0x35e   : > { %p9442_p13 = pneg %p9441_p12 }
 0x360   : > { %p9447_p1 = pnand %p9445_p0, %p9442_p13 }
 0x362   : > { %9450 = shalt.err (!%p9447_p1)
}
 0x363   : > { %s9451_s17 = scalar_lea.vmem %s1594_s6, 16  ;;  %s9457_s11 = scalar_lea.vmem %s1594_s6, 32 }
 0x364   : > { %p9452_p5 = scmp.ne.s32.totalorder %s1594_s6, %s9451_s17  ;;  %p9458_p3 = scmp.lt.s32.totalorder %s1594_s6, %s1594_s6 }
 0x365   : > { %p9459_p4 = scmp.lt.s32.totalorder %s9457_s11, %s9451_s17 }
 0x366   : > { %p9453_p6 = pnand %p9452_p5, %p8173_p10 }
 0x367   : > { %p9460_p7 = por %p9459_p4, %p9458_p3 }
 0x368   : > { %p9454_p2 = pneg %p9453_p6 }
 0x36a   : > { %p9461_p8 = pnand %p9460_p7, %p9454_p2 }
 0x36c   : > { %9464 = shalt.err (!%p9461_p8)
}
 0x36d   : > { %s12394_s8 = sld [smem:[#allocation126_spill]] }
 0x36e   : > { %7948 = dma.hbm_to_vmem [thread:$0]  (%p8173_p10), %s12393_s16, 16, %s1594_s6, [#allocation6]  }
 0x373   : > { %s9465_s12 = scalar_lea.hbm %s12394_s8, 16 }
 0x374   : > { %p9466_p11 = scmp.ne.s32.totalorder %s12394_s8, %s9465_s12  ;;  %p9471_p0 = scmp.lt.u32.totalorder %s9465_s12, %s12394_s8 }
 0x376   : > { %p9467_p12 = pnand %p9466_p11, %p8173_p10 }
 0x378   : > { %p9468_p13 = pneg %p9467_p12 }
 0x37a   : > { %p9473_p1 = pnand %p9471_p0, %p9468_p13 }
 0x37c   : > { %9476 = shalt.err (!%p9473_p1)
}
 0x37d   : > { %s9477_s17 = scalar_lea.vmem %s11169_s14, 16  ;;  %s9483_s5 = scalar_lea.vmem %s11169_s14, 32 }
 0x37e   : > { %p9478_p5 = scmp.ne.s32.totalorder %s11169_s14, %s9477_s17  ;;  %p9484_p3 = scmp.lt.s32.totalorder %s11169_s14, %s11169_s14 }
 0x37f   : > { %p9485_p4 = scmp.lt.s32.totalorder %s9483_s5, %s9477_s17 }
 0x380   : > { %p9479_p6 = pnand %p9478_p5, %p8173_p10 }
 0x381   : > { %p9486_p7 = por %p9485_p4, %p9484_p3 }
 0x382   : > { %p9480_p2 = pneg %p9479_p6 }
 0x384   : > { %p9487_p8 = pnand %p9486_p7, %p9480_p2 }
 0x386   : > { %9490 = shalt.err (!%p9487_p8)
}
 0x387   : > { %s12395_s6 = sld [smem:[#allocation128_spill]]  ;;  %s10447_s11 = smov [#allocation13]  }
 0x388   : > { %7952 = dma.hbm_to_vmem [thread:$0]  (%p8173_p10), %s12394_s8, 16, %s11169_s14, [#allocation9]  }
 0x389   : > { %s1643_s12 = sshll.u32 %s10447_s11, 4  ;;  %s10448_s10 = smov [#allocation16]   ;;  %s1644_s12 = int_to_ptr.vmem [resolvable:$true] %s1643_s12 }
 0x38a   : > { %s1664_s4 = sshll.u32 %s10448_s10, 4  ;;  %s11197_s4 = int_to_ptr.vmem [resolvable:$true] %s1664_s4 }
 0x38d   : > { %s9491_s17 = scalar_lea.hbm %s12395_s6, 16 }
 0x38e   : > { %p9492_p11 = scmp.ne.s32.totalorder %s12395_s6, %s9491_s17  ;;  %p9497_p0 = scmp.lt.u32.totalorder %s9491_s17, %s12395_s6 }
 0x390   : > { %p9493_p12 = pnand %p9492_p11, %p8173_p10 }
 0x392   : > { %p9494_p13 = pneg %p9493_p12 }
 0x394   : > { %p9499_p1 = pnand %p9497_p0, %p9494_p13 }
 0x396   : > { %9502 = shalt.err (!%p9499_p1)
}
 0x397   : > { %s9503_s5 = scalar_lea.vmem %s1644_s12, 16  ;;  %s9509_s14 = scalar_lea.vmem %s1644_s12, 32 }
 0x398   : > { %p9504_p5 = scmp.ne.s32.totalorder %s1644_s12, %s9503_s5  ;;  %p9510_p3 = scmp.lt.s32.totalorder %s1644_s12, %s1644_s12 }
 0x399   : > { %p9511_p4 = scmp.lt.s32.totalorder %s9509_s14, %s9503_s5 }
 0x39a   : > { %p9505_p6 = pnand %p9504_p5, %p8173_p10 }
 0x39b   : > { %p9512_p7 = por %p9511_p4, %p9510_p3 }
 0x39c   : > { %p9506_p2 = pneg %p9505_p6 }
 0x39e   : > { %p9513_p8 = pnand %p9512_p7, %p9506_p2 }
 0x3a0   : > { %9516 = shalt.err (!%p9513_p8)
}
 0x3a1   : > { %s12396_s10 = sld [smem:[#allocation129_spill]] }
 0x3a2   : > { %7956 = dma.hbm_to_vmem [thread:$0]  (%p8173_p10), %s12395_s6, 16, %s1644_s12, [#allocation12]  }
 0x3a7   : > { %s9517_s11 = scalar_lea.hbm %s12396_s10, 1024 }
 0x3a8   : > { %p9518_p11 = scmp.ne.s32.totalorder %s12396_s10, %s9517_s11  ;;  %p9523_p0 = scmp.lt.u32.totalorder %s9517_s11, %s12396_s10 }
 0x3aa   : > { %p9519_p12 = pnand %p9518_p11, %p8173_p10 }
 0x3ac   : > { %p9520_p13 = pneg %p9519_p12 }
 0x3ae   : > { %p9525_p1 = pnand %p9523_p0, %p9520_p13 }
 0x3b0   : > { %9528 = shalt.err (!%p9525_p1)
}
 0x3b1   : > { %s9529_s17 = scalar_lea.vmem %s11197_s4, 1024  ;;  %p9536_p3 = scmp.lt.s32.totalorder %s11197_s4, %s11197_s4 }
 0x3b2   : > { %p9530_p5 = scmp.ne.s32.totalorder %s11197_s4, %s9529_s17  ;;  %p9537_p4 = scmp.lt.s32.totalorder %s9529_s17, %s9529_s17 }
 0x3b4   : > { %p9531_p6 = pnand %p9530_p5, %p8173_p10  ;;  %p9538_p7 = por %p9537_p4, %p9536_p3 }
 0x3b6   : > { %p9532_p2 = pneg %p9531_p6 }
 0x3b8   : > { %p9539_p8 = pnand %p9538_p7, %p9532_p2 }
 0x3ba   : > { %9542 = shalt.err (!%p9539_p8)
}
 0x3bb   : > { %s12397_s12 = sld [smem:[#allocation131_spill]]  ;;  %s10449_s5 = smov [#allocation19]  }
 0x3bc   : > { %7960 = dma.hbm_to_vmem [thread:$0]  (%p8173_p10), %s12396_s10, 1024, %s11197_s4, [#allocation15], %s12378_s1, %s12378_s1, %s12377_s15  }
 0x3bd   : > { %s1690_s14 = sshll.u32 %s10449_s5, 4  ;;  %s10450_s11 = smov [#allocation22]   ;;  %s1691_s14 = int_to_ptr.vmem [resolvable:$true] %s1690_s14 }
 0x3be   : > { %s1717_s3 = sshll.u32 %s10450_s11, 4  ;;  %s11227_s3 = int_to_ptr.vmem [resolvable:$true] %s1717_s3 }
 0x3c1   : > { %s9543_s17 = scalar_lea.hbm %s12397_s12, 1024 }
 0x3c2   : > { %p9544_p11 = scmp.ne.s32.totalorder %s12397_s12, %s9543_s17  ;;  %p9549_p0 = scmp.lt.u32.totalorder %s9543_s17, %s12397_s12 }
 0x3c4   : > { %p9545_p12 = pnand %p9544_p11, %p8173_p10 }
 0x3c6   : > { %p9546_p13 = pneg %p9545_p12 }
 0x3c8   : > { %p9551_p1 = pnand %p9549_p0, %p9546_p13 }
 0x3ca   : > { %9554 = shalt.err (!%p9551_p1)
}
 0x3cb   : > { %s9555_s6 = scalar_lea.vmem %s1691_s14, 1024  ;;  %p9562_p3 = scmp.lt.s32.totalorder %s1691_s14, %s1691_s14 }
 0x3cc   : > { %p9556_p5 = scmp.ne.s32.totalorder %s1691_s14, %s9555_s6  ;;  %p9563_p4 = scmp.lt.s32.totalorder %s9555_s6, %s9555_s6 }
 0x3ce   : > { %p9557_p6 = pnand %p9556_p5, %p8173_p10  ;;  %p9564_p7 = por %p9563_p4, %p9562_p3 }
 0x3d0   : > { %p9558_p2 = pneg %p9557_p6 }
 0x3d2   : > { %p9565_p8 = pnand %p9564_p7, %p9558_p2 }
 0x3d4   : > { %9568 = shalt.err (!%p9565_p8)
}
 0x3d5   : > { %s12398_s4 = sld [smem:[#allocation132_spill]] }
 0x3d6   : > { %7964 = dma.hbm_to_vmem [thread:$0]  (%p8173_p10), %s12397_s12, 1024, %s1691_s14, [#allocation18], %s12378_s1, %s12378_s1, %s12377_s15  }
 0x3db   : > { %s9569_s5 = scalar_lea.hbm %s12398_s4, 16 }
 0x3dc   : > { %p9570_p11 = scmp.ne.s32.totalorder %s12398_s4, %s9569_s5  ;;  %p9575_p0 = scmp.lt.u32.totalorder %s9569_s5, %s12398_s4 }
 0x3de   : > { %p9571_p12 = pnand %p9570_p11, %p8173_p10 }
 0x3e0   : > { %p9572_p13 = pneg %p9571_p12 }
 0x3e2   : > { %p9577_p1 = pnand %p9575_p0, %p9572_p13 }
 0x3e4   : > { %9580 = shalt.err (!%p9577_p1)
}
 0x3e5   : > { %s9581_s6 = scalar_lea.vmem %s11227_s3, 16  ;;  %s9587_s11 = scalar_lea.vmem %s11227_s3, 32 }
 0x3e6   : > { %p9582_p5 = scmp.ne.s32.totalorder %s11227_s3, %s9581_s6  ;;  %p9588_p3 = scmp.lt.s32.totalorder %s11227_s3, %s11227_s3 }
 0x3e7   : > { %p9589_p4 = scmp.lt.s32.totalorder %s9587_s11, %s9581_s6 }
 0x3e8   : > { %p9583_p6 = pnand %p9582_p5, %p8173_p10 }
 0x3e9   : > { %p9590_p7 = por %p9589_p4, %p9588_p3 }
 0x3ea   : > { %p9584_p2 = pneg %p9583_p6 }
 0x3ec   : > { %p9591_p8 = pnand %p9590_p7, %p9584_p2 }
 0x3ee   : > { %9594 = shalt.err (!%p9591_p8)
}
 0x3ef   : > { %s12399_s14 = sld [smem:[#allocation134_spill]]  ;;  %s10451_s17 = smov [#allocation25]  }
 0x3f0   : > { %7968 = dma.hbm_to_vmem [thread:$0]  (%p8173_p10), %s12398_s4, 16, %s11227_s3, [#allocation21]  }
 0x3f1   : > { %s1739_s5 = sshll.u32 %s10451_s17, 4  ;;  %s10452_s8 = smov [#allocation28]   ;;  %s1740_s5 = int_to_ptr.vmem [resolvable:$true] %s1739_s5 }
 0x3f2   : > { %s1761_s10 = sshll.u32 %s10452_s8, 4  ;;  %s11258_s10 = int_to_ptr.vmem [resolvable:$true] %s1761_s10 }
 0x3f5   : > { %s9595_s6 = scalar_lea.hbm %s12399_s14, 16 }
 0x3f6   : > { %p9596_p11 = scmp.ne.s32.totalorder %s12399_s14, %s9595_s6  ;;  %p9601_p0 = scmp.lt.u32.totalorder %s9595_s6, %s12399_s14 }
 0x3f8   : > { %p9597_p12 = pnand %p9596_p11, %p8173_p10 }
 0x3fa   : > { %p9598_p13 = pneg %p9597_p12 }
 0x3fc   : > { %p9603_p1 = pnand %p9601_p0, %p9598_p13 }
 0x3fe   : > { %9606 = shalt.err (!%p9603_p1)
}
 0x3ff   : > { %s9607_s11 = scalar_lea.vmem %s1740_s5, 16  ;;  %s9613_s3 = scalar_lea.vmem %s1740_s5, 32 }
 0x400   : > { %p9608_p5 = scmp.ne.s32.totalorder %s1740_s5, %s9607_s11  ;;  %p9614_p3 = scmp.lt.s32.totalorder %s1740_s5, %s1740_s5 }
 0x401   : > { %p9615_p4 = scmp.lt.s32.totalorder %s9613_s3, %s9607_s11 }
 0x402   : > { %p9609_p6 = pnand %p9608_p5, %p8173_p10 }
 0x403   : > { %p9616_p7 = por %p9615_p4, %p9614_p3 }
 0x404   : > { %p9610_p2 = pneg %p9609_p6 }
 0x406   : > { %p9617_p8 = pnand %p9616_p7, %p9610_p2 }
 0x408   : > { %9620 = shalt.err (!%p9617_p8)
}
 0x409   : > { %s12400_s8 = sld [smem:[#allocation135_spill]] }
 0x40a   : > { %7972 = dma.hbm_to_vmem [thread:$0]  (%p8173_p10), %s12399_s14, 16, %s1740_s5, [#allocation24]  }
 0x40f   : > { %s9621_s17 = scalar_lea.hbm %s12400_s8, 16 }
 0x410   : > { %p9622_p11 = scmp.ne.s32.totalorder %s12400_s8, %s9621_s17  ;;  %p9627_p0 = scmp.lt.u32.totalorder %s9621_s17, %s12400_s8 }
 0x412   : > { %p9623_p12 = pnand %p9622_p11, %p8173_p10 }
 0x414   : > { %p9624_p13 = pneg %p9623_p12 }
 0x416   : > { %p9629_p1 = pnand %p9627_p0, %p9624_p13 }
 0x418   : > { %9632 = shalt.err (!%p9629_p1)
}
 0x419   : > { %s9633_s6 = scalar_lea.vmem %s11258_s10, 16  ;;  %s9639_s11 = scalar_lea.vmem %s11258_s10, 32 }
 0x41a   : > { %p9634_p5 = scmp.ne.s32.totalorder %s11258_s10, %s9633_s6  ;;  %p9640_p3 = scmp.lt.s32.totalorder %s11258_s10, %s11258_s10 }
 0x41b   : > { %p9641_p4 = scmp.lt.s32.totalorder %s9639_s11, %s9633_s6 }
 0x41c   : > { %p9635_p6 = pnand %p9634_p5, %p8173_p10 }
 0x41d   : > { %p9642_p7 = por %p9641_p4, %p9640_p3 }
 0x41e   : > { %p9636_p2 = pneg %p9635_p6 }
 0x420   : > { %p9643_p8 = pnand %p9642_p7, %p9636_p2 }
 0x422   : > { %9646 = shalt.err (!%p9643_p8)
}
 0x423   : > { %s12401_s5 = sld [smem:[#allocation138_spill]]  ;;  %s10453_s3 = smov [#allocation31]  }
 0x424   : > { %7976 = dma.hbm_to_vmem [thread:$0]  (%p8173_p10), %s12400_s8, 16, %s11258_s10, [#allocation27]  }
 0x425   : > { %s1786_s17 = sshll.u32 %s10453_s3, 4  ;;  %s10454_s4 = smov [#allocation34]   ;;  %s1787_s17 = int_to_ptr.vmem [resolvable:$true] %s1786_s17 }
 0x426   : > { %s1808_s12 = sshll.u32 %s10454_s4, 4  ;;  %s11286_s12 = int_to_ptr.vmem [resolvable:$true] %s1808_s12 }
 0x429   : > { %s9647_s6 = scalar_lea.hbm %s12401_s5, 16 }
 0x42a   : > { %p9648_p11 = scmp.ne.s32.totalorder %s12401_s5, %s9647_s6  ;;  %p9653_p0 = scmp.lt.u32.totalorder %s9647_s6, %s12401_s5 }
 0x42c   : > { %p9649_p12 = pnand %p9648_p11, %p8173_p10 }
 0x42e   : > { %p9650_p13 = pneg %p9649_p12 }
 0x430   : > { %p9655_p1 = pnand %p9653_p0, %p9650_p13 }
 0x432   : > { %9658 = shalt.err (!%p9655_p1)
}
 0x433   : > { %s9659_s11 = scalar_lea.vmem %s1787_s17, 16  ;;  %s9665_s10 = scalar_lea.vmem %s1787_s17, 32 }
 0x434   : > { %p9660_p5 = scmp.ne.s32.totalorder %s1787_s17, %s9659_s11  ;;  %p9666_p3 = scmp.lt.s32.totalorder %s1787_s17, %s1787_s17 }
 0x435   : > { %p9667_p4 = scmp.lt.s32.totalorder %s9665_s10, %s9659_s11 }
 0x436   : > { %p9661_p6 = pnand %p9660_p5, %p8173_p10 }
 0x437   : > { %p9668_p7 = por %p9667_p4, %p9666_p3 }
 0x438   : > { %p9662_p2 = pneg %p9661_p6 }
 0x43a   : > { %p9669_p8 = pnand %p9668_p7, %p9662_p2 }
 0x43c   : > { %9672 = shalt.err (!%p9669_p8)
}
 0x43d   : > { %s12402_s4 = sld [smem:[#allocation140_spill]] }
 0x43e   : > { %7980 = dma.hbm_to_vmem [thread:$0]  (%p8173_p10), %s12401_s5, 16, %s1787_s17, [#allocation30]  }
 0x443   : > { %s9673_s3 = scalar_lea.hbm %s12402_s4, 16 }
 0x444   : > { %p9674_p11 = scmp.ne.s32.totalorder %s12402_s4, %s9673_s3  ;;  %p9679_p0 = scmp.lt.u32.totalorder %s9673_s3, %s12402_s4 }
 0x446   : > { %p9675_p12 = pnand %p9674_p11, %p8173_p10 }
 0x448   : > { %p9676_p13 = pneg %p9675_p12 }
 0x44a   : > { %p9681_p1 = pnand %p9679_p0, %p9676_p13 }
 0x44c   : > { %9684 = shalt.err (!%p9681_p1)
}
 0x44d   : > { %s9685_s6 = scalar_lea.vmem %s11286_s12, 16  ;;  %s9691_s11 = scalar_lea.vmem %s11286_s12, 32 }
 0x44e   : > { %p9686_p5 = scmp.ne.s32.totalorder %s11286_s12, %s9685_s6  ;;  %p9692_p3 = scmp.lt.s32.totalorder %s11286_s12, %s11286_s12 }
 0x44f   : > { %p9693_p4 = scmp.lt.s32.totalorder %s9691_s11, %s9685_s6 }
 0x450   : > { %p9687_p6 = pnand %p9686_p5, %p8173_p10 }
 0x451   : > { %p9694_p7 = por %p9693_p4, %p9692_p3 }
 0x452   : > { %p9688_p2 = pneg %p9687_p6 }
 0x454   : > { %p9695_p8 = pnand %p9694_p7, %p9688_p2 }
 0x456   : > { %9698 = shalt.err (!%p9695_p8)
}
 0x457   : > { %s12403_s17 = sld [smem:[#allocation142_spill]]  ;;  %s10455_s10 = smov [#allocation37]  }
 0x458   : > { %7984 = dma.hbm_to_vmem [thread:$0]  (%p8173_p10), %s12402_s4, 16, %s11286_s12, [#allocation33]  }
 0x459   : > { %s1831_s3 = sshll.u32 %s10455_s10, 4  ;;  %s10456_s5 = smov [#allocation40]   ;;  %s1832_s3 = int_to_ptr.vmem [resolvable:$true] %s1831_s3 }
 0x45a   : > { %s1857_s8 = sshll.u32 %s10456_s5, 4  ;;  %s11314_s8 = int_to_ptr.vmem [resolvable:$true] %s1857_s8 }
 0x45d   : > { %s9699_s6 = scalar_lea.hbm %s12403_s17, 2048 }
 0x45e   : > { %p9700_p11 = scmp.ne.s32.totalorder %s12403_s17, %s9699_s6  ;;  %p9705_p0 = scmp.lt.u32.totalorder %s9699_s6, %s12403_s17 }
 0x460   : > { %p9701_p12 = pnand %p9700_p11, %p8173_p10 }
 0x462   : > { %p9702_p13 = pneg %p9701_p12 }
 0x464   : > { %p9707_p1 = pnand %p9705_p0, %p9702_p13 }
 0x466   : > { %9710 = shalt.err (!%p9707_p1)
}
 0x467   : > { %s9711_s11 = scalar_lea.vmem %s1832_s3, 2048  ;;  %p9718_p3 = scmp.lt.s32.totalorder %s1832_s3, %s1832_s3 }
 0x468   : > { %p9712_p5 = scmp.ne.s32.totalorder %s1832_s3, %s9711_s11  ;;  %p9719_p4 = scmp.lt.s32.totalorder %s9711_s11, %s9711_s11 }
 0x46a   : > { %p9713_p6 = pnand %p9712_p5, %p8173_p10  ;;  %p9720_p7 = por %p9719_p4, %p9718_p3 }
 0x46c   : > { %p9714_p2 = pneg %p9713_p6 }
 0x46e   : > { %p9721_p8 = pnand %p9720_p7, %p9714_p2 }
 0x470   : > { %9724 = shalt.err (!%p9721_p8)
}
 0x471   : > { %s12404_s12 = smov 8   ;;  %s12405_s5 = smov 128  }
 0x472   : > { %s12406_s10 = sld [smem:[#allocation143_spill]] }
 0x473   : > { %7988 = dma.hbm_to_vmem [thread:$0]  (%p8173_p10), %s12403_s17, 2048, %s1832_s3, [#allocation36], %s12405_s5, %s12405_s5, %s12404_s12  }
 0x478   : > { %s9725_s6 = scalar_lea.hbm %s12406_s10, 1024 }
 0x479   : > { %p9726_p11 = scmp.ne.s32.totalorder %s12406_s10, %s9725_s6  ;;  %p9731_p0 = scmp.lt.u32.totalorder %s9725_s6, %s12406_s10 }
 0x47b   : > { %p9727_p12 = pnand %p9726_p11, %p8173_p10 }
 0x47d   : > { %p9728_p13 = pneg %p9727_p12 }
 0x47f   : > { %p9733_p1 = pnand %p9731_p0, %p9728_p13 }
 0x481   : > { %9736 = shalt.err (!%p9733_p1)
}
 0x482   : > { %s9737_s11 = scalar_lea.vmem %s11314_s8, 1024  ;;  %p9744_p3 = scmp.lt.s32.totalorder %s11314_s8, %s11314_s8 }
 0x483   : > { %p9738_p5 = scmp.ne.s32.totalorder %s11314_s8, %s9737_s11  ;;  %p9745_p4 = scmp.lt.s32.totalorder %s9737_s11, %s9737_s11 }
 0x485   : > { %p9739_p6 = pnand %p9738_p5, %p8173_p10  ;;  %p9746_p7 = por %p9745_p4, %p9744_p3 }
 0x487   : > { %p9740_p2 = pneg %p9739_p6 }
 0x489   : > { %p9747_p8 = pnand %p9746_p7, %p9740_p2 }
 0x48b   : > { %9750 = shalt.err (!%p9747_p8)
}
 0x48c   : > { %s12407_s3 = sld [smem:[#allocation144_spill]]  ;;  %s10457_s6 = smov [#allocation43]  }
 0x48d   : > { %7992 = dma.hbm_to_vmem [thread:$0]  (%p8173_p10), %s12406_s10, 1024, %s11314_s8, [#allocation39], %s12378_s1, %s12378_s1, %s12377_s15  }
 0x48e   : > { %s1884_s4 = sshll.u32 %s10457_s6, 4  ;;  %s10458_s14 = smov [#allocation46]   ;;  %s1885_s4 = int_to_ptr.vmem [resolvable:$true] %s1884_s4 }
 0x48f   : > { %s1906_s16 = sshll.u32 %s10458_s14, 4  ;;  %s11347_s16 = int_to_ptr.vmem [resolvable:$true] %s1906_s16 }
 0x492   : > { %s9751_s11 = scalar_lea.hbm %s12407_s3, 16 }
 0x493   : > { %p9752_p11 = scmp.ne.s32.totalorder %s12407_s3, %s9751_s11  ;;  %p9757_p0 = scmp.lt.u32.totalorder %s9751_s11, %s12407_s3 }
 0x495   : > { %p9753_p12 = pnand %p9752_p11, %p8173_p10 }
 0x497   : > { %p9754_p13 = pneg %p9753_p12 }
 0x499   : > { %p9759_p1 = pnand %p9757_p0, %p9754_p13 }
 0x49b   : > { %9762 = shalt.err (!%p9759_p1)
}
 0x49c   : > { %s9763_s17 = scalar_lea.vmem %s1885_s4, 16  ;;  %s9769_s8 = scalar_lea.vmem %s1885_s4, 32 }
 0x49d   : > { %p9764_p5 = scmp.ne.s32.totalorder %s1885_s4, %s9763_s17  ;;  %p9770_p3 = scmp.lt.s32.totalorder %s1885_s4, %s1885_s4 }
 0x49e   : > { %p9771_p4 = scmp.lt.s32.totalorder %s9769_s8, %s9763_s17 }
 0x49f   : > { %p9765_p6 = pnand %p9764_p5, %p8173_p10 }
 0x4a0   : > { %p9772_p7 = por %p9771_p4, %p9770_p3 }
 0x4a1   : > { %p9766_p2 = pneg %p9765_p6 }
 0x4a3   : > { %p9773_p8 = pnand %p9772_p7, %p9766_p2 }
 0x4a5   : > { %9776 = shalt.err (!%p9773_p8)
}
 0x4a6   : > { %s12408_s14 = sld [smem:[#allocation146_spill]] }
 0x4a7   : > { %7996 = dma.hbm_to_vmem [thread:$0]  (%p8173_p10), %s12407_s3, 16, %s1885_s4, [#allocation42]  }
 0x4ac   : > { %s9777_s6 = scalar_lea.hbm %s12408_s14, 16 }
 0x4ad   : > { %p9778_p11 = scmp.ne.s32.totalorder %s12408_s14, %s9777_s6  ;;  %p9783_p0 = scmp.lt.u32.totalorder %s9777_s6, %s12408_s14 }
 0x4af   : > { %p9779_p12 = pnand %p9778_p11, %p8173_p10 }
 0x4b1   : > { %p9780_p13 = pneg %p9779_p12 }
 0x4b3   : > { %p9785_p1 = pnand %p9783_p0, %p9780_p13 }
 0x4b5   : > { %9788 = shalt.err (!%p9785_p1)
}
 0x4b6   : > { %s9789_s17 = scalar_lea.vmem %s11347_s16, 16  ;;  %s9795_s11 = scalar_lea.vmem %s11347_s16, 32 }
 0x4b7   : > { %p9790_p5 = scmp.ne.s32.totalorder %s11347_s16, %s9789_s17  ;;  %p9796_p3 = scmp.lt.s32.totalorder %s11347_s16, %s11347_s16 }
 0x4b8   : > { %p9797_p4 = scmp.lt.s32.totalorder %s9795_s11, %s9789_s17 }
 0x4b9   : > { %p9791_p6 = pnand %p9790_p5, %p8173_p10 }
 0x4ba   : > { %p9798_p7 = por %p9797_p4, %p9796_p3 }
 0x4bb   : > { %p9792_p2 = pneg %p9791_p6 }
 0x4bd   : > { %p9799_p8 = pnand %p9798_p7, %p9792_p2 }
 0x4bf   : > { %9802 = shalt.err (!%p9799_p8)
}
 0x4c0   : > { %s12409_s4 = sld [smem:[#allocation148_spill]]  ;;  %s10459_s8 = smov [#allocation49]  }
 0x4c1   : > { %8000 = dma.hbm_to_vmem [thread:$0]  (%p8173_p10), %s12408_s14, 16, %s11347_s16, [#allocation45]  }
 0x4c2   : > { %s1930_s6 = sshll.u32 %s10459_s8, 4  ;;  %s10460_s3 = smov [#allocation52]   ;;  %s1931_s6 = int_to_ptr.vmem [resolvable:$true] %s1930_s6 }
 0x4c3   : > { %s1952_s10 = sshll.u32 %s10460_s3, 4  ;;  %s11375_s10 = int_to_ptr.vmem [resolvable:$true] %s1952_s10 }
 0x4c6   : > { %s9803_s17 = scalar_lea.hbm %s12409_s4, 16 }
 0x4c7   : > { %p9804_p11 = scmp.ne.s32.totalorder %s12409_s4, %s9803_s17  ;;  %p9809_p0 = scmp.lt.u32.totalorder %s9803_s17, %s12409_s4 }
 0x4c9   : > { %p9805_p12 = pnand %p9804_p11, %p8173_p10 }
 0x4cb   : > { %p9806_p13 = pneg %p9805_p12 }
 0x4cd   : > { %p9811_p1 = pnand %p9809_p0, %p9806_p13 }
 0x4cf   : > { %9814 = shalt.err (!%p9811_p1)
}
 0x4d0   : > { %s9815_s11 = scalar_lea.vmem %s1931_s6, 16  ;;  %s9821_s16 = scalar_lea.vmem %s1931_s6, 32 }
 0x4d1   : > { %p9816_p5 = scmp.ne.s32.totalorder %s1931_s6, %s9815_s11  ;;  %p9822_p3 = scmp.lt.s32.totalorder %s1931_s6, %s1931_s6 }
 0x4d2   : > { %p9823_p4 = scmp.lt.s32.totalorder %s9821_s16, %s9815_s11 }
 0x4d3   : > { %p9817_p6 = pnand %p9816_p5, %p8173_p10 }
 0x4d4   : > { %p9824_p7 = por %p9823_p4, %p9822_p3 }
 0x4d5   : > { %p9818_p2 = pneg %p9817_p6 }
 0x4d7   : > { %p9825_p8 = pnand %p9824_p7, %p9818_p2 }
 0x4d9   : > { %9828 = shalt.err (!%p9825_p8)
}
 0x4da   : > { %s12410_s3 = sld [smem:[#allocation150_spill]] }
 0x4db   : > { %8004 = dma.hbm_to_vmem [thread:$0]  (%p8173_p10), %s12409_s4, 16, %s1931_s6, [#allocation48]  }
 0x4e0   : > { %s9829_s8 = scalar_lea.hbm %s12410_s3, 16 }
 0x4e1   : > { %p9830_p11 = scmp.ne.s32.totalorder %s12410_s3, %s9829_s8  ;;  %p9835_p0 = scmp.lt.u32.totalorder %s9829_s8, %s12410_s3 }
 0x4e3   : > { %p9831_p12 = pnand %p9830_p11, %p8173_p10 }
 0x4e5   : > { %p9832_p13 = pneg %p9831_p12 }
 0x4e7   : > { %p9837_p1 = pnand %p9835_p0, %p9832_p13 }
 0x4e9   : > { %9840 = shalt.err (!%p9837_p1)
}
 0x4ea   : > { %s9841_s17 = scalar_lea.vmem %s11375_s10, 16  ;;  %s9847_s11 = scalar_lea.vmem %s11375_s10, 32 }
 0x4eb   : > { %p9842_p5 = scmp.ne.s32.totalorder %s11375_s10, %s9841_s17  ;;  %p9848_p3 = scmp.lt.s32.totalorder %s11375_s10, %s11375_s10 }
 0x4ec   : > { %p9849_p4 = scmp.lt.s32.totalorder %s9847_s11, %s9841_s17 }
 0x4ed   : > { %p9843_p6 = pnand %p9842_p5, %p8173_p10 }
 0x4ee   : > { %p9850_p7 = por %p9849_p4, %p9848_p3 }
 0x4ef   : > { %p9844_p2 = pneg %p9843_p6 }
 0x4f1   : > { %p9851_p8 = pnand %p9850_p7, %p9844_p2 }
 0x4f3   : > { %9854 = shalt.err (!%p9851_p8)
}
 0x4f4   : > { %s12411_s6 = sld [smem:[#allocation152_spill]]  ;;  %s10461_s16 = smov [#allocation55]  }
 0x4f5   : > { %8008 = dma.hbm_to_vmem [thread:$0]  (%p8173_p10), %s12410_s3, 16, %s11375_s10, [#allocation51]  }
 0x4f6   : > { %s1974_s8 = sshll.u32 %s10461_s16, 4  ;;  %s10462_s4 = smov [#allocation58]   ;;  %s1975_s8 = int_to_ptr.vmem [resolvable:$true] %s1974_s8 }
 0x4f7   : > { %s1998_s14 = sshll.u32 %s10462_s4, 4  ;;  %s11403_s14 = int_to_ptr.vmem [resolvable:$true] %s1998_s14 }
 0x4fa   : > { %s9855_s17 = scalar_lea.hbm %s12411_s6, 16 }
 0x4fb   : > { %p9856_p11 = scmp.ne.s32.totalorder %s12411_s6, %s9855_s17  ;;  %p9861_p0 = scmp.lt.u32.totalorder %s9855_s17, %s12411_s6 }
 0x4fd   : > { %p9857_p12 = pnand %p9856_p11, %p8173_p10 }
 0x4ff   : > { %p9858_p13 = pneg %p9857_p12 }
 0x501   : > { %p9863_p1 = pnand %p9861_p0, %p9858_p13 }
 0x503   : > { %9866 = shalt.err (!%p9863_p1)
}
 0x504   : > { %s9867_s11 = scalar_lea.vmem %s1975_s8, 16  ;;  %s9873_s10 = scalar_lea.vmem %s1975_s8, 32 }
 0x505   : > { %p9868_p5 = scmp.ne.s32.totalorder %s1975_s8, %s9867_s11  ;;  %p9874_p3 = scmp.lt.s32.totalorder %s1975_s8, %s1975_s8 }
 0x506   : > { %p9875_p4 = scmp.lt.s32.totalorder %s9873_s10, %s9867_s11 }
 0x507   : > { %p9869_p6 = pnand %p9868_p5, %p8173_p10 }
 0x508   : > { %p9876_p7 = por %p9875_p4, %p9874_p3 }
 0x509   : > { %p9870_p2 = pneg %p9869_p6 }
 0x50b   : > { %p9877_p8 = pnand %p9876_p7, %p9870_p2 }
 0x50d   : > { %9880 = shalt.err (!%p9877_p8)
}
 0x50e   : > { %s12412_s4 = sld [smem:[#allocation154_spill]] }
 0x50f   : > { %8012 = dma.hbm_to_vmem [thread:$0]  (%p8173_p10), %s12411_s6, 16, %s1975_s8, [#allocation54]  }
 0x514   : > { %s9881_s16 = scalar_lea.hbm %s12412_s4, 16 }
 0x515   : > { %p9882_p11 = scmp.ne.s32.totalorder %s12412_s4, %s9881_s16  ;;  %p9887_p0 = scmp.lt.u32.totalorder %s9881_s16, %s12412_s4 }
 0x517   : > { %p9883_p12 = pnand %p9882_p11, %p8173_p10 }
 0x519   : > { %p9884_p13 = pneg %p9883_p12 }
 0x51b   : > { %p9889_p1 = pnand %p9887_p0, %p9884_p13 }
 0x51d   : > { %9892 = shalt.err (!%p9889_p1)
}
 0x51e   : > { %s9893_s17 = scalar_lea.vmem %s11403_s14, 16  ;;  %s9899_s11 = scalar_lea.vmem %s11403_s14, 32 }
 0x51f   : > { %p9894_p5 = scmp.ne.s32.totalorder %s11403_s14, %s9893_s17  ;;  %p9900_p3 = scmp.lt.s32.totalorder %s11403_s14, %s11403_s14 }
 0x520   : > { %p9901_p4 = scmp.lt.s32.totalorder %s9899_s11, %s9893_s17 }
 0x521   : > { %p9895_p6 = pnand %p9894_p5, %p8173_p10 }
 0x522   : > { %p9902_p7 = por %p9901_p4, %p9900_p3 }
 0x523   : > { %p9896_p2 = pneg %p9895_p6 }
 0x525   : > { %p9903_p8 = pnand %p9902_p7, %p9896_p2 }
 0x527   : > { %9906 = shalt.err (!%p9903_p8)
}
 0x528   : > { %s12413_s8 = sld [smem:[#allocation156_spill]]  ;;  %s10463_s10 = smov [#allocation61]  }
 0x529   : > { %8016 = dma.hbm_to_vmem [thread:$0]  (%p8173_p10), %s12412_s4, 16, %s11403_s14, [#allocation57]  }
 0x52a   : > { %s2020_s16 = sshll.u32 %s10463_s10, 4  ;;  %s10464_s3 = smov [#allocation64]   ;;  %s2021_s16 = int_to_ptr.vmem [resolvable:$true] %s2020_s16 }
 0x52b   : > { %s2045_s6 = sshll.u32 %s10464_s3, 4  ;;  %s11431_s6 = int_to_ptr.vmem [resolvable:$true] %s2045_s6 }
 0x52e   : > { %s9907_s17 = scalar_lea.hbm %s12413_s8, 16 }
 0x52f   : > { %p9908_p11 = scmp.ne.s32.totalorder %s12413_s8, %s9907_s17  ;;  %p9913_p0 = scmp.lt.u32.totalorder %s9907_s17, %s12413_s8 }
 0x531   : > { %p9909_p12 = pnand %p9908_p11, %p8173_p10 }
 0x533   : > { %p9910_p13 = pneg %p9909_p12 }
 0x535   : > { %p9915_p1 = pnand %p9913_p0, %p9910_p13 }
 0x537   : > { %9918 = shalt.err (!%p9915_p1)
}
 0x538   : > { %s9919_s11 = scalar_lea.vmem %s2021_s16, 16  ;;  %s9925_s14 = scalar_lea.vmem %s2021_s16, 32 }
 0x539   : > { %p9920_p5 = scmp.ne.s32.totalorder %s2021_s16, %s9919_s11  ;;  %p9926_p3 = scmp.lt.s32.totalorder %s2021_s16, %s2021_s16 }
 0x53a   : > { %p9927_p4 = scmp.lt.s32.totalorder %s9925_s14, %s9919_s11 }
 0x53b   : > { %p9921_p6 = pnand %p9920_p5, %p8173_p10 }
 0x53c   : > { %p9928_p7 = por %p9927_p4, %p9926_p3 }
 0x53d   : > { %p9922_p2 = pneg %p9921_p6 }
 0x53f   : > { %p9929_p8 = pnand %p9928_p7, %p9922_p2 }
 0x541   : > { %9932 = shalt.err (!%p9929_p8)
}
 0x542   : > { %s12414_s3 = sld [smem:[#allocation159_spill]] }
 0x543   : > { %8020 = dma.hbm_to_vmem [thread:$0]  (%p8173_p10), %s12413_s8, 16, %s2021_s16, [#allocation60]  }
 0x548   : > { %s9933_s10 = scalar_lea.hbm %s12414_s3, 16 }
 0x549   : > { %p9934_p11 = scmp.ne.s32.totalorder %s12414_s3, %s9933_s10  ;;  %p9939_p0 = scmp.lt.u32.totalorder %s9933_s10, %s12414_s3 }
 0x54b   : > { %p9935_p12 = pnand %p9934_p11, %p8173_p10 }
 0x54d   : > { %p9936_p13 = pneg %p9935_p12 }
 0x54f   : > { %p9941_p1 = pnand %p9939_p0, %p9936_p13 }
 0x551   : > { %9944 = shalt.err (!%p9941_p1)
}
 0x552   : > { %s9945_s17 = scalar_lea.vmem %s11431_s6, 16  ;;  %s9951_s11 = scalar_lea.vmem %s11431_s6, 32 }
 0x553   : > { %p9946_p5 = scmp.ne.s32.totalorder %s11431_s6, %s9945_s17  ;;  %p9952_p3 = scmp.lt.s32.totalorder %s11431_s6, %s11431_s6 }
 0x554   : > { %p9953_p4 = scmp.lt.s32.totalorder %s9951_s11, %s9945_s17 }
 0x555   : > { %p9947_p6 = pnand %p9946_p5, %p8173_p10 }
 0x556   : > { %p9954_p7 = por %p9953_p4, %p9952_p3 }
 0x557   : > { %p9948_p2 = pneg %p9947_p6 }
 0x559   : > { %p9955_p8 = pnand %p9954_p7, %p9948_p2 }
 0x55b   : > { %9958 = shalt.err (!%p9955_p8)
}
 0x55c   : > { %s12415_s16 = sld [smem:[#allocation161_spill]]  ;;  %s10465_s14 = smov [#allocation67]  }
 0x55d   : > { %8024 = dma.hbm_to_vmem [thread:$0]  (%p8173_p10), %s12414_s3, 16, %s11431_s6, [#allocation63]  }
 0x55e   : > { %s2067_s10 = sshll.u32 %s10465_s14, 4  ;;  %s10466_s4 = smov [#allocation70]   ;;  %s2068_s10 = int_to_ptr.vmem [resolvable:$true] %s2067_s10 }
 0x55f   : > { %s2088_s8 = sshll.u32 %s10466_s4, 4  ;;  %s11459_s8 = int_to_ptr.vmem [resolvable:$true] %s2088_s8 }
 0x562   : > { %s9959_s17 = scalar_lea.hbm %s12415_s16, 16 }
 0x563   : > { %p9960_p11 = scmp.ne.s32.totalorder %s12415_s16, %s9959_s17  ;;  %p9965_p0 = scmp.lt.u32.totalorder %s9959_s17, %s12415_s16 }
 0x565   : > { %p9961_p12 = pnand %p9960_p11, %p8173_p10 }
 0x567   : > { %p9962_p13 = pneg %p9961_p12 }
 0x569   : > { %p9967_p1 = pnand %p9965_p0, %p9962_p13 }
 0x56b   : > { %9970 = shalt.err (!%p9967_p1)
}
 0x56c   : > { %s9971_s11 = scalar_lea.vmem %s2068_s10, 16  ;;  %s9977_s6 = scalar_lea.vmem %s2068_s10, 32 }
 0x56d   : > { %p9972_p5 = scmp.ne.s32.totalorder %s2068_s10, %s9971_s11  ;;  %p9978_p3 = scmp.lt.s32.totalorder %s2068_s10, %s2068_s10 }
 0x56e   : > { %p9979_p4 = scmp.lt.s32.totalorder %s9977_s6, %s9971_s11 }
 0x56f   : > { %p9973_p6 = pnand %p9972_p5, %p8173_p10 }
 0x570   : > { %p9980_p7 = por %p9979_p4, %p9978_p3 }
 0x571   : > { %p9974_p2 = pneg %p9973_p6 }
 0x573   : > { %p9981_p8 = pnand %p9980_p7, %p9974_p2 }
 0x575   : > { %9984 = shalt.err (!%p9981_p8)
}
 0x576   : > { %s12416_s4 = sld [smem:[#allocation163_spill]] }
 0x577   : > { %8028 = dma.hbm_to_vmem [thread:$0]  (%p8173_p10), %s12415_s16, 16, %s2068_s10, [#allocation66]  }
 0x57c   : > { %s9985_s14 = scalar_lea.hbm %s12416_s4, 1024 }
 0x57d   : > { %p9986_p11 = scmp.ne.s32.totalorder %s12416_s4, %s9985_s14  ;;  %p9991_p0 = scmp.lt.u32.totalorder %s9985_s14, %s12416_s4 }
 0x57f   : > { %p9987_p12 = pnand %p9986_p11, %p8173_p10 }
 0x581   : > { %p9988_p13 = pneg %p9987_p12 }
 0x583   : > { %p9993_p1 = pnand %p9991_p0, %p9988_p13 }
 0x585   : > { %9996 = shalt.err (!%p9993_p1)
}
 0x586   : > { %s9997_s17 = scalar_lea.vmem %s11459_s8, 1024  ;;  %p10004_p3 = scmp.lt.s32.totalorder %s11459_s8, %s11459_s8 }
 0x587   : > { %p9998_p5 = scmp.ne.s32.totalorder %s11459_s8, %s9997_s17  ;;  %p10005_p4 = scmp.lt.s32.totalorder %s9997_s17, %s9997_s17 }
 0x589   : > { %p9999_p6 = pnand %p9998_p5, %p8173_p10  ;;  %p10006_p7 = por %p10005_p4, %p10004_p3 }
 0x58b   : > { %p10000_p2 = pneg %p9999_p6 }
 0x58d   : > { %p10007_p8 = pnand %p10006_p7, %p10000_p2 }
 0x58f   : > { %10010 = shalt.err (!%p10007_p8)
}
 0x590   : > { %s12417_s10 = sld [smem:[#allocation165_spill]]  ;;  %s10467_s11 = smov [#allocation73]  }
 0x591   : > { %8032 = dma.hbm_to_vmem [thread:$0]  (%p8173_p10), %s12416_s4, 1024, %s11459_s8, [#allocation69], %s12378_s1, %s12378_s1, %s12377_s15  }
 0x592   : > { %s2114_s6 = sshll.u32 %s10467_s11, 4  ;;  %s10468_s14 = smov [#allocation76]   ;;  %s2115_s6 = int_to_ptr.vmem [resolvable:$true] %s2114_s6 }
 0x593   : > { %s2142_s3 = sshll.u32 %s10468_s14, 4  ;;  %s11489_s3 = int_to_ptr.vmem [resolvable:$true] %s2142_s3 }
 0x596   : > { %s10011_s17 = scalar_lea.hbm %s12417_s10, 1024 }
 0x597   : > { %p10012_p11 = scmp.ne.s32.totalorder %s12417_s10, %s10011_s17  ;;  %p10017_p0 = scmp.lt.u32.totalorder %s10011_s17, %s12417_s10 }
 0x599   : > { %p10013_p12 = pnand %p10012_p11, %p8173_p10 }
 0x59b   : > { %p10014_p13 = pneg %p10013_p12 }
 0x59d   : > { %p10019_p1 = pnand %p10017_p0, %p10014_p13 }
 0x59f   : > { %10022 = shalt.err (!%p10019_p1)
}
 0x5a0   : > { %s10023_s16 = scalar_lea.vmem %s2115_s6, 1024  ;;  %p10030_p3 = scmp.lt.s32.totalorder %s2115_s6, %s2115_s6 }
 0x5a1   : > { %p10024_p5 = scmp.ne.s32.totalorder %s2115_s6, %s10023_s16  ;;  %p10031_p4 = scmp.lt.s32.totalorder %s10023_s16, %s10023_s16 }
 0x5a3   : > { %p10025_p6 = pnand %p10024_p5, %p8173_p10  ;;  %p10032_p7 = por %p10031_p4, %p10030_p3 }
 0x5a5   : > { %p10026_p2 = pneg %p10025_p6 }
 0x5a7   : > { %p10033_p8 = pnand %p10032_p7, %p10026_p2 }
 0x5a9   : > { %10036 = shalt.err (!%p10033_p8)
}
 0x5aa   : > { %s12418_s8 = sld [smem:[#allocation168_spill]] }
 0x5ab   : > { %8036 = dma.hbm_to_vmem [thread:$0]  (%p8173_p10), %s12417_s10, 1024, %s2115_s6, [#allocation72], %s12378_s1, %s12378_s1, %s12377_s15  }
 0x5b0   : > { %s10037_s11 = scalar_lea.hbm %s12418_s8, 16 }
 0x5b1   : > { %p10038_p11 = scmp.ne.s32.totalorder %s12418_s8, %s10037_s11  ;;  %p10043_p0 = scmp.lt.u32.totalorder %s10037_s11, %s12418_s8 }
 0x5b3   : > { %p10039_p12 = pnand %p10038_p11, %p8173_p10 }
 0x5b5   : > { %p10040_p13 = pneg %p10039_p12 }
 0x5b7   : > { %p10045_p1 = pnand %p10043_p0, %p10040_p13 }
 0x5b9   : > { %10048 = shalt.err (!%p10045_p1)
}
 0x5ba   : > { %s10049_s16 = scalar_lea.vmem %s11489_s3, 16  ;;  %s10055_s14 = scalar_lea.vmem %s11489_s3, 32 }
 0x5bb   : > { %p10050_p5 = scmp.ne.s32.totalorder %s11489_s3, %s10049_s16  ;;  %p10056_p3 = scmp.lt.s32.totalorder %s11489_s3, %s11489_s3 }
 0x5bc   : > { %p10057_p4 = scmp.lt.s32.totalorder %s10055_s14, %s10049_s16 }
 0x5bd   : > { %p10051_p6 = pnand %p10050_p5, %p8173_p10 }
 0x5be   : > { %p10058_p7 = por %p10057_p4, %p10056_p3 }
 0x5bf   : > { %p10052_p2 = pneg %p10051_p6 }
 0x5c1   : > { %p10059_p8 = pnand %p10058_p7, %p10052_p2 }
 0x5c3   : > { %10062 = shalt.err (!%p10059_p8)
}
 0x5c4   : > { %s12419_s6 = sld [smem:[#allocation170_spill]]  ;;  %s10469_s17 = smov [#allocation79]  }
 0x5c5   : > { %8040 = dma.hbm_to_vmem [thread:$0]  (%p8173_p10), %s12418_s8, 16, %s11489_s3, [#allocation75]  }
 0x5c6   : > { %s2163_s11 = sshll.u32 %s10469_s17, 4  ;;  %s10470_s4 = smov [#allocation82]   ;;  %s2164_s11 = int_to_ptr.vmem [resolvable:$true] %s2163_s11 }
 0x5c7   : > { %s2188_s10 = sshll.u32 %s10470_s4, 4  ;;  %s11520_s10 = int_to_ptr.vmem [resolvable:$true] %s2188_s10 }
 0x5ca   : > { %s10063_s16 = scalar_lea.hbm %s12419_s6, 1024 }
 0x5cb   : > { %p10064_p11 = scmp.ne.s32.totalorder %s12419_s6, %s10063_s16  ;;  %p10069_p0 = scmp.lt.u32.totalorder %s10063_s16, %s12419_s6 }
 0x5cd   : > { %p10065_p12 = pnand %p10064_p11, %p8173_p10 }
 0x5cf   : > { %p10066_p13 = pneg %p10065_p12 }
 0x5d1   : > { %p10071_p1 = pnand %p10069_p0, %p10066_p13 }
 0x5d3   : > { %10074 = shalt.err (!%p10071_p1)
}
 0x5d4   : > { %s10075_s14 = scalar_lea.vmem %s2164_s11, 1024  ;;  %p10082_p3 = scmp.lt.s32.totalorder %s2164_s11, %s2164_s11 }
 0x5d5   : > { %p10076_p5 = scmp.ne.s32.totalorder %s2164_s11, %s10075_s14  ;;  %p10083_p4 = scmp.lt.s32.totalorder %s10075_s14, %s10075_s14 }
 0x5d7   : > { %p10077_p6 = pnand %p10076_p5, %p8173_p10  ;;  %p10084_p7 = por %p10083_p4, %p10082_p3 }
 0x5d9   : > { %p10078_p2 = pneg %p10077_p6 }
 0x5db   : > { %p10085_p8 = pnand %p10084_p7, %p10078_p2 }
 0x5dd   : > { %10088 = shalt.err (!%p10085_p8)
}
 0x5de   : > { %s12420_s3 = sld [smem:[#allocation172_spill]] }
 0x5df   : > { %8044 = dma.hbm_to_vmem [thread:$0]  (%p8173_p10), %s12419_s6, 1024, %s2164_s11, [#allocation78], %s12378_s1, %s12378_s1, %s12377_s15  }
 0x5e4   : > { %s10089_s4 = scalar_lea.hbm %s12420_s3, 16 }
 0x5e5   : > { %p10090_p11 = scmp.ne.s32.totalorder %s12420_s3, %s10089_s4  ;;  %p10095_p0 = scmp.lt.u32.totalorder %s10089_s4, %s12420_s3 }
 0x5e7   : > { %p10091_p12 = pnand %p10090_p11, %p8173_p10 }
 0x5e9   : > { %p10092_p13 = pneg %p10091_p12 }
 0x5eb   : > { %p10097_p1 = pnand %p10095_p0, %p10092_p13 }
 0x5ed   : > { %10100 = shalt.err (!%p10097_p1)
}
 0x5ee   : > { %s10101_s17 = scalar_lea.vmem %s11520_s10, 16  ;;  %s10107_s16 = scalar_lea.vmem %s11520_s10, 32 }
 0x5ef   : > { %p10102_p5 = scmp.ne.s32.totalorder %s11520_s10, %s10101_s17  ;;  %p10108_p3 = scmp.lt.s32.totalorder %s11520_s10, %s11520_s10 }
 0x5f0   : > { %p10109_p4 = scmp.lt.s32.totalorder %s10107_s16, %s10101_s17 }
 0x5f1   : > { %p10103_p6 = pnand %p10102_p5, %p8173_p10 }
 0x5f2   : > { %p10110_p7 = por %p10109_p4, %p10108_p3 }
 0x5f3   : > { %p10104_p2 = pneg %p10103_p6 }
 0x5f5   : > { %p10111_p8 = pnand %p10110_p7, %p10104_p2 }
 0x5f7   : > { %10114 = shalt.err (!%p10111_p8)
}
 0x5f8   : > { %8048 = dma.hbm_to_vmem [thread:$0]  (%p8173_p10), %s12420_s3, 16, %s11520_s10, [#allocation81]  }
 0x5f9   : > { %s10471_s11 = smov [#allocation85]   ;;  %s10472_s4 = smov [#allocation86]  }
 0x5fa   : > { %s2212_s14 = sshll.u32 %s10471_s11, 4  ;;  %s2225_s6 = sshll.u32 %s10472_s4, 4  ;;  %s2213_s14 = int_to_ptr.vmem [resolvable:$true] %s2212_s14  ;;  %s11551_s6 = int_to_ptr.vmem [resolvable:$true] %s2225_s6 }
 0x5fb   : > { %s10115_s17 = scalar_lea.hbm %s10798_s21, 1024 }
 0x5fc   : > { %p10116_p11 = scmp.ne.s32.totalorder %s10798_s21, %s10115_s17  ;;  %p10121_p0 = scmp.lt.u32.totalorder %s10115_s17, %s10798_s21 }
 0x5fe   : > { %p10117_p12 = pnand %p10116_p11, %p8173_p10 }
 0x600   : > { %p10118_p13 = pneg %p10117_p12 }
 0x602   : > { %p10123_p1 = pnand %p10121_p0, %p10118_p13 }
 0x604   : > { %10126 = shalt.err (!%p10123_p1)
}
 0x605   : > { %s10127_s16 = scalar_lea.vmem %s2213_s14, 1024  ;;  %p10134_p3 = scmp.lt.s32.totalorder %s2213_s14, %s2213_s14 }
 0x606   : > { %p10128_p5 = scmp.ne.s32.totalorder %s2213_s14, %s10127_s16  ;;  %p10135_p4 = scmp.lt.s32.totalorder %s10127_s16, %s10127_s16 }
 0x608   : > { %p10129_p6 = pnand %p10128_p5, %p8173_p10  ;;  %p10136_p7 = por %p10135_p4, %p10134_p3 }
 0x60a   : > { %p10130_p2 = pneg %p10129_p6 }
 0x60c   : > { %p10137_p8 = pnand %p10136_p7, %p10130_p2 }
 0x60e   : > { %10140 = shalt.err (!%p10137_p8)
}
 0x60f   : > { %8052 = dma.hbm_to_vmem [thread:$0]  (%p8173_p10), %s10798_s21, 1024, %s2213_s14, [#allocation84], %s12378_s1, %s12378_s1, %s12377_s15  }
 0x610   : > { %s10141_s10 = scalar_lea.hbm %s10803_s27, 2048 }
 0x611   : > { %p10142_p11 = scmp.ne.s32.totalorder %s10803_s27, %s10141_s10  ;;  %p10147_p0 = scmp.lt.u32.totalorder %s10141_s10, %s10803_s27 }
 0x613   : > { %p10143_p12 = pnand %p10142_p11, %p8173_p10 }
 0x615   : > { %p10144_p13 = pneg %p10143_p12 }
 0x617   : > { %p10149_p1 = pnand %p10147_p0, %p10144_p13 }
 0x619   : > { %10152 = shalt.err (!%p10149_p1)
}
 0x61a   : > { %s10153_s11 = scalar_lea.vmem %s11551_s6, 2048  ;;  %p10160_p3 = scmp.lt.s32.totalorder %s11551_s6, %s11551_s6 }
 0x61b   : > { %p10154_p5 = scmp.ne.s32.totalorder %s11551_s6, %s10153_s11  ;;  %p10161_p4 = scmp.lt.s32.totalorder %s10153_s11, %s10153_s11 }
 0x61d   : > { %p10155_p6 = pnand %p10154_p5, %p8173_p10  ;;  %p10162_p7 = por %p10161_p4, %p10160_p3 }
 0x61f   : > { %p10156_p2 = pneg %p10155_p6 }
 0x621   : > { %p10163_p8 = pnand %p10162_p7, %p10156_p2 }
 0x623   : > { %10166 = shalt.err (!%p10163_p8)
}
 0x624   : > { %8054 = dma.hbm_to_vmem [thread:$0]  (%p8173_p10), %s10803_s27, 2048, %s11551_s6, [#allocation87], %s12405_s5, %s12405_s5, %s12404_s12  }
 0x625 PF: > { %2255 = sbr.rel (%p10858_p9) target bundleno = 10966 (0x2ad6), region = 276  ;;  %p8229_p11 = scmp.eq.s32.totalorder (!%p10858_p9), %s10831_s7, 0 }
 0x62c   : > { %10212 = dma.done.wait (%p8229_p11), [#allocation3], 256  }
 0x62d   : > { %10214 = vsyncadd (%p8229_p11), [#allocation3], 4294967040 }
 0x62e   : > { %10216 = dma.done.wait (%p8229_p11), [#allocation6], 32  }
 0x62f   : > { %10218 = vsyncadd (%p8229_p11), [#allocation6], 4294967264 }
 0x630   : > { %10220 = dma.done.wait (%p8229_p11), [#allocation9], 32  }
 0x631   : > { %10222 = vsyncadd (%p8229_p11), [#allocation9], 4294967264 }
 0x632   : > { %10224 = dma.done.wait (%p8229_p11), [#allocation12], 32  }
 0x633   : > { %10226 = vsyncadd (%p8229_p11), [#allocation12], 4294967264 }
 0x634   : > { %10228 = dma.done.wait (%p8229_p11), [#allocation15], 1040  }
 0x635   : > { %10230 = vsyncadd (%p8229_p11), [#allocation15], 4294966256 }
 0x636   : > { %10232 = dma.done.wait (%p8229_p11), [#allocation18], 2048  }
 0x637   : > { %10234 = vsyncadd (%p8229_p11), [#allocation18], 4294965248 }
 0x638   : > { %10236 = dma.done.wait (%p8229_p11), [#allocation21], 3088  }
 0x639   : > { %10238 = vsyncadd (%p8229_p11), [#allocation21], 4294964208 }
 0x63a   : > { %10240 = dma.done.wait (%p8229_p11), [#allocation24], 48  }
 0x63b   : > { %10242 = vsyncadd (%p8229_p11), [#allocation24], 4294967248 }
 0x63c   : > { %10244 = dma.done.wait (%p8229_p11), [#allocation27], 32  }
 0x63d   : > { %10246 = vsyncadd (%p8229_p11), [#allocation27], 4294967264 }
 0x63e   : > { %10248 = dma.done.wait (%p8229_p11), [#allocation30], 32  }
 0x63f   : > { %10250 = vsyncadd (%p8229_p11), [#allocation30], 4294967264 }
 0x640   : > { %10252 = dma.done.wait (%p8229_p11), [#allocation33], 32  }
 0x641   : > { %10254 = vsyncadd (%p8229_p11), [#allocation33], 4294967264 }
 0x642   : > { %10256 = dma.done.wait (%p8229_p11), [#allocation36], 3072  }
 0x643   : > { %10258 = vsyncadd (%p8229_p11), [#allocation36], 4294964224 }
 0x644   : > { %10260 = dma.done.wait (%p8229_p11), [#allocation39], 2048  }
 0x645   : > { %10262 = vsyncadd (%p8229_p11), [#allocation39], 4294965248 }
 0x646   : > { %10264 = dma.done.wait (%p8229_p11), [#allocation42], 1040  }
 0x647   : > { %10266 = vsyncadd (%p8229_p11), [#allocation42], 4294966256 }
 0x648   : > { %10268 = dma.done.wait (%p8229_p11), [#allocation45], 32  }
 0x649   : > { %10270 = vsyncadd (%p8229_p11), [#allocation45], 4294967264 }
 0x64a   : > { %10272 = dma.done.wait (%p8229_p11), [#allocation48], 1040  }
 0x64b   : > { %10274 = vsyncadd (%p8229_p11), [#allocation48], 4294966256 }
 0x64c   : > { %10276 = dma.done.wait (%p8229_p11), [#allocation51], 32  }
 0x64d   : > { %10278 = vsyncadd (%p8229_p11), [#allocation51], 4294967264 }
 0x64e   : > { %10280 = dma.done.wait (%p8229_p11), [#allocation54], 32  }
 0x64f   : > { %10282 = vsyncadd (%p8229_p11), [#allocation54], 4294967264 }
 0x650   : > { %10284 = dma.done.wait (%p8229_p11), [#allocation57], 1040  }
 0x651   : > { %10286 = vsyncadd (%p8229_p11), [#allocation57], 4294966256 }
 0x652   : > { %10288 = dma.done.wait (%p8229_p11), [#allocation60], 32  }
 0x653   : > { %10290 = vsyncadd (%p8229_p11), [#allocation60], 4294967264 }
 0x654   : > { %10292 = dma.done.wait (%p8229_p11), [#allocation63], 64  }
 0x655   : > { %10294 = vsyncadd (%p8229_p11), [#allocation63], 4294967232 }
 0x656   : > { %10296 = dma.done.wait (%p8229_p11), [#allocation66], 32  }
 0x657   : > { %10298 = vsyncadd (%p8229_p11), [#allocation66], 4294967264 }
 0x658   : > { %10300 = dma.done.wait (%p8229_p11), [#allocation69], 1040  }
 0x659   : > { %10302 = vsyncadd (%p8229_p11), [#allocation69], 4294966256 }
 0x65a   : > { %10304 = dma.done.wait (%p8229_p11), [#allocation72], 2048  }
 0x65b   : > { %10306 = vsyncadd (%p8229_p11), [#allocation72], 4294965248 }
 0x65c   : > { %10308 = dma.done.wait (%p8229_p11), [#allocation75], 32  }
 0x65d   : > { %10310 = vsyncadd (%p8229_p11), [#allocation75], 4294967264 }
 0x65e   : > { %10312 = dma.done.wait (%p8229_p11), [#allocation78], 1040  }
 0x65f   : > { %10314 = vsyncadd (%p8229_p11), [#allocation78], 4294966256 }
 0x660   : > { %10316 = dma.done.wait (%p8229_p11), [#allocation81], 32  }
 0x661   : > { %10318 = vsyncadd (%p8229_p11), [#allocation81], 4294967264 }
 0x662   : > { %10320 = dma.done.wait (%p8229_p11), [#allocation84], 1040  }
 0x663   : > { %10322 = vsyncadd (%p8229_p11), [#allocation84], 4294966256 }
 0x664   : > { %10324 = dma.done.wait (%p8229_p11), [#allocation87], 2048  }
 0x665   : > { %10326 = vsyncadd (%p8229_p11), [#allocation87], 4294965248  ;;  %s12421_s26 = sld [smem:[#allocation120_spill]]  ;;  %p2624_p9 = scmp.lt.s32.totalorder %s10831_s7, 1  ;;  %v10473_v0 = vmov 0   ;;  %v10474_v1 = vmov 0.0|0.0   ;;  %v2651_v28 = vlaneseq }
 0x666   : > { %8450 = vset.pattern.permute.xlu0 %v10473_v0  ;;  %7883 = vmatprep.subr.bf16.mxu0 %v10474_v1  ;;  %v10475_v2 = vmov 0.0   ;;  %v2633_v4 = vld [vmem:[#allocation86] sm:$0xff]  ;;  %v2634_v5 = vld [vmem:[#allocation86 + $0x8] sm:$0xff]  ;;  %v2635_v7 = vld [vmem:[#allocation86 + $0x10] sm:$0xff]  ;;  %vm10476_vm0 = vmmov 0   ;;  %s12422_s5 = sld [smem:[#allocation119_spill]] }
 0x667   : > { %s11707_s15 = scalar_select %p2624_p9, %s10831_s7, 1  ;;  %7436 = vmatprep.subr.bf16.mxu1 %v10475_v2  ;;  %v11714_v6 = vpack.c.bf16 %v2634_v5, %v2633_v4  ;;  %v2636_v8 = vld [vmem:[#allocation86 + $0x18] sm:$0xff]  ;;  %7433 = vmatprep.mubr.msk.f32.mxu0 %vm10476_vm0, %v10475_v2  ;;  %v2637_v10 = vld [vmem:[#allocation86 + $0x20] sm:$0xff]  ;;  %v2638_v11 = vld [vmem:[#allocation86 + $0x28] sm:$0xff]  ;;  %v11750_v29 = vand.u32 127, %v2651_v28  ;;  %v10477_v31 = vmov 1.0  }
 0x668   : > { %7452 = vmatprep.mubr.msk.bf16.mxu1 %vm10476_vm0, %v10475_v2  ;;  %v11721_v9 = vpack.c.bf16 %v2636_v8, %v2635_v7  ;;  %v2639_v12 = vld [vmem:[#allocation86 + $0x30] sm:$0xff]  ;;  %v2640_v13 = vld [vmem:[#allocation86 + $0x38] sm:$0xff]  ;;  %v11725_v14 = vpack.c.bf16 %v2638_v11, %v2637_v10  ;;  %v2641_v15 = vld [vmem:[#allocation86 + $0x40] sm:$0xff]  ;;  %s12423_s14 = sld [smem:[#allocation166_spill]]  ;;  %vm3290_vm3 = vcmask 1043456   ;;  %vm3262_vm4 = vcmask 64512  }
 0x669   : > { %s6953_s1 = sshll.u32 %s11707_s15, 3  ;;  %7885 = vmatpush3.bf16.msra.mxu0 %v11714_v6  ;;  %v2642_v16 = vld [vmem:[#allocation86 + $0x48] sm:$0xff]  ;;  %v11729_v17 = vpack.c.bf16 %v2640_v13, %v2639_v12  ;;  %v2643_v18 = vld [vmem:[#allocation86 + $0x50] sm:$0xff]  ;;  %v2644_v19 = vld [vmem:[#allocation86 + $0x58] sm:$0xff]  ;;  %vm2731_vm2 = vcmp.lt.s32.totalorder %v11750_v29, 32  ;;  %s12424_s4 = sld [smem:[#allocation158_spill]] }
 0x66a   : > { %7886 = vmatprep.subr.bf16.mxu0 %v10474_v1  ;;  %v11733_v20 = vpack.c.bf16 %v2642_v16, %v2641_v15  ;;  %v2645_v21 = vld [vmem:[#allocation86 + $0x60] sm:$0xff]  ;;  %v2646_v22 = vld [vmem:[#allocation86 + $0x68] sm:$0xff]  ;;  %v11737_v23 = vpack.c.bf16 %v2644_v19, %v2643_v18  ;;  %v2647_v24 = vld [vmem:[#allocation86 + $0x70] sm:$0xff]  ;;  %v11765_v41 = vsel %vm2731_vm2, 1.0, %v10475_v2  ;;  %s12425_s17 = sld [smem:[#allocation124_spill]]  ;;  %s12426_s16 = sld [smem:[#allocation125_spill]] }
 0x66b   : > { %s2631_s12 = scalar_lea.vmem %s12421_s26, %s6953_s1  ;;  %v2648_v25 = vld [vmem:[#allocation86 + $0x78] sm:$0xff]  ;;  %v11741_v26 = vpack.c.bf16 %v2646_v22, %v2645_v21  ;;  %v11755_v32 = vld [vmem:[#allocation2] sm:$0xff]  ;;  %v8453_v45 = vld [vmem:[#allocation79 + $0x10] sm:$0xff]   ;;  %s12427_s10 = sld [smem:[#allocation136_spill]] }
 0x66c   : > { %v2650_v3 = vld [vmem:[%s2631_s12] sm:$0xff]  ;;  %v11745_v27 = vpack.c.bf16 %v2648_v25, %v2647_v24  ;;  %s2627_s6 = scalar_lea.vmem %s12422_s5, %s6953_s1  ;;  %v8451_v37 = vld [vmem:[#allocation79] sm:$0xff]   ;;  %v8454_v46 = vld [vmem:[#allocation79 + $0x18] sm:$0xff]   ;;  %s2621_s11 = sand.u32 1, %s10337_s28  }
 0x66d   : > { %2654 = vperm.xlu0 %8450, %v2650_v3   ;;  %7888 = vmatpush3.bf16.msra.mxu0 %v11721_v9  ;;  %v3894_v36 = vld [vmem:[%s2627_s6] sm:$0xff]  ;;  %v8455_v47 = vld [vmem:[#allocation79 + $0x20] sm:$0xff]   ;;  %v8457_v49 = vld [vmem:[#allocation79 + $0x30] sm:$0xff]   ;;  %s6952_s26 = sshll.u32 %s2621_s11, 3  ;;  %s7187_s12 = sshll.u32 %s10831_s7, 7 }
 0x66e   : > { %7889 = vmatprep.subr.bf16.mxu0 %v10474_v1  ;;  %7437 = vmatpush3.bf16.msra.mxu1 %v8451_v37  ;;  %v8452_v38 = vld [vmem:[#allocation79 + $0x8] sm:$0xff]   ;;  %v8458_v50 = vld [vmem:[#allocation79 + $0x38] sm:$0xff]   ;;  %v8465_v11 = vld [vmem:[%s12423_s14 + $0x1c] ss:$12 sps:$4 sm:$0xff]   ;;  %s2623_s15 = scalar_lea.vmem [#allocation88], %s6952_s26  ;;  %s12168_s5 = scalar_lea.hbm %s10808_s13, %s7187_s12 }
 0x66f   : > { %7438 = vmatprep.subr.bf16.mxu1 %v10475_v2  ;;  %v8456_v48 = vld [vmem:[#allocation79 + $0x28] sm:$0xff]   ;;  %v6958_v55 = vld [vmem:[#allocation77] ss:$0 sm:$0xff]  ;;  %v6959_v57 = vld [vmem:[#allocation74] ss:$0 sm:$0xff]  ;;  %s6166_s1 = sshll.u32 %s2623_s15, 4  ;;  %s12165_s1 = int_to_ptr.vmem [resolvable:$true] %s6166_s1 }
 0x670   : > { %v6960_v61 = vld [vmem:[#allocation76] ss:$0 sm:$0xff]  ;;  %v8459_v7 = vld [vmem:[%s12423_s14] ss:$12 sps:$4 sm:$0xff]   ;;  %v8461_v8 = vld [vmem:[%s12423_s14 + $0x4] ss:$12 sps:$4 sm:$0xff]  }
 0x671   : > { %7891 = vmatpush3.bf16.msra.mxu0 %v11725_v14  ;;  %v8462_v10 = vld [vmem:[%s12423_s14 + $0x8] ss:$12 sps:$4 sm:$0xff]   ;;  %v8466_v12 = vld [vmem:[%s12423_s14 + $0x20] ss:$12 sps:$4 sm:$0xff]   ;;  %v8463_v13 = vld [vmem:[%s12423_s14 + $0x18] ss:$12 sps:$4 sm:$0xff]  }
 0x672   : > { %7892 = vmatprep.subr.bf16.mxu0 %v10474_v1  ;;  %7439 = vmatpush3.bf16.msra.mxu1 %v8452_v38  ;;  %v8469_v15 = vld [vmem:[%s12423_s14 + $0x34] ss:$12 sps:$4 sm:$0xff]   ;;  %v8467_v16 = vld [vmem:[%s12423_s14 + $0x30] ss:$12 sps:$4 sm:$0xff]   ;;  %v8470_v25 = vld [vmem:[%s12423_s14 + $0x38] ss:$12 sps:$4 sm:$0xff]  }
 0x673   : > { %7440 = vmatprep.subr.bf16.mxu1 %v10475_v2  ;;  %v8478_v37 = vld [vmem:[%s12423_s14 + $0x68] ss:$12 sps:$4 sm:$0xff]   ;;  %s6153_s6 = scalar_lea.sflag [#allocation4], %s2621_s11  ;;  %p12428_p12 = scmp.ne.s32.totalorder %s12373_s22, 0 }
 0x674   : > { %v8481_v38 = vld [vmem:[%s12423_s14 + $0x7c] ss:$12 sps:$4 sm:$0xff]   ;;  %s10479_s26 = smov [#allocation88]  }
 0x675   : > { %7894 = vmatpush3.bf16.msra.mxu0 %v11729_v17  ;;  %s10171_s3 = sshll.u32 %s10479_s26, 4  ;;  %s10172_s3 = int_to_ptr.vmem [resolvable:$false] %s10171_s3 }
 0x676   : > { %7895 = vmatprep.subr.bf16.mxu0 %v10474_v1  ;;  %7441 = vmatpush3.bf16.msra.mxu1 %v8453_v45  ;;  %v8489_v45 = vld [vmem:[%s12423_s14 + $0xac] ss:$12 sps:$4 sm:$0xff]   ;;  %s10173_s7 = scalar_lea.vmem %s10172_s3, 256  ;;  %p10174_p1 = scmp.lt.s32.totalorder %s12165_s1, %s10172_s3 }
 0x677   : > { %7442 = vmatprep.subr.bf16.mxu1 %v10475_v2 }
 0x679   : > { %7897 = vmatpush3.bf16.msra.mxu0 %v11733_v20 }
 0x67a   : > { %7898 = vmatprep.subr.bf16.mxu0 %v10474_v1  ;;  %7443 = vmatpush3.bf16.msra.mxu1 %v8454_v46  ;;  %v8487_v46 = vld [vmem:[%s12423_s14 + $0xa8] ss:$12 sps:$4 sm:$0xff]  }
 0x67b   : > { %7444 = vmatprep.subr.bf16.mxu1 %v10475_v2 }
 0x67d   : > { %7900 = vmatpush3.bf16.msra.mxu0 %v11737_v23 }
 0x67e   : > { %7901 = vmatprep.subr.bf16.mxu0 %v10474_v1  ;;  %7445 = vmatpush3.bf16.msra.mxu1 %v8455_v47  ;;  %v8490_v47 = vld [vmem:[%s12423_s14 + $0xb0] ss:$12 sps:$4 sm:$0xff]  }
 0x67f   : > { %7446 = vmatprep.subr.bf16.mxu1 %v10475_v2 }
 0x681   : > { %7903 = vmatpush3.bf16.msra.mxu0 %v11741_v26 }
 0x682   : > { %7904 = vmatprep.subr.bf16.mxu0 %v10474_v1  ;;  %7447 = vmatpush3.bf16.msra.mxu1 %v8456_v48 }
 0x683   : > { %7448 = vmatprep.subr.bf16.mxu1 %v10475_v2 }
 0x685   : > { %7906 = vmatpush3.bf16.msra.mxu0 %v11745_v27 }
 0x686   : > { %7449 = vmatpush3.bf16.msra.mxu1 %v8457_v49  ;;  %3078 = vmatprep.subr.bf16.mxu0 %v8461_v8 }
 0x687   : > { %7450 = vmatprep.subr.bf16.mxu1 %v10475_v2 }
 0x68a   : > { %7451 = vmatpush3.bf16.msra.mxu1 %v8458_v50 }
 0x68b   : > { %7456 = vmatprep.subr.bf16.mxu1 %v10475_v2 }
 0x6ec   : > { %v2655_v30 = vpop.permute.xlu0 %2654 }
 0x6ed   : > { %vm2656_vm1 = vcmp.eq.s32.totalorder %v11750_v29, %v2655_v30  ;;  %v8473_v30 = vld [vmem:[%s12423_s14 + $0x4c] ss:$12 sps:$4 sm:$0xff]  }
 0x6ee   : > { %7434 = vmatmul.mubr.msk.f32.vlgmr.msra.gmra.mrb[0].mxu0 %vm2656_vm1, %v10477_v31 }
 0x6ef   : > { %3110 = vmatprep.mubr.bf16.mxu0 %v10473_v0  ;;  %3079 = vmatpush1.bf16.msra.mxu0 %v8459_v7 }
 0x6f0   : > { %3080 = vmatprep.subr.bf16.mxu0 %v8465_v11 }
 0x6f3   : > { %3081 = vmatpush1.bf16.msra.mxu0 %v8463_v13 }
 0x6f4   : > { %3082 = vmatprep.subr.bf16.mxu0 %v8469_v15 }
 0x6f7   : > { %3083 = vmatpush1.bf16.msra.mxu0 %v8467_v16 }
 0x6f8   : > { %3084 = vmatprep.subr.bf16.mxu0 %v8473_v30 }
 0x7c1   : > { %v2725_v33 = vpop.f32.mrb[0].mxu0 }
 0x7c2   : > { %v2726_v34 = vadd.f32 %v2725_v33, %v11755_v32  ;;  %v7435_v35 = vpop.f32.mrb[1].mxu0  ;;  %v8471_v33 = vld [vmem:[%s12423_s14 + $0x48] ss:$12 sps:$4 sm:$0xff]  }
 0x7c3   : > { %3085 = vmatpush1.bf16.msra.mxu0 %v8471_v33  ;;  %v8475_v35 = vld [vmem:[%s12423_s14 + $0x60] ss:$12 sps:$4 sm:$0xff]  }
 0x7c4   : > { %2734 = vadd.xlane.f32.xlu0 %v2726_v34 }
 0x7da   : > { %3896 = vperm.xlu0 %8450, %v3894_v36   ;;  %v8477_v36 = vld [vmem:[%s12423_s14 + $0x64] ss:$12 sps:$4 sm:$0xff]  }
 0x7db   : > { %3086 = vmatprep.subr.bf16.mxu0 %v8477_v36 }
 0x7dc   : > { %3087 = vmatpush1.bf16.msra.mxu0 %v8475_v35 }
 0x7dd   : > { %3088 = vmatprep.subr.bf16.mxu0 %v8481_v38 }
 0x851   : > { %v2735_v39 = vpop.xlane.xlu0 %2734 }
 0x852   : > { %v2736_v40 = vmul.f32 0.03125, %v2735_v39  ;;  %v8479_v39 = vld [vmem:[%s12423_s14 + $0x78] ss:$12 sps:$4 sm:$0xff]  }
 0x853   : > { %3089 = vmatpush1.bf16.msra.mxu0 %v8479_v39 }
 0x854   : > { %v2737_v42 = vsub.f32 %v2726_v34, %v2736_v40  ;;  %v8474_v34 = vld [vmem:[%s12423_s14 + $0x50] ss:$12 sps:$4 sm:$0xff]   ;;  %v8482_v40 = vld [vmem:[%s12423_s14 + $0x80] ss:$12 sps:$4 sm:$0xff]  }
 0x856   : > { %v2738_v43 = vmul.f32 %v11765_v41, %v2737_v42  ;;  %v8485_v42 = vld [vmem:[%s12423_s14 + $0x94] ss:$12 sps:$4 sm:$0xff]  }
 0x857   : > { %3090 = vmatprep.subr.bf16.mxu0 %v8485_v42 }
 0x858   : > { %v2739_v44 = vmul.f32 %v2738_v43, %v2738_v43 }
 0x85a   : > { %2740 = vadd.xlane.f32.xlu1 %v2739_v44  ;;  %v8486_v44 = vld [vmem:[%s12423_s14 + $0x98] ss:$12 sps:$4 sm:$0xff]  }
 0x8e7   : > { %v2741_v51 = vpop.xlane.xlu1 %2740 }
 0x8e8   : > { %v2742_v52 = vmul.f32 0.03125, %v2741_v51 }
 0x8ea   : > { %v2743_v53 = vadd.f32 1e-05, %v2742_v52  ;;  %v6969_v52 = vld [vmem:[#allocation65] ss:$0 sm:$0xff] }
 0x8ec   : > { %8659 = vrsqrt.f32 %v2743_v53 }
 0x8f6   : > { %v8660_v54 = vpop.eup %8659 }
 0x8f7   : > { %v2745_v56 = vmul.f32 %v8660_v54, %v2738_v43  ;;  %v8483_v43 = vld [vmem:[%s12423_s14 + $0x90] ss:$12 sps:$4 sm:$0xff]   ;;  %v6970_v54 = vld [vmem:[#allocation64] ss:$0 sm:$0xff] }
 0x8f8   : > { %3091 = vmatpush1.bf16.msra.mxu0 %v8483_v43 }
 0x8f9   : > { %v2752_v58 = vmul.f32 %v6958_v55, %v2745_v56  ;;  %3092 = vmatprep.subr.bf16.mxu0 %v8489_v45 }
 0x8fb   : > { %v2759_v59 = vadd.f32 %v6959_v57, %v2752_v58  ;;  %v11819_v58 = vshrl.u32 %v2651_v28, 7 }
 0x8fc   : > { %3093 = vmatpush1.bf16.msra.mxu0 %v8487_v46 }
 0x8fd   : > { %v2776_v60 = vpack.c.bf16 %v2759_v59, %v2759_v59  ;;  %7476 = vmatprep.subr.bf16.mxu0 %v10475_v2  ;;  %v2945_v59 = vsub.s32 2, %v11819_v58  ;;  %vm4423_vm6 = vcmp.le.s32.totalorder %v11750_v29, %v11819_v58 }
 0x8ff   : > { %7453 = vmatmul.mubr.bf16.vlgmr.msra.gmra.mrb[0].mxu1 %v2776_v60  ;;  %v2933_v60 = vld [vmem:[#allocation62] sm:$0x7] }
 0x900   : > { %7472 = vmatprep.mubr.msk.bf16.mxu1 %vm10476_vm0, %v10475_v2  ;;  %7457 = vmatpush3.bf16.msra.mxu1 %v8462_v10  ;;  %v11831_v10 = vsub.s32 0, %v11819_v58 }
 0x901   : > { %7458 = vmatprep.subr.bf16.mxu1 %v10475_v2 }
 0x904   : > { %7459 = vmatpush3.bf16.msra.mxu1 %v8466_v12 }
 0x905   : > { %7460 = vmatprep.subr.bf16.mxu1 %v10475_v2 }
 0x908   : > { %7461 = vmatpush3.bf16.msra.mxu1 %v8470_v25 }
 0x909   : > { %7462 = vmatprep.subr.bf16.mxu1 %v10475_v2 }
 0x90c   : > { %7463 = vmatpush3.bf16.msra.mxu1 %v8474_v34  ;;  %v2938_v34 = vrot.slane %v2933_v60, %v11831_v10 }
 0x90d   : > { %7464 = vmatprep.subr.bf16.mxu1 %v10475_v2 }
 0x910   : > { %7465 = vmatpush3.bf16.msra.mxu1 %v8478_v37 }
 0x911   : > { %7466 = vmatprep.subr.bf16.mxu1 %v10475_v2 }
 0x914   : > { %7467 = vmatpush3.bf16.msra.mxu1 %v8482_v40 }
 0x915   : > { %7468 = vmatprep.subr.bf16.mxu1 %v10475_v2 }
 0x918   : > { %7469 = vmatpush3.bf16.msra.mxu1 %v8486_v44 }
 0x919   : > { %7470 = vmatprep.subr.bf16.mxu1 %v10475_v2 }
 0x91c   : > { %7471 = vmatpush3.bf16.msra.mxu1 %v8490_v47 }
 0x91d   : > { %7500 = vmatprep.subr.bf16.mxu1 %v10475_v2 }
 0x9d2   : > { %v2866_v62 = vpop.f32.mrb[0].mxu1 }
 0x9d3   : > { %v11776_v63 = vadd.f32 %v6960_v61, %v2866_v62  ;;  %v7454_v3 = vpop.f32.mrb[1].mxu1  ;;  %v3160_v61 = vld [vmem:[%s12424_s4 + $0x1] sm:$0x1]  ;;  %v11824_v62 = vsub.s32 1, %v11819_v58 }
 0x9d4   : > { %v2869_v4 = vpop.f32.mrb[2].mxu1  ;;  %v3159_v3 = vld [vmem:[%s12424_s4] sm:$0x1] }
 0x9d5   : > { %2874 = vadd.xlane.f32.xlu1 %v11776_v63  ;;  %v7455_v5 = vpop.f32.mrb[3].mxu1  ;;  %v2946_v4 = vrot.slane %v2933_v60, %v2945_v59  ;;  %v3165_v7 = vpack.i.b16 %v3159_v3, %v3159_v3  ;;  %v2942_v8 = vrot.slane %v2933_v60, %v11824_v62 }
 0x9d6   : > { %v3172_v5 = vpack.i.b16 %v3160_v61, %v3160_v61 }
 0x9d8   : > { %v11834_v13 = vrot.slane %v3172_v5, %v11831_v10 }
 0xa62   : > { %v2875_v18 = vpop.xlane.xlu1 %2874 }
 0xa63   : > { %v2876_v19 = vmul.f32 0.03125, %v2875_v18  ;;  %v3170_v18 = vrot.slane %v3165_v7, %v11831_v10  ;;  %v8491_v7 = vld [vmem:[#allocation73] sm:$0xff]  }
 0xa65   : > { %v2877_v21 = vsub.f32 %v11776_v63, %v2876_v19 }
 0xa67   : > { %v2878_v22 = vmul.f32 %v11765_v41, %v2877_v21 }
 0xa69   : > { %v2879_v24 = vmul.f32 %v2878_v22, %v2878_v22 }
 0xa6b   : > { %2880 = vadd.xlane.f32.xlu1 %v2879_v24 }
 0xaf8   : > { %v2881_v48 = vpop.xlane.xlu1 %2880 }
 0xaf9   : > { %v2882_v49 = vmul.f32 0.03125, %v2881_v48 }
 0xafb   : > { %v2883_v50 = vadd.f32 1e-05, %v2882_v49 }
 0xafd   : > { %8661 = vrsqrt.f32 %v2883_v50 }
 0xb07   : > { %v8662_v51 = vpop.eup %8661 }
 0xb08   : > { %v2885_v53 = vmul.f32 %v8662_v51, %v2878_v22 }
 0xb0a   : > { %v2892_v55 = vmul.f32 %v6969_v52, %v2885_v53 }
 0xb0c   : > { %v2899_v56 = vadd.f32 %v6970_v54, %v2892_v55 }
 0xb0e   : > { %v2932_v57 = vpack.c.bf16 %v2899_v56, %v2899_v56 }
 0xb10   : > { %3111 = vmatmul.mubr.bf16.vlgmr.msra.gmra.mrb[4].mxu0 %v2932_v57  ;;  %7473 = vmatmul.mubr.bf16.vlgmr.msra.gmra.mrb[4].mxu1 %v2932_v57 }
 0xb11   : > { %7478 = vmatprep.mubr.msk.bf16.mxu0 %vm10476_vm0, %v10475_v2  ;;  %7516 = vmatprep.mubr.msk.bf16.mxu1 %vm10476_vm0, %v10475_v2 }
 0xb12   : > { %7501 = vmatpush3.bf16.msra.mxu1 %v8491_v7 }
 0xb13   : > { %7502 = vmatprep.subr.bf16.mxu1 %v10475_v2 }
 0xbe3   : > { %v3112_v28 = vpop.f32.mrb[4].mxu0  ;;  %v3153_v11 = vpop.f32.mrb[4].mxu1 }
 0xbe4   : > { %v3154_v12 = vadd.f32 %v3153_v11, %v2946_v4  ;;  %v3114_v15 = vpop.f32.mrb[5].mxu0  ;;  %v7474_v16 = vpop.f32.mrb[5].mxu1  ;;  %v3113_v37 = vadd.f32 %v3112_v28, %v2938_v34  ;;  %v8493_v28 = vld [vmem:[#allocation73 + $0x10] sm:$0xff]   ;;  %v8494_v11 = vld [vmem:[#allocation73 + $0x18] sm:$0xff]  }
 0xbe5   : > { %v3115_v19 = vadd.f32 %v3114_v15, %v2942_v8  ;;  %v3116_v21 = vpop.f32.mrb[6].mxu0  ;;  %v3156_v22 = vpop.f32.mrb[6].mxu1  ;;  %v8492_v8 = vld [vmem:[#allocation73 + $0x8] sm:$0xff]   ;;  %v8497_v16 = vld [vmem:[#allocation73 + $0x30] sm:$0xff]  }
 0xbe6   : > { %v11837_v24 = vpack.c.bf16 %v3154_v12, %v3154_v12  ;;  %v3117_v25 = vpop.f32.mrb[7].mxu0  ;;  %v7475_v30 = vpop.f32.mrb[7].mxu1  ;;  %v3161_v38 = vpack.c.bf16 %v3113_v37, %v3113_v37  ;;  %7503 = vmatpush3.bf16.msra.mxu1 %v8492_v8  ;;  %v8495_v12 = vld [vmem:[#allocation73 + $0x20] sm:$0xff]   ;;  %v8496_v15 = vld [vmem:[#allocation73 + $0x28] sm:$0xff]   ;;  %v8498_v37 = vld [vmem:[#allocation73 + $0x38] sm:$0xff]  }
 0xbe7   : > { %v3162_v33 = vpack.c.bf16 %v3115_v19, %v3115_v19  ;;  %7504 = vmatprep.subr.bf16.mxu1 %v10475_v2 }
 0xbe8   : > { %v3181_v35 = vmul.bf16 %v11834_v13, %v11837_v24  ;;  %v3180_v40 = vmul.bf16 %v3170_v18, %v11837_v24 }
 0xbe9   : > { %v3178_v36 = vmul.bf16 %v3170_v18, %v3162_v33  ;;  %v3179_v39 = vmul.bf16 %v11834_v13, %v3162_v33 }
 0xbea   : > { %v3292_v42 = vsel %vm3290_vm3, %v3180_v40, 0  ;;  %7505 = vmatpush3.bf16.msra.mxu1 %v8493_v28  ;;  %v3338_v30 = vsel %vm3290_vm3, %v3181_v35, 0 }
 0xbeb   : > { %7477 = vmatpush3.bf16.xpose.msra.mxu0 %v3178_v36  ;;  %7506 = vmatprep.subr.bf16.mxu1 %v10475_v2 }
 0xbec   : > { %7482 = vmatprep.subr.bf16.mxu0 %v10475_v2 }
 0xbee   : > { %7507 = vmatpush3.bf16.msra.mxu1 %v8494_v11 }
 0xbef   : > { %7508 = vmatprep.subr.bf16.mxu1 %v10475_v2 }
 0xbf2   : > { %7479 = vmatmul.mubr.bf16.vlgmr.msra.gmra.mrb[8].mxu0 %v3161_v38  ;;  %7509 = vmatpush3.bf16.msra.mxu1 %v8495_v12  ;;  %v7006_v12 = vld [vmem:[#allocation68] ss:$0 sm:$0xff] }
 0xbf3   : > { %7483 = vmatpush3.bf16.xpose.msra.mxu0 %v3179_v39  ;;  %7484 = vmatprep.mubr.msk.bf16.mxu0 %vm10476_vm0, %v10475_v2 }
 0xbf4   : > { %7488 = vmatprep.subr.bf16.mxu0 %v10475_v2  ;;  %7510 = vmatprep.subr.bf16.mxu1 %v10475_v2 }
 0xbf6   : > { %7511 = vmatpush3.bf16.msra.mxu1 %v8496_v15 }
 0xbf7   : > { %7512 = vmatprep.subr.bf16.mxu1 %v10475_v2 }
 0xbfa   : > { %7485 = vmatmul.mubr.bf16.vlgmr.msra.gmra.mrb[12].mxu0 %v3161_v38  ;;  %7513 = vmatpush3.bf16.msra.mxu1 %v8497_v16  ;;  %v7007_v16 = vld [vmem:[#allocation67] ss:$0 sm:$0xff] }
 0xbfb   : > { %7489 = vmatpush3.bf16.msra.mxu0 %v3292_v42  ;;  %7490 = vmatprep.mubr.msk.bf16.mxu0 %vm10476_vm0, %v10475_v2  ;;  %v7005_v42 = vld [vmem:[#allocation61] ss:$0 sm:$0xff] }
 0xbfc   : > { %7494 = vmatprep.subr.bf16.mxu0 %v10475_v2  ;;  %7514 = vmatprep.subr.bf16.mxu1 %v10475_v2 }
 0xbfe   : > { %7515 = vmatpush3.bf16.msra.mxu1 %v8498_v37 }
 0xbff   : > { %7540 = vmatprep.subr.bf16.mxu1 %v10475_v2 }
 0xcc5   : > { %v3216_v43 = vpop.f32.mrb[8].mxu0 }
 0xcc6   : > { %v7480_v44 = vpop.f32.mrb[9].mxu0  ;;  %v3263_v45 = vsel %vm3262_vm4, %v3216_v43, -inf }
 0xcc7   : > { %3264 = vmax.xlane.f32.xlu1 %v3263_v45  ;;  %v3219_v46 = vpop.f32.mrb[10].mxu0 }
 0xcc8   : > { %v7481_v47 = vpop.f32.mrb[11].mxu0 }
 0xccd   : > { %v3256_v48 = vpop.f32.mrb[12].mxu0 }
 0xcce   : > { %v7486_v49 = vpop.f32.mrb[13].mxu0  ;;  %v3266_v50 = vsel %vm3262_vm4, %v3256_v48, -inf }
 0xccf   : > { %3267 = vmax.xlane.f32.xlu1 %v3266_v50  ;;  %v3259_v51 = vpop.f32.mrb[14].mxu0  ;;  %v8500_v49 = vld [vmem:[#allocation70 + $0x8] sm:$0xff]  }
 0xcd0   : > { %v7487_v52 = vpop.f32.mrb[15].mxu0 }
 0xd54   : > { %v3265_v53 = vpop.xlane.xlu1 %3264 }
 0xd55   : > { %v3269_v54 = vsub.f32 %v3216_v43, %v3265_v53 }
 0xd57   : > { %v3271_v55 = vmul.f32 1.442695, %v3269_v54  ;;  %v8501_v54 = vld [vmem:[#allocation70 + $0x10] sm:$0xff]  }
 0xd59   : > { %8663 = vpow2.f32 %v3271_v55  ;;  %v8502_v55 = vld [vmem:[#allocation70 + $0x18] sm:$0xff]  }
 0xd5c   : > { %v3268_v56 = vpop.xlane.xlu1 %3267 }
 0xd5d   : > { %v3270_v57 = vsub.f32 %v3256_v48, %v3268_v56  ;;  %v8499_v48 = vld [vmem:[#allocation70] sm:$0xff]  }
 0xd5e   : > { %v8503_v56 = vld [vmem:[#allocation70 + $0x20] sm:$0xff]  }
 0xd5f   : > { %v3273_v60 = vmul.f32 1.442695, %v3270_v57  ;;  %v8504_v57 = vld [vmem:[#allocation70 + $0x28] sm:$0xff]  }
 0xd61   : > { %8665 = vpow2.f32 %v3273_v60  ;;  %v8505_v60 = vld [vmem:[#allocation70 + $0x30] sm:$0xff]  }
 0xd63   : > { %v8664_v61 = vpop.eup %8663 }
 0xd64   : > { %v3275_v3 = vsel %vm3262_vm4, %v8664_v61, 0.0 }
 0xd65   : > { %3276 = vadd.xlane.f32.xlu1 %v3275_v3  ;;  %v8507_v3 = vld [vmem:[#allocation71] sm:$0xff]  }
 0xd6b   : > { %v8666_v4 = vpop.eup %8665 }
 0xd6c   : > { %v3278_v5 = vsel %vm3262_vm4, %v8666_v4, 0.0 }
 0xd6d   : > { %3279 = vadd.xlane.f32.xlu1 %v3278_v5  ;;  %v8509_v5 = vld [vmem:[#allocation71 + $0x10] sm:$0xff]  }
 0xdf2   : > { %v3277_v18 = vpop.xlane.xlu1 %3276 }
 0xdf3   : > { %8667 = vrcp.f32 %v3277_v18 }
 0xdfa   : > { %v3280_v19 = vpop.xlane.xlu1 %3279 }
 0xdfb   : > { %8669 = vrcp.f32 %v3280_v19 }
 0xdfd   : > { %v8668_v21 = vpop.eup %8667 }
 0xdfe   : > { %v3282_v22 = vmul.f32 %v8668_v21, %v8664_v61  ;;  %v8506_v61 = vld [vmem:[#allocation70 + $0x38] sm:$0xff]  }
 0xe00   : > { %v3285_v25 = vpack.c.bf16 %v3282_v22, %v3282_v22  ;;  %v8510_v22 = vld [vmem:[#allocation71 + $0x18] sm:$0xff]  }
 0xe02   : > { %7491 = vmatmul.mubr.msk.bf16.vlgmr.msra.gmra.mrb[16].mxu0 %vm3262_vm4, %v3285_v25  ;;  %v8511_v25 = vld [vmem:[#allocation71 + $0x20] sm:$0xff]  }
 0xe03   : > { %7495 = vmatpush3.bf16.msra.mxu0 %v3338_v30  ;;  %7496 = vmatprep.mubr.msk.bf16.mxu0 %vm10476_vm0, %v10475_v2  ;;  %v8512_v30 = vld [vmem:[#allocation71 + $0x28] sm:$0xff]  }
 0xe04   : > { %7520 = vmatprep.subr.bf16.mxu0 %v10475_v2 }
 0xe05   : > { %v8670_v33 = vpop.eup %8669 }
 0xe06   : > { %v3284_v34 = vmul.f32 %v8670_v33, %v8666_v4  ;;  %v8508_v4 = vld [vmem:[#allocation71 + $0x8] sm:$0xff]   ;;  %v8513_v33 = vld [vmem:[#allocation71 + $0x30] sm:$0xff]  }
 0xe08   : > { %v3286_v36 = vpack.c.bf16 %v3284_v34, %v3284_v34  ;;  %v8514_v34 = vld [vmem:[#allocation71 + $0x38] sm:$0xff]  }
 0xe0e   : > { %7497 = vmatmul.mubr.msk.bf16.vlgmr.msra.gmra.mrb[16].mxu0 %vm3262_vm4, %v3286_v36  ;;  %v7008_v36 = vld [vmem:[#allocation58] ss:$0 sm:$0xff] }
 0xe0f   : > { %7536 = vmatprep.mubr.msk.bf16.mxu0 %vm10476_vm0, %v10475_v2  ;;  %7521 = vmatpush3.bf16.msra.mxu0 %v8499_v48 }
 0xe10   : > { %7522 = vmatprep.subr.bf16.mxu0 %v10475_v2 }
 0xe13   : > { %7523 = vmatpush3.bf16.msra.mxu0 %v8500_v49  ;;  %v8516_v49 = vld [vmem:[%s10793_s9 + $0x8] sm:$0xff]  }
 0xe14   : > { %7524 = vmatprep.subr.bf16.mxu0 %v10475_v2 }
 0xe17   : > { %7525 = vmatpush3.bf16.msra.mxu0 %v8501_v54  ;;  %v8519_v54 = vld [vmem:[%s10793_s9 + $0x20] sm:$0xff]  }
 0xe18   : > { %7526 = vmatprep.subr.bf16.mxu0 %v10475_v2 }
 0xe1b   : > { %7527 = vmatpush3.bf16.msra.mxu0 %v8502_v55 }
 0xe1c   : > { %7528 = vmatprep.subr.bf16.mxu0 %v10475_v2 }
 0xe1f   : > { %7529 = vmatpush3.bf16.msra.mxu0 %v8503_v56 }
 0xe20   : > { %7530 = vmatprep.subr.bf16.mxu0 %v10475_v2 }
 0xe23   : > { %7531 = vmatpush3.bf16.msra.mxu0 %v8504_v57  ;;  %v8520_v57 = vld [vmem:[%s10793_s9 + $0x28] sm:$0xff]  }
 0xe24   : > { %7532 = vmatprep.subr.bf16.mxu0 %v10475_v2 }
 0xe27   : > { %7533 = vmatpush3.bf16.msra.mxu0 %v8505_v60 }
 0xe28   : > { %7534 = vmatprep.subr.bf16.mxu0 %v10475_v2 }
 0xe2b   : > { %7535 = vmatpush3.bf16.msra.mxu0 %v8506_v61 }
 0xe2c   : > { %7560 = vmatprep.subr.bf16.mxu0 %v10475_v2 }
 0xee1   : > { %v3374_v13 = vpop.f32.mrb[16].mxu0 }
 0xee2   : > { %v3397_v24 = vpack.c.bf16 %v3374_v13, %v3374_v13  ;;  %v7498_v35 = vpop.f32.mrb[17].mxu0 }
 0xee3   : > { %v3377_v38 = vpop.f32.mrb[18].mxu0 }
 0xee4   : > { %v7499_v39 = vpop.f32.mrb[19].mxu0  ;;  %7517 = vmatmul.mubr.bf16.vlgmr.msra.gmra.mrb[8].mxu1 %v3397_v24 }
 0xee5   : > { %7556 = vmatprep.mubr.msk.bf16.mxu1 %vm10476_vm0, %v10475_v2  ;;  %7541 = vmatpush3.bf16.msra.mxu1 %v8507_v3  ;;  %v8521_v3 = vld [vmem:[%s10793_s9 + $0x30] sm:$0xff]  }
 0xee6   : > { %7542 = vmatprep.subr.bf16.mxu1 %v10475_v2 }
 0xee9   : > { %7543 = vmatpush3.bf16.msra.mxu1 %v8508_v4 }
 0xeea   : > { %7544 = vmatprep.subr.bf16.mxu1 %v10475_v2 }
 0xeed   : > { %7545 = vmatpush3.bf16.msra.mxu1 %v8509_v5  ;;  %v8522_v5 = vld [vmem:[%s10793_s9 + $0x38] sm:$0xff]  }
 0xeee   : > { %7546 = vmatprep.subr.bf16.mxu1 %v10475_v2 }
 0xef1   : > { %7547 = vmatpush3.bf16.msra.mxu1 %v8510_v22 }
 0xef2   : > { %7548 = vmatprep.subr.bf16.mxu1 %v10475_v2 }
 0xef5   : > { %7549 = vmatpush3.bf16.msra.mxu1 %v8511_v25  ;;  %v8524_v25 = vld [vmem:[#allocation47 + $0x8] sm:$0xff]  }
 0xef6   : > { %7550 = vmatprep.subr.bf16.mxu1 %v10475_v2 }
 0xef9   : > { %7551 = vmatpush3.bf16.msra.mxu1 %v8512_v30  ;;  %v8525_v30 = vld [vmem:[#allocation47 + $0x10] sm:$0xff]  }
 0xefa   : > { %7552 = vmatprep.subr.bf16.mxu1 %v10475_v2 }
 0xefd   : > { %7553 = vmatpush3.bf16.msra.mxu1 %v8513_v33 }
 0xefe   : > { %7554 = vmatprep.subr.bf16.mxu1 %v10475_v2 }
 0xf01   : > { %7555 = vmatpush3.bf16.msra.mxu1 %v8514_v34 }
 0xf02   : > { %7907 = vmatprep.subr.bf16.mxu1 %v10474_v1 }
 0xfb7   : > { %v3480_v40 = vpop.f32.mrb[8].mxu1 }
 0xfb8   : > { %v3486_v43 = vadd.f32 %v3480_v40, %v11776_v63  ;;  %v7518_v44 = vpop.f32.mrb[9].mxu1 }
 0xfb9   : > { %v3483_v45 = vpop.f32.mrb[10].mxu1 }
 0xfba   : > { %v11878_v46 = vadd.f32 %v7005_v42, %v3486_v43  ;;  %v7519_v47 = vpop.f32.mrb[11].mxu1 }
 0xfbc   : > { %3497 = vadd.xlane.f32.xlu1 %v11878_v46 }
0x1049   : > { %v3498_v50 = vpop.xlane.xlu1 %3497 }
0x104a   : > { %v3499_v51 = vmul.f32 0.03125, %v3498_v50  ;;  %v8517_v50 = vld [vmem:[%s10793_s9 + $0x10] sm:$0xff]  }
0x104c   : > { %v3500_v52 = vsub.f32 %v11878_v46, %v3499_v51 }
0x104e   : > { %v3501_v63 = vmul.f32 %v11765_v41, %v3500_v52 }
0x1050   : > { %v3502_v53 = vmul.f32 %v3501_v63, %v3501_v63 }
0x1052   : > { %3503 = vadd.xlane.f32.xlu1 %v3502_v53  ;;  %v8518_v53 = vld [vmem:[%s10793_s9 + $0x18] sm:$0xff]  }
0x10df   : > { %v3504_v7 = vpop.xlane.xlu1 %3503 }
0x10e0   : > { %v3505_v8 = vmul.f32 0.03125, %v3504_v7 }
0x10e2   : > { %v3506_v28 = vadd.f32 1e-05, %v3505_v8 }
0x10e4   : > { %8671 = vrsqrt.f32 %v3506_v28 }
0x10ee   : > { %v8672_v11 = vpop.eup %8671 }
0x10ef   : > { %v3508_v15 = vmul.f32 %v8672_v11, %v3501_v63 }
0x10f1   : > { %v3515_v18 = vmul.f32 %v7006_v12, %v3508_v15  ;;  %v7026_v12 = vld [vmem:[#allocation83] ss:$0 sm:$0xff] }
0x10f3   : > { %v3522_v19 = vadd.f32 %v7007_v16, %v3515_v18  ;;  %v7027_v16 = vld [vmem:[#allocation80] ss:$0 sm:$0xff] }
0x10f5   : > { %v3539_v21 = vpack.c.bf16 %v3522_v19, %v3522_v19 }
0x10f7   : > { %7537 = vmatmul.mubr.bf16.vlgmr.msra.gmra.mrb[20].mxu0 %v3539_v21  ;;  %v8523_v21 = vld [vmem:[#allocation47] sm:$0xff]  }
0x10f8   : > { %7576 = vmatprep.mubr.msk.bf16.mxu0 %vm10476_vm0, %v10475_v2 }
0x11ca   : > { %v3629_v37 = vpop.f32.mrb[20].mxu0 }
0x11cb   : > { %v3630_v13 = vadd.f32 %v7008_v36, %v3629_v37  ;;  %v7538_v24 = vpop.f32.mrb[21].mxu0  ;;  %v8526_v37 = vld [vmem:[#allocation47 + $0x18] sm:$0xff]  }
0x11cc   : > { %v3632_v35 = vpop.f32.mrb[22].mxu0  ;;  %v8528_v24 = vld [vmem:[#allocation47 + $0x28] sm:$0xff]  }
0x11cd   : > { %v3636_v38 = vmul.f32 0.70710677, %v3630_v13  ;;  %v7539_v39 = vpop.f32.mrb[23].mxu0  ;;  %v3635_v42 = vmul.f32 0.5, %v3630_v13  ;;  %v8527_v13 = vld [vmem:[#allocation47 + $0x20] sm:$0xff]  }
0x11ce   : > { %v7039_v39 = vld [vmem:[#allocation46] ss:$0 sm:$0xff] }
0x11cf   : > { %8673 = verf.f32 %v3636_v38  ;;  %v8529_v38 = vld [vmem:[#allocation47 + $0x30] sm:$0xff]  }
0x11d9   : > { %v8674_v40 = vpop.eup %8673 }
0x11da   : > { %v3638_v43 = vadd.f32 1.0, %v8674_v40 }
0x11dc   : > { %v3639_v44 = vmul.f32 %v3638_v43, %v3635_v42  ;;  %v7040_v42 = vld [vmem:[#allocation43] ss:$0 sm:$0xff] }
0x11de   : > { %v3656_v45 = vpack.c.bf16 %v3639_v44, %v3639_v44  ;;  %v8530_v44 = vld [vmem:[#allocation47 + $0x38] sm:$0xff]  }
0x11e0   : > { %7557 = vmatmul.mubr.bf16.vlgmr.msra.gmra.mrb[12].mxu1 %v3656_v45 }
0x11e1   : > { %7909 = vmatpush3.bf16.msra.mxu1 %v11714_v6  ;;  %7612 = vmatprep.mubr.msk.f32.mxu1 %vm10476_vm0, %v10475_v2  ;;  %v3897_v6 = vpop.permute.xlu0 %3896 }
0x11e2   : > { %7910 = vmatprep.subr.bf16.mxu1 %v10474_v1  ;;  %vm3898_vm5 = vcmp.eq.s32.totalorder %v11750_v29, %v3897_v6 }
0x11e5   : > { %7912 = vmatpush3.bf16.msra.mxu1 %v11721_v9 }
0x11e6   : > { %7913 = vmatprep.subr.bf16.mxu1 %v10474_v1 }
0x11e9   : > { %7915 = vmatpush3.bf16.msra.mxu1 %v11725_v14  ;;  %v7025_v14 = vld [vmem:[#allocation59] ss:$0 sm:$0xff] }
0x11ea   : > { %7916 = vmatprep.subr.bf16.mxu1 %v10474_v1 }
0x11ed   : > { %7918 = vmatpush3.bf16.msra.mxu1 %v11729_v17 }
0x11ee   : > { %7919 = vmatprep.subr.bf16.mxu1 %v10474_v1 }
0x11f1   : > { %7921 = vmatpush3.bf16.msra.mxu1 %v11733_v20 }
0x11f2   : > { %7922 = vmatprep.subr.bf16.mxu1 %v10474_v1 }
0x11f5   : > { %7924 = vmatpush3.bf16.msra.mxu1 %v11737_v23 }
0x11f6   : > { %7925 = vmatprep.subr.bf16.mxu1 %v10474_v1 }
0x11f9   : > { %7927 = vmatpush3.bf16.msra.mxu1 %v11741_v26 }
0x11fa   : > { %7928 = vmatprep.subr.bf16.mxu1 %v10474_v1 }
0x11fd   : > { %7930 = vmatpush3.bf16.msra.mxu1 %v11745_v27 }
0x1200   : > { %7613 = vmatmul.mubr.msk.f32.vlgmr.msra.gmra.mrb[16].mxu1 %vm3898_vm5, %v10477_v31  ;;  %v8515_v31 = vld [vmem:[%s10793_s9] sm:$0xff]  }
0x1201   : > { %4349 = vmatprep.mubr.bf16.mxu1 %v10473_v0  ;;  %7561 = vmatpush3.bf16.msra.mxu0 %v8515_v31  ;;  %v8531_v31 = vld [vmem:[#allocation20] ss:$12 sps:$4 sm:$0xff]  }
0x1202   : > { %7562 = vmatprep.subr.bf16.mxu0 %v10475_v2 }
0x1205   : > { %7563 = vmatpush3.bf16.msra.mxu0 %v8516_v49  ;;  %v8533_v49 = vld [vmem:[#allocation20 + $0x4] ss:$12 sps:$4 sm:$0xff]  }
0x1206   : > { %7564 = vmatprep.subr.bf16.mxu0 %v10475_v2  ;;  %4317 = vmatprep.subr.bf16.mxu1 %v8533_v49 }
0x1207   : > { %4318 = vmatpush1.bf16.msra.mxu1 %v8531_v31 }
0x1209   : > { %7565 = vmatpush3.bf16.msra.mxu0 %v8517_v50  ;;  %v8534_v50 = vld [vmem:[#allocation20 + $0x8] ss:$12 sps:$4 sm:$0xff]  }
0x120a   : > { %7566 = vmatprep.subr.bf16.mxu0 %v10475_v2 }
0x120d   : > { %7567 = vmatpush3.bf16.msra.mxu0 %v8518_v53 }
0x120e   : > { %7568 = vmatprep.subr.bf16.mxu0 %v10475_v2 }
0x1211   : > { %7569 = vmatpush3.bf16.msra.mxu0 %v8519_v54 }
0x1212   : > { %7570 = vmatprep.subr.bf16.mxu0 %v10475_v2 }
0x1215   : > { %7571 = vmatpush3.bf16.msra.mxu0 %v8520_v57 }
0x1216   : > { %7572 = vmatprep.subr.bf16.mxu0 %v10475_v2 }
0x1219   : > { %7573 = vmatpush3.bf16.msra.mxu0 %v8521_v3  ;;  %v8543_v3 = vld [vmem:[#allocation20 + $0x48] ss:$12 sps:$4 sm:$0xff]  }
0x121a   : > { %7574 = vmatprep.subr.bf16.mxu0 %v10475_v2 }
0x121d   : > { %7575 = vmatpush3.bf16.msra.mxu0 %v8522_v5  ;;  %v8547_v5 = vld [vmem:[#allocation20 + $0x60] ss:$12 sps:$4 sm:$0xff]  }
0x121e   : > { %7615 = vmatprep.subr.bf16.mxu0 %v10475_v2 }
0x12b3   : > { %v3739_v9 = vpop.f32.mrb[12].mxu1 }
0x12b4   : > { %v3745_v17 = vadd.f32 %v3739_v9, %v11878_v46  ;;  %v7558_v20 = vpop.f32.mrb[13].mxu1 }
0x12b5   : > { %v3742_v23 = vpop.f32.mrb[14].mxu1 }
0x12b6   : > { %v7559_v26 = vpop.f32.mrb[15].mxu1  ;;  %v3753_v1 = vadd.f32 %v7025_v14, %v3745_v17  ;;  %v7041_v23 = vld [vmem:[#allocation44] ss:$0 sm:$0xff] }
0x12b8   : > { %3756 = vadd.xlane.f32.xlu1 %v3753_v1 }
0x12d3   : > { %v3967_v47 = vpop.f32.mrb[16].mxu1 }
0x12d4   : > { %v3968_v27 = vadd.f32 %v3967_v47, %v11755_v32  ;;  %v7614_v48 = vpop.f32.mrb[17].mxu1 }
0x12d6   : > { %3973 = vadd.xlane.f32.xlu1 %v3968_v27 }
0x1345   : > { %v3757_v46 = vpop.xlane.xlu1 %3756 }
0x1346   : > { %v3758_v51 = vmul.f32 0.03125, %v3757_v46  ;;  %v8537_v46 = vld [vmem:[#allocation20 + $0x1c] ss:$12 sps:$4 sm:$0xff]  }
0x1347   : > { %4319 = vmatprep.subr.bf16.mxu1 %v8537_v46 }
0x1348   : > { %v3759_v32 = vsub.f32 %v3753_v1, %v3758_v51  ;;  %v8538_v51 = vld [vmem:[#allocation20 + $0x20] ss:$12 sps:$4 sm:$0xff]  }
0x134a   : > { %v3760_v52 = vmul.f32 %v11765_v41, %v3759_v32  ;;  %v8535_v32 = vld [vmem:[#allocation20 + $0x18] ss:$12 sps:$4 sm:$0xff]  }
0x134b   : > { %4320 = vmatpush1.bf16.msra.mxu1 %v8535_v32 }
0x134c   : > { %v3761_v63 = vmul.f32 %v3760_v52, %v3760_v52 }
0x134e   : > { %3762 = vadd.xlane.f32.xlu1 %v3761_v63  ;;  %v8539_v63 = vld [vmem:[#allocation20 + $0x30] ss:$12 sps:$4 sm:$0xff]  }
0x1363   : > { %v3974_v55 = vpop.xlane.xlu1 %3973 }
0x1364   : > { %v3975_v56 = vmul.f32 0.03125, %v3974_v55 }
0x1366   : > { %v3976_v60 = vsub.f32 %v3968_v27, %v3975_v56 }
0x1368   : > { %v3977_v61 = vmul.f32 %v11765_v41, %v3976_v60  ;;  %v8542_v60 = vld [vmem:[#allocation20 + $0x38] ss:$12 sps:$4 sm:$0xff]  }
0x136a   : > { %v3978_v4 = vmul.f32 %v3977_v61, %v3977_v61 }
0x136c   : > { %3979 = vadd.xlane.f32.xlu1 %v3978_v4  ;;  %v8546_v4 = vld [vmem:[#allocation20 + $0x50] ss:$12 sps:$4 sm:$0xff]  }
0x13db   : > { %v3763_v7 = vpop.xlane.xlu1 %3762 }
0x13dc   : > { %v3764_v8 = vmul.f32 0.03125, %v3763_v7  ;;  %v8549_v7 = vld [vmem:[#allocation20 + $0x64] ss:$12 sps:$4 sm:$0xff]  }
0x13de   : > { %v3765_v28 = vadd.f32 1e-05, %v3764_v8  ;;  %v8550_v8 = vld [vmem:[#allocation20 + $0x68] ss:$12 sps:$4 sm:$0xff]  }
0x13e0   : > { %8675 = vrsqrt.f32 %v3765_v28  ;;  %v8553_v28 = vld [vmem:[#allocation20 + $0x7c] ss:$12 sps:$4 sm:$0xff]  }
0x13ea   : > { %v8676_v11 = vpop.eup %8675 }
0x13eb   : > { %v3767_v15 = vmul.f32 %v8676_v11, %v3760_v52  ;;  %v8541_v52 = vld [vmem:[#allocation20 + $0x34] ss:$12 sps:$4 sm:$0xff]   ;;  %v8551_v11 = vld [vmem:[#allocation20 + $0x78] ss:$12 sps:$4 sm:$0xff]  }
0x13ec   : > { %4321 = vmatprep.subr.bf16.mxu1 %v8541_v52 }
0x13ed   : > { %v3774_v18 = vmul.f32 %v7026_v12, %v3767_v15  ;;  %4322 = vmatpush1.bf16.msra.mxu1 %v8539_v63  ;;  %v8554_v12 = vld [vmem:[#allocation20 + $0x80] ss:$12 sps:$4 sm:$0xff]  }
0x13ee   : > { %v8557_v15 = vld [vmem:[#allocation20 + $0x94] ss:$12 sps:$4 sm:$0xff]  }
0x13ef   : > { %v3781_v19 = vadd.f32 %v7027_v16, %v3774_v18  ;;  %v8555_v16 = vld [vmem:[#allocation20 + $0x90] ss:$12 sps:$4 sm:$0xff]   ;;  %v8558_v18 = vld [vmem:[#allocation20 + $0x98] ss:$12 sps:$4 sm:$0xff]  }
0x13f1   : > { %v3798_v22 = vpack.c.bf16 %v3781_v19, %v3781_v19  ;;  %v8561_v19 = vld [vmem:[#allocation20 + $0xac] ss:$12 sps:$4 sm:$0xff]  }
0x13f3   : > { %7577 = vmatmul.mubr.bf16.vlgmr.msra.gmra.mrb[24].mxu0 %v3798_v22  ;;  %v8562_v22 = vld [vmem:[#allocation20 + $0xb0] ss:$12 sps:$4 sm:$0xff]  }
0x13f4   : > { %7616 = vmatpush3.bf16.msra.mxu0 %v8523_v21  ;;  %7631 = vmatprep.mubr.msk.bf16.mxu0 %vm10476_vm0, %v10475_v2  ;;  %v8559_v21 = vld [vmem:[#allocation20 + $0xa8] ss:$12 sps:$4 sm:$0xff]  }
0x13f5   : > { %7617 = vmatprep.subr.bf16.mxu0 %v10475_v2 }
0x13f8   : > { %7618 = vmatpush3.bf16.msra.mxu0 %v8524_v25 }
0x13f9   : > { %v3980_v33 = vpop.xlane.xlu1 %3979  ;;  %7619 = vmatprep.subr.bf16.mxu0 %v10475_v2 }
0x13fa   : > { %v3981_v34 = vmul.f32 0.03125, %v3980_v33 }
0x13fc   : > { %v3982_v36 = vadd.f32 1e-05, %v3981_v34  ;;  %7620 = vmatpush3.bf16.msra.mxu0 %v8525_v30 }
0x13fd   : > { %7621 = vmatprep.subr.bf16.mxu0 %v10475_v2 }
0x13fe   : > { %8677 = vrsqrt.f32 %v3982_v36  ;;  %v7050_v36 = vld [vmem:[#allocation11] ss:$0 sm:$0xff] }
0x1400   : > { %7622 = vmatpush3.bf16.msra.mxu0 %v8526_v37 }
0x1401   : > { %7623 = vmatprep.subr.bf16.mxu0 %v10475_v2 }
0x1404   : > { %7624 = vmatpush3.bf16.msra.mxu0 %v8527_v13  ;;  %v7051_v13 = vld [vmem:[#allocation10] ss:$0 sm:$0xff] }
0x1405   : > { %7625 = vmatprep.subr.bf16.mxu0 %v10475_v2 }
0x1408   : > { %v8678_v35 = vpop.eup %8677  ;;  %7626 = vmatpush3.bf16.msra.mxu0 %v8528_v24 }
0x1409   : > { %7627 = vmatprep.subr.bf16.mxu0 %v10475_v2  ;;  %v3984_v40 = vmul.f32 %v8678_v35, %v3977_v61  ;;  %v8545_v61 = vld [vmem:[#allocation20 + $0x4c] ss:$12 sps:$4 sm:$0xff]  }
0x140a   : > { %4323 = vmatprep.subr.bf16.mxu1 %v8545_v61 }
0x140b   : > { %v3991_v43 = vmul.f32 %v7039_v39, %v3984_v40  ;;  %4324 = vmatpush1.bf16.msra.mxu1 %v8543_v3  ;;  %v4172_v39 = vld [vmem:[%s12425_s17] sm:$0x7]  ;;  %s10167_s17 = scalar_lea.vmem %s12165_s1, 128 }
0x140c   : > { %7628 = vmatpush3.bf16.msra.mxu0 %v8529_v38  ;;  %4325 = vmatprep.subr.bf16.mxu1 %v8549_v7  ;;  %v4398_v40 = vld [vmem:[%s12426_s16] sm:$0x1]  ;;  %v4177_v32 = vrot.slane %v4172_v39, %v11831_v10  ;;  %p10168_p10 = scmp.ne.s32.totalorder %s12165_s1, %s10167_s17  ;;  %p10175_p5 = scmp.lt.s32.totalorder %s10173_s7, %s10167_s17 }
0x140d   : > { %7629 = vmatprep.subr.bf16.mxu0 %v10475_v2  ;;  %v3998_v45 = vadd.f32 %v7040_v42, %v3991_v43  ;;  %v4399_v42 = vld [vmem:[%s12426_s16 + $0x1] sm:$0x1]  ;;  %v4185_v43 = vrot.slane %v4172_v39, %v2945_v59 }
0x140e   : > { %p10169_p13 = pnand %p10168_p10, %p12428_p12  ;;  %p10176_p6 = por %p10175_p5, %p10174_p1 }
0x140f   : > { %v4015_v6 = vpack.c.bf16 %v3998_v45, %v3998_v45  ;;  %4326 = vmatpush1.bf16.msra.mxu1 %v8547_v5  ;;  %v4411_v45 = vpack.i.b16 %v4399_v42, %v4399_v42  ;;  %v8569_v42 = vld [vmem:[#allocation19 + $0x30] sm:$0xff]  }
0x1410   : > { %7630 = vmatpush3.bf16.msra.mxu0 %v8530_v44  ;;  %4327 = vmatprep.subr.bf16.mxu1 %v8553_v28  ;;  %v4404_v44 = vpack.i.b16 %v4398_v40, %v4398_v40  ;;  %v8568_v40 = vld [vmem:[#allocation19 + $0x28] sm:$0xff]   ;;  %p10170_p0 = pneg %p10169_p13 }
0x1411   : > { %7635 = vmatprep.subr.bf16.mxu0 %v10475_v2 }
0x1412   : > { %p10177_p2 = pnand %p10176_p6, %p10170_p0 }
0x1413   : > { %7632 = vmatmul.mubr.bf16.vlgmr.msra.gmra.mrb[28].mxu0 %v4015_v6  ;;  %4328 = vmatpush1.bf16.msra.mxu1 %v8551_v11  ;;  %v4181_v6 = vrot.slane %v4172_v39, %v11824_v62  ;;  %v8567_v39 = vld [vmem:[#allocation19 + $0x20] sm:$0xff]  }
0x1414   : > { %7651 = vmatprep.mubr.msk.bf16.mxu0 %vm10476_vm0, %v10475_v2  ;;  %7636 = vmatpush3.bf16.msra.mxu0 %v8534_v50 }
0x1415   : > { %7637 = vmatprep.subr.bf16.mxu0 %v10475_v2  ;;  %4329 = vmatprep.subr.bf16.mxu1 %v8557_v15 }
0x1417   : > { %4330 = vmatpush1.bf16.msra.mxu1 %v8555_v16 }
0x1418   : > { %7638 = vmatpush3.bf16.msra.mxu0 %v8538_v51  ;;  %4331 = vmatprep.subr.bf16.mxu1 %v8561_v19 }
0x1419   : > { %7639 = vmatprep.subr.bf16.mxu0 %v10475_v2 }
0x141b   : > { %4332 = vmatpush1.bf16.msra.mxu1 %v8559_v21 }
0x141c   : > { %7640 = vmatpush3.bf16.msra.mxu0 %v8542_v60  ;;  %7655 = vmatprep.subr.bf16.mxu1 %v10475_v2  ;;  %v10478_v60 = vmov -1e+30  }
0x141d   : > { %7641 = vmatprep.subr.bf16.mxu0 %v10475_v2  ;;  %v4424_v61 = vsel %vm4423_vm6, 0.0, %v10478_v60 }
0x1420   : > { %7642 = vmatpush3.bf16.msra.mxu0 %v8546_v4 }
0x1421   : > { %7643 = vmatprep.subr.bf16.mxu0 %v10475_v2 }
0x1424   : > { %7644 = vmatpush3.bf16.msra.mxu0 %v8550_v8 }
0x1425   : > { %7645 = vmatprep.subr.bf16.mxu0 %v10475_v2 }
0x1428   : > { %7646 = vmatpush3.bf16.msra.mxu0 %v8554_v12 }
0x1429   : > { %7647 = vmatprep.subr.bf16.mxu0 %v10475_v2 }
0x142c   : > { %7648 = vmatpush3.bf16.msra.mxu0 %v8558_v18 }
0x142d   : > { %7649 = vmatprep.subr.bf16.mxu0 %v10475_v2 }
0x1430   : > { %7650 = vmatpush3.bf16.msra.mxu0 %v8562_v22 }
0x1431   : > { %7667 = vmatprep.subr.bf16.mxu0 %v10475_v2 }
0x14c6   : > { %v11953_v9 = vpop.f32.mrb[24].mxu0 }
0x14c7   : > { %v7578_v14 = vpop.f32.mrb[25].mxu0 }
0x14c8   : > { %v3891_v17 = vpop.f32.mrb[26].mxu0 }
0x14c9   : > { %v7579_v20 = vpop.f32.mrb[27].mxu0 }
0x14e6   : > { %v4105_v26 = vpop.f32.mrb[28].mxu0 }
0x14e7   : > { %v11955_v1 = vadd.f32 %v7041_v23, %v4105_v26  ;;  %v7633_v47 = vpop.f32.mrb[29].mxu0  ;;  %v4409_v23 = vrot.slane %v4404_v44, %v11831_v10  ;;  %v11981_v26 = vrot.slane %v4411_v45, %v11831_v10 }
0x14e8   : > { %v4108_v27 = vpop.f32.mrb[30].mxu0 }
0x14e9   : > { %4113 = vadd.xlane.f32.xlu1 %v11955_v1  ;;  %v7634_v48 = vpop.f32.mrb[31].mxu0 }
0x1576   : > { %v4114_v53 = vpop.xlane.xlu1 %4113 }
0x1577   : > { %v4115_v54 = vmul.f32 0.03125, %v4114_v53 }
0x1579   : > { %v4116_v55 = vsub.f32 %v11955_v1, %v4115_v54 }
0x157b   : > { %v4117_v56 = vmul.f32 %v11765_v41, %v4116_v55 }
0x157d   : > { %v4118_v57 = vmul.f32 %v4117_v56, %v4117_v56 }
0x157f   : > { %4119 = vadd.xlane.f32.xlu1 %v4118_v57 }
0x160c   : > { %v4120_v25 = vpop.xlane.xlu1 %4119 }
0x160d   : > { %v4121_v30 = vmul.f32 0.03125, %v4120_v25 }
0x160f   : > { %v4122_v33 = vadd.f32 1e-05, %v4121_v30 }
0x1611   : > { %8679 = vrsqrt.f32 %v4122_v33 }
0x161b   : > { %v8680_v34 = vpop.eup %8679 }
0x161c   : > { %v4124_v37 = vmul.f32 %v8680_v34, %v4117_v56 }
0x161e   : > { %v4131_v24 = vmul.f32 %v7050_v36, %v4124_v37 }
0x1620   : > { %v4138_v35 = vadd.f32 %v7051_v13, %v4131_v24  ;;  %v8563_v13 = vld [vmem:[#allocation19] sm:$0xff]   ;;  %v8564_v24 = vld [vmem:[#allocation19 + $0x8] sm:$0xff]  }
0x1622   : > { %v4171_v38 = vpack.c.bf16 %v4138_v35, %v4138_v35  ;;  %v8565_v35 = vld [vmem:[#allocation19 + $0x10] sm:$0xff]  }
0x1624   : > { %4350 = vmatmul.mubr.bf16.vlgmr.msra.gmra.mrb[20].mxu1 %v4171_v38  ;;  %7652 = vmatmul.mubr.bf16.vlgmr.msra.gmra.mrb[32].mxu0 %v4171_v38  ;;  %v8566_v38 = vld [vmem:[#allocation19 + $0x18] sm:$0xff]  }
0x1625   : > { %7657 = vmatprep.mubr.msk.bf16.mxu1 %vm10476_vm0, %v10475_v2  ;;  %7669 = vmatprep.mubr.msk.bf16.mxu0 %vm10476_vm0, %v10475_v2 }
0x16f7   : > { %v4351_v14 = vpop.f32.mrb[20].mxu1  ;;  %v4392_v17 = vpop.f32.mrb[32].mxu0 }
0x16f8   : > { %v4393_v20 = vadd.f32 %v4392_v17, %v4185_v43  ;;  %v4353_v47 = vpop.f32.mrb[21].mxu1  ;;  %v7653_v27 = vpop.f32.mrb[33].mxu0  ;;  %v4352_v55 = vadd.f32 %v4351_v14, %v4177_v32 }
0x16f9   : > { %v4354_v48 = vadd.f32 %v4353_v47, %v4181_v6  ;;  %v4355_v31 = vpop.f32.mrb[22].mxu1  ;;  %v4395_v49 = vpop.f32.mrb[34].mxu0  ;;  %v8570_v27 = vld [vmem:[#allocation19 + $0x38] sm:$0xff]  }
0x16fa   : > { %v11983_v50 = vpack.c.bf16 %v4393_v20, %v4393_v20  ;;  %v4356_v59 = vpop.f32.mrb[23].mxu1  ;;  %v7654_v46 = vpop.f32.mrb[35].mxu0  ;;  %v4400_v56 = vpack.c.bf16 %v4352_v55, %v4352_v55  ;;  %v8572_v55 = vld [vmem:[#allocation16 + $0x8] sm:$0xff]  }
0x16fb   : > { %v4401_v51 = vpack.c.bf16 %v4354_v48, %v4354_v48  ;;  %v7086_v46 = vld [vmem:[#allocation8] ss:$0 sm:$0xff] }
0x16fc   : > { %v4419_v52 = vmul.bf16 %v4409_v23, %v11983_v50  ;;  %v4420_v63 = vmul.bf16 %v11981_v26, %v11983_v50 }
0x16fd   : > { %v4417_v53 = vmul.bf16 %v4409_v23, %v4401_v51  ;;  %v4418_v57 = vmul.bf16 %v11981_v26, %v4401_v51 }
0x16fe   : > { %v4533_v54 = vsel %vm3290_vm3, %v4419_v52, 0  ;;  %v4579_v17 = vsel %vm3290_vm3, %v4420_v63, 0 }
0x16ff   : > { %7656 = vmatpush3.bf16.xpose.msra.mxu1 %v4417_v53  ;;  %7668 = vmatpush3.bf16.msra.mxu0 %v4533_v54  ;;  %v8571_v54 = vld [vmem:[#allocation16] sm:$0xff]  }
0x1700   : > { %7661 = vmatprep.subr.bf16.mxu1 %v10475_v2  ;;  %7673 = vmatprep.subr.bf16.mxu0 %v10475_v2 }
0x1706   : > { %7658 = vmatmul.mubr.bf16.vlgmr.msra.gmra.mrb[24].mxu1 %v4400_v56 }
0x1707   : > { %7662 = vmatpush3.bf16.xpose.msra.mxu1 %v4418_v57  ;;  %7663 = vmatprep.mubr.msk.bf16.mxu1 %vm10476_vm0, %v10475_v2 }
0x1708   : > { %7679 = vmatprep.subr.bf16.mxu1 %v10475_v2 }
0x170e   : > { %7664 = vmatmul.mubr.bf16.vlgmr.msra.gmra.mrb[28].mxu1 %v4400_v56 }
0x170f   : > { %7695 = vmatprep.mubr.msk.bf16.mxu1 %vm10476_vm0, %v10475_v2  ;;  %7680 = vmatpush3.bf16.msra.mxu1 %v8563_v13  ;;  %v8585_v13 = vld [vmem:[#allocation17 + $0x30] sm:$0xff]  }
0x1710   : > { %7681 = vmatprep.subr.bf16.mxu1 %v10475_v2 }
0x1713   : > { %7682 = vmatpush3.bf16.msra.mxu1 %v8564_v24  ;;  %v8586_v24 = vld [vmem:[#allocation17 + $0x38] sm:$0xff]  }
0x1714   : > { %7683 = vmatprep.subr.bf16.mxu1 %v10475_v2 }
0x1717   : > { %7684 = vmatpush3.bf16.msra.mxu1 %v8565_v35  ;;  %v8589_v35 = vld [vmem:[#allocation37 + $0x4] ss:$8 sps:$4 sm:$0xff]  }
0x1718   : > { %7685 = vmatprep.subr.bf16.mxu1 %v10475_v2 }
0x171b   : > { %7686 = vmatpush3.bf16.msra.mxu1 %v8566_v38  ;;  %v7089_v38 = vld [vmem:[#allocation5] ss:$0 sm:$0xff] }
0x171c   : > { %7687 = vmatprep.subr.bf16.mxu1 %v10475_v2 }
0x171f   : > { %7688 = vmatpush3.bf16.msra.mxu1 %v8567_v39 }
0x1720   : > { %7689 = vmatprep.subr.bf16.mxu1 %v10475_v2 }
0x1723   : > { %7690 = vmatpush3.bf16.msra.mxu1 %v8568_v40 }
0x1724   : > { %7691 = vmatprep.subr.bf16.mxu1 %v10475_v2 }
0x1727   : > { %7692 = vmatpush3.bf16.msra.mxu1 %v8569_v42 }
0x1728   : > { %7693 = vmatprep.subr.bf16.mxu1 %v10475_v2 }
0x172b   : > { %7694 = vmatpush3.bf16.msra.mxu1 %v8570_v27  ;;  %v8592_v27 = vld [vmem:[#allocation37 + $0x14] ss:$8 sps:$4 sm:$0xff]  }
0x172c   : > { %7719 = vmatprep.subr.bf16.mxu1 %v10475_v2 }
0x17d9   : > { %v4459_v3 = vpop.f32.mrb[24].mxu1 }
0x17da   : > { %v4460_v4 = vadd.f32 %v4459_v3, %v4424_v61  ;;  %v7659_v5 = vpop.f32.mrb[25].mxu1  ;;  %v8573_v3 = vld [vmem:[#allocation16 + $0x10] sm:$0xff]  }
0x17db   : > { %v4462_v7 = vpop.f32.mrb[26].mxu1  ;;  %v8575_v5 = vld [vmem:[#allocation16 + $0x20] sm:$0xff]  }
0x17dc   : > { %v7660_v8 = vpop.f32.mrb[27].mxu1  ;;  %v4505_v28 = vsel %vm3262_vm4, %v4460_v4, -inf  ;;  %v8576_v7 = vld [vmem:[#allocation16 + $0x28] sm:$0xff]  }
0x17dd   : > { %4506 = vmax.xlane.f32.xlu0 %v4505_v28  ;;  %v8577_v8 = vld [vmem:[#allocation16 + $0x30] sm:$0xff]   ;;  %v8578_v28 = vld [vmem:[#allocation16 + $0x38] sm:$0xff]  }
0x17e1   : > { %v4499_v11 = vpop.f32.mrb[28].mxu1 }
0x17e2   : > { %v4500_v12 = vadd.f32 %v4499_v11, %v4424_v61  ;;  %v7665_v15 = vpop.f32.mrb[29].mxu1  ;;  %v8579_v11 = vld [vmem:[#allocation17] sm:$0xff]  }
0x17e3   : > { %v4502_v16 = vpop.f32.mrb[30].mxu1  ;;  %v8581_v15 = vld [vmem:[#allocation17 + $0x10] sm:$0xff]  }
0x17e4   : > { %v7666_v18 = vpop.f32.mrb[31].mxu1  ;;  %v4508_v19 = vsel %vm3262_vm4, %v4500_v12, -inf }
0x17e5   : > { %4509 = vmax.xlane.f32.xlu1 %v4508_v19 }
0x186a   : > { %v4507_v21 = vpop.xlane.xlu0 %4506 }
0x186b   : > { %v4511_v29 = vsub.f32 %v4460_v4, %v4507_v21  ;;  %v8574_v4 = vld [vmem:[#allocation16 + $0x18] sm:$0xff]  }
0x186d   : > { %v4513_v58 = vmul.f32 1.442695, %v4511_v29  ;;  %v7087_v29 = vld [vmem:[#allocation14] ss:$0 sm:$0xff] }
0x186f   : > { %8681 = vpow2.f32 %v4513_v58 }
0x1872   : > { %v4510_v22 = vpop.xlane.xlu1 %4509 }
0x1873   : > { %v4512_v25 = vsub.f32 %v4500_v12, %v4510_v22  ;;  %v8580_v12 = vld [vmem:[#allocation17 + $0x8] sm:$0xff]   ;;  %v7088_v22 = vld [vmem:[#allocation13] ss:$0 sm:$0xff] }
0x1875   : > { %v4515_v30 = vmul.f32 1.442695, %v4512_v25 }
0x1877   : > { %8683 = vpow2.f32 %v4515_v30 }
0x1879   : > { %v8682_v33 = vpop.eup %8681 }
0x187a   : > { %v4517_v34 = vsel %vm3262_vm4, %v8682_v33, 0.0 }
0x187b   : > { %4518 = vadd.xlane.f32.xlu1 %v4517_v34  ;;  %v8582_v34 = vld [vmem:[#allocation17 + $0x18] sm:$0xff]  }
0x1881   : > { %v8684_v36 = vpop.eup %8683 }
0x1882   : > { %v4520_v37 = vsel %vm3262_vm4, %v8684_v36, 0.0 }
0x1883   : > { %4521 = vadd.xlane.f32.xlu1 %v4520_v37  ;;  %v8584_v37 = vld [vmem:[#allocation17 + $0x28] sm:$0xff]  }
0x1908   : > { %v4519_v43 = vpop.xlane.xlu1 %4518 }
0x1909   : > { %8685 = vrcp.f32 %v4519_v43 }
0x1910   : > { %v4522_v44 = vpop.xlane.xlu1 %4521 }
0x1911   : > { %8687 = vrcp.f32 %v4522_v44 }
0x1913   : > { %v8686_v45 = vpop.eup %8685 }
0x1914   : > { %v4524_v6 = vmul.f32 %v8686_v45, %v8682_v33 }
0x1916   : > { %v4527_v14 = vpack.c.bf16 %v4524_v6, %v4524_v6 }
0x1918   : > { %7670 = vmatmul.mubr.msk.bf16.vlgmr.msra.gmra.mrb[36].mxu0 %vm3262_vm4, %v4527_v14 }
0x1919   : > { %7674 = vmatpush3.bf16.msra.mxu0 %v4579_v17  ;;  %7675 = vmatprep.mubr.msk.bf16.mxu0 %vm10476_vm0, %v10475_v2 }
0x191a   : > { %7699 = vmatprep.subr.bf16.mxu0 %v10475_v2 }
0x191b   : > { %v8688_v20 = vpop.eup %8687 }
0x191c   : > { %v4526_v23 = vmul.f32 %v8688_v20, %v8684_v36  ;;  %v8583_v36 = vld [vmem:[#allocation17 + $0x20] sm:$0xff]  }
0x191e   : > { %v4528_v47 = vpack.c.bf16 %v4526_v23, %v4526_v23  ;;  %v8587_v23 = vld [vmem:[#allocation37] ss:$8 sps:$4 sm:$0xff]  }
0x1924   : > { %7676 = vmatmul.mubr.msk.bf16.vlgmr.msra.gmra.mrb[36].mxu0 %vm3262_vm4, %v4528_v47 }
0x1925   : > { %7715 = vmatprep.mubr.msk.bf16.mxu0 %vm10476_vm0, %v10475_v2  ;;  %7700 = vmatpush3.bf16.msra.mxu0 %v8571_v54  ;;  %v7028_v54 = vld [vmem:[#allocation82] ss:$0 sm:$0xff] }
0x1926   : > { %7701 = vmatprep.subr.bf16.mxu0 %v10475_v2 }
0x1929   : > { %7702 = vmatpush3.bf16.msra.mxu0 %v8572_v55  ;;  %v8608_v55 = vld [vmem:[#allocation37 + $0x70] ss:$8 sps:$4 sm:$0xff]  }
0x192a   : > { %7703 = vmatprep.subr.bf16.mxu0 %v10475_v2 }
0x192d   : > { %7704 = vmatpush3.bf16.msra.mxu0 %v8573_v3 }
0x192e   : > { %7705 = vmatprep.subr.bf16.mxu0 %v10475_v2 }
0x1931   : > { %7706 = vmatpush3.bf16.msra.mxu0 %v8574_v4 }
0x1932   : > { %7707 = vmatprep.subr.bf16.mxu0 %v10475_v2 }
0x1935   : > { %7708 = vmatpush3.bf16.msra.mxu0 %v8575_v5 }
0x1936   : > { %7709 = vmatprep.subr.bf16.mxu0 %v10475_v2 }
0x1939   : > { %7710 = vmatpush3.bf16.msra.mxu0 %v8576_v7  ;;  %v5152_v7 = vld [vmem:[#allocation23] sm:$0x3] }
0x193a   : > { %7711 = vmatprep.subr.bf16.mxu0 %v10475_v2 }
0x193d   : > { %7712 = vmatpush3.bf16.msra.mxu0 %v8577_v8  ;;  %v5285_v8 = vld [vmem:[%s12427_s10] sm:$0x1] }
0x193e   : > { %7713 = vmatprep.subr.bf16.mxu0 %v10475_v2 }
0x1941   : > { %7714 = vmatpush3.bf16.msra.mxu0 %v8578_v28  ;;  %v5286_v28 = vld [vmem:[%s12427_s10 + $0x1] sm:$0x1] }
0x1942   : > { %7739 = vmatprep.subr.bf16.mxu0 %v10475_v2 }
0x19f7   : > { %v4615_v26 = vpop.f32.mrb[36].mxu0 }
0x19f8   : > { %v4638_v48 = vpack.c.bf16 %v4615_v26, %v4615_v26  ;;  %v7677_v31 = vpop.f32.mrb[37].mxu0  ;;  %v8590_v26 = vld [vmem:[#allocation37 + $0x10] ss:$8 sps:$4 sm:$0xff]  }
0x19f9   : > { %v4618_v49 = vpop.f32.mrb[38].mxu0  ;;  %v8593_v31 = vld [vmem:[#allocation37 + $0x20] ss:$8 sps:$4 sm:$0xff]  }
0x19fa   : > { %v7678_v50 = vpop.f32.mrb[39].mxu0  ;;  %7696 = vmatmul.mubr.bf16.vlgmr.msra.gmra.mrb[32].mxu1 %v4638_v48  ;;  %v8595_v48 = vld [vmem:[#allocation37 + $0x24] ss:$8 sps:$4 sm:$0xff]   ;;  %v8598_v49 = vld [vmem:[#allocation37 + $0x34] ss:$8 sps:$4 sm:$0xff]  }
0x19fb   : > { %7735 = vmatprep.mubr.msk.bf16.mxu1 %vm10476_vm0, %v10475_v2  ;;  %7720 = vmatpush3.bf16.msra.mxu1 %v8579_v11  ;;  %v8596_v50 = vld [vmem:[#allocation37 + $0x30] ss:$8 sps:$4 sm:$0xff]   ;;  %v8611_v11 = vld [vmem:[#allocation41] sm:$0xff]  }
0x19fc   : > { %7721 = vmatprep.subr.bf16.mxu1 %v10475_v2 }
0x19ff   : > { %7722 = vmatpush3.bf16.msra.mxu1 %v8580_v12  ;;  %v8612_v12 = vld [vmem:[#allocation41 + $0x8] sm:$0xff]  }
0x1a00   : > { %7723 = vmatprep.subr.bf16.mxu1 %v10475_v2 }
0x1a03   : > { %7724 = vmatpush3.bf16.msra.mxu1 %v8581_v15  ;;  %v5291_v15 = vpack.i.b16 %v5285_v8, %v5285_v8 }
0x1a04   : > { %7725 = vmatprep.subr.bf16.mxu1 %v10475_v2 }
0x1a07   : > { %7726 = vmatpush3.bf16.msra.mxu1 %v8582_v34 }
0x1a08   : > { %7727 = vmatprep.subr.bf16.mxu1 %v10475_v2 }
0x1a0b   : > { %7728 = vmatpush3.bf16.msra.mxu1 %v8583_v36 }
0x1a0c   : > { %7729 = vmatprep.subr.bf16.mxu1 %v10475_v2 }
0x1a0f   : > { %7730 = vmatpush3.bf16.msra.mxu1 %v8584_v37 }
0x1a10   : > { %7731 = vmatprep.subr.bf16.mxu1 %v10475_v2 }
0x1a13   : > { %7732 = vmatpush3.bf16.msra.mxu1 %v8585_v13 }
0x1a14   : > { %7733 = vmatprep.subr.bf16.mxu1 %v10475_v2 }
0x1a17   : > { %7734 = vmatpush3.bf16.msra.mxu1 %v8586_v24 }
0x1a18   : > { %5244 = vmatprep.subr.bf16.mxu1 %v8589_v35 }
0x1acd   : > { %v4721_v59 = vpop.f32.mrb[32].mxu1 }
0x1ace   : > { %v4727_v51 = vadd.f32 %v4721_v59, %v11955_v1  ;;  %v7697_v32 = vpop.f32.mrb[33].mxu1  ;;  %v8601_v59 = vld [vmem:[#allocation37 + $0x44] ss:$8 sps:$4 sm:$0xff]  }
0x1acf   : > { %v4724_v52 = vpop.f32.mrb[34].mxu1  ;;  %v8602_v32 = vld [vmem:[#allocation37 + $0x50] ss:$8 sps:$4 sm:$0xff]  }
0x1ad0   : > { %v12026_v63 = vadd.f32 %v7086_v46, %v4727_v51  ;;  %v7698_v53 = vpop.f32.mrb[35].mxu1  ;;  %v8599_v46 = vld [vmem:[#allocation37 + $0x40] ss:$8 sps:$4 sm:$0xff]   ;;  %v8604_v51 = vld [vmem:[#allocation37 + $0x54] ss:$8 sps:$4 sm:$0xff]  }
0x1ad1   : > { %v8607_v52 = vld [vmem:[#allocation37 + $0x64] ss:$8 sps:$4 sm:$0xff]   ;;  %v8610_v53 = vld [vmem:[#allocation37 + $0x74] ss:$8 sps:$4 sm:$0xff]  }
0x1ad2   : > { %4738 = vadd.xlane.f32.xlu1 %v12026_v63 }
0x1b5f   : > { %v4739_v56 = vpop.xlane.xlu1 %4738 }
0x1b60   : > { %v4740_v57 = vmul.f32 0.03125, %v4739_v56  ;;  %v3889_v56 = vadd.f32 %v7028_v54, %v11953_v9 }
0x1b62   : > { %v4741_v60 = vsub.f32 %v12026_v63, %v4740_v57  ;;  %v5151_v57 = vpack.c.bf16 %v3889_v56, %v3889_v56 }
0x1b64   : > { %v4742_v1 = vmul.f32 %v11765_v41, %v4741_v60 }
0x1b66   : > { %v4743_v61 = vmul.f32 %v4742_v1, %v4742_v1 }
0x1b68   : > { %4744 = vadd.xlane.f32.xlu1 %v4743_v61 }
0x1bf5   : > { %v4745_v16 = vpop.xlane.xlu1 %4744 }
0x1bf6   : > { %v4746_v18 = vmul.f32 0.03125, %v4745_v16  ;;  %v5298_v16 = vpack.i.b16 %v5286_v28, %v5286_v28 }
0x1bf8   : > { %v4747_v19 = vadd.f32 1e-05, %v4746_v18  ;;  %v5161_v18 = vrot.slane %v5152_v7, %v11824_v62  ;;  %v8614_v62 = vld [vmem:[#allocation41 + $0x18] sm:$0xff]  }
0x1bfa   : > { %8689 = vrsqrt.f32 %v4747_v19 }
0x1c04   : > { %v8690_v21 = vpop.eup %8689 }
0x1c05   : > { %v4749_v58 = vmul.f32 %v8690_v21, %v4742_v1  ;;  %v7106_v1 = vld [vmem:[#allocation7] ss:$0 sm:$0xff]  ;;  %v8613_v21 = vld [vmem:[#allocation41 + $0x10] sm:$0xff]  }
0x1c07   : > { %v4756_v25 = vmul.f32 %v7087_v29, %v4749_v58  ;;  %v12062_v29 = vrot.slane %v5291_v15, %v11831_v10  ;;  %v12065_v58 = vrot.slane %v5298_v16, %v11831_v10 }
0x1c09   : > { %v4763_v30 = vadd.f32 %v7088_v22, %v4756_v25 }
0x1c0b   : > { %v4780_v33 = vpack.c.bf16 %v4763_v30, %v4763_v30 }
0x1c0d   : > { %7716 = vmatmul.mubr.bf16.vlgmr.msra.gmra.mrb[40].mxu0 %v4780_v33 }
0x1c0e   : > { %7755 = vmatprep.mubr.msk.bf16.mxu0 %vm10476_vm0, %v10475_v2  ;;  %7740 = vmatpush3.bf16.msra.mxu0 %v8611_v11 }
0x1c0f   : > { %7741 = vmatprep.subr.bf16.mxu0 %v10475_v2 }
0x1c12   : > { %7742 = vmatpush3.bf16.msra.mxu0 %v8612_v12 }
0x1c13   : > { %7743 = vmatprep.subr.bf16.mxu0 %v10475_v2 }
0x1c16   : > { %7744 = vmatpush3.bf16.msra.mxu0 %v8613_v21 }
0x1c17   : > { %7745 = vmatprep.subr.bf16.mxu0 %v10475_v2 }
0x1c1a   : > { %7746 = vmatpush3.bf16.msra.mxu0 %v8614_v62  ;;  %v8623_v62 = vld [vmem:[#allocation40 + $0x20] sm:$0xff]  }
0x1c1b   : > { %7747 = vmatprep.subr.bf16.mxu0 %v10475_v2 }
0x1ce0   : > { %v4870_v39 = vpop.f32.mrb[40].mxu0 }
0x1ce1   : > { %v4871_v40 = vadd.f32 %v7089_v38, %v4870_v39  ;;  %v7717_v42 = vpop.f32.mrb[41].mxu0  ;;  %v8615_v39 = vld [vmem:[#allocation41 + $0x20] sm:$0xff]  }
0x1ce2   : > { %v4873_v43 = vpop.f32.mrb[42].mxu0  ;;  %7748 = vmatpush3.bf16.msra.mxu0 %v8615_v39  ;;  %v8617_v42 = vld [vmem:[#allocation41 + $0x30] sm:$0xff]  }
0x1ce3   : > { %v4877_v44 = vmul.f32 0.70710677, %v4871_v40  ;;  %v7718_v45 = vpop.f32.mrb[43].mxu0  ;;  %v4876_v14 = vmul.f32 0.5, %v4871_v40  ;;  %7749 = vmatprep.subr.bf16.mxu0 %v10475_v2  ;;  %v8616_v40 = vld [vmem:[#allocation41 + $0x28] sm:$0xff]   ;;  %v8618_v43 = vld [vmem:[#allocation41 + $0x38] sm:$0xff]  }
0x1ce5   : > { %8691 = verf.f32 %v4877_v44 }
0x1ce6   : > { %7750 = vmatpush3.bf16.msra.mxu0 %v8616_v40 }
0x1ce7   : > { %7751 = vmatprep.subr.bf16.mxu0 %v10475_v2 }
0x1cea   : > { %7752 = vmatpush3.bf16.msra.mxu0 %v8617_v42 }
0x1ceb   : > { %7753 = vmatprep.subr.bf16.mxu0 %v10475_v2 }
0x1cee   : > { %7754 = vmatpush3.bf16.msra.mxu0 %v8618_v43 }
0x1cef   : > { %v8692_v6 = vpop.eup %8691  ;;  %7759 = vmatprep.subr.bf16.mxu0 %v10475_v2 }
0x1cf0   : > { %v4879_v17 = vadd.f32 1.0, %v8692_v6 }
0x1cf2   : > { %v4880_v20 = vmul.f32 %v4879_v17, %v4876_v14  ;;  %v5157_v14 = vrot.slane %v5152_v7, %v11831_v10 }
0x1cf4   : > { %v4897_v47 = vpack.c.bf16 %v4880_v20, %v4880_v20 }
0x1cf6   : > { %7736 = vmatmul.mubr.bf16.vlgmr.msra.gmra.mrb[36].mxu1 %v4897_v47 }
0x1cf7   : > { %5245 = vmatpush1.bf16.msra.mxu1 %v8587_v23  ;;  %5276 = vmatprep.mubr.bf16.mxu1 %v10473_v0  ;;  %v8605_v0 = vld [vmem:[#allocation37 + $0x60] ss:$8 sps:$4 sm:$0xff]   ;;  %v7107_v23 = vld [vmem:[#allocation31] ss:$0 sm:$0xff] }
0x1cf8   : > { %5246 = vmatprep.subr.bf16.mxu1 %v8592_v27  ;;  %v7108_v27 = vld [vmem:[#allocation29] ss:$0 sm:$0xff] }
0x1cfb   : > { %5247 = vmatpush1.bf16.msra.mxu1 %v8590_v26 }
0x1cfc   : > { %5248 = vmatprep.subr.bf16.mxu1 %v8595_v48 }
0x1cff   : > { %5249 = vmatpush1.bf16.msra.mxu1 %v8593_v31 }
0x1d00   : > { %5250 = vmatprep.subr.bf16.mxu1 %v8598_v49 }
0x1d03   : > { %5251 = vmatpush1.bf16.msra.mxu1 %v8596_v50 }
0x1d04   : > { %5252 = vmatprep.subr.bf16.mxu1 %v8601_v59  ;;  %v7109_v59 = vld [vmem:[#allocation28] ss:$0 sm:$0xff] }
0x1d07   : > { %5253 = vmatpush1.bf16.msra.mxu1 %v8599_v46 }
0x1d08   : > { %5254 = vmatprep.subr.bf16.mxu1 %v8604_v51 }
0x1d0b   : > { %5255 = vmatpush1.bf16.msra.mxu1 %v8602_v32 }
0x1d0c   : > { %5256 = vmatprep.subr.bf16.mxu1 %v8607_v52 }
0x1d0f   : > { %5257 = vmatpush1.bf16.msra.mxu1 %v8605_v0 }
0x1d10   : > { %5258 = vmatprep.subr.bf16.mxu1 %v8610_v53 }
0x1d13   : > { %5259 = vmatpush1.bf16.msra.mxu1 %v8608_v55 }
0x1d14   : > { %7783 = vmatprep.subr.bf16.mxu1 %v10475_v2 }
0x1d16   : > { %5277 = vmatmul.mubr.bf16.vlgmr.msra.gmra.mrb[40].mxu1 %v5151_v57 }
0x1d17   : > { %7799 = vmatprep.mubr.msk.bf16.mxu1 %vm10476_vm0, %v10475_v2 }
0x1dc9   : > { %v4980_v60 = vpop.f32.mrb[36].mxu1 }
0x1dca   : > { %v4986_v61 = vadd.f32 %v4980_v60, %v12026_v63  ;;  %v7737_v3 = vpop.f32.mrb[37].mxu1 }
0x1dcb   : > { %v4983_v4 = vpop.f32.mrb[38].mxu1 }
0x1dcc   : > { %v12054_v5 = vadd.f32 %v7106_v1, %v4986_v61  ;;  %v7738_v9 = vpop.f32.mrb[39].mxu1 }
0x1dce   : > { %4997 = vadd.xlane.f32.xlu1 %v12054_v5 }
0x1de9   : > { %v5278_v63 = vpop.f32.mrb[40].mxu1 }
0x1dea   : > { %v5280_v19 = vpop.f32.mrb[41].mxu1  ;;  %v5279_v20 = vadd.f32 %v5278_v63, %v5157_v14 }
0x1deb   : > { %v5281_v22 = vadd.f32 %v5280_v19, %v5161_v18  ;;  %v5282_v25 = vpop.f32.mrb[42].mxu1 }
0x1dec   : > { %v5283_v30 = vpop.f32.mrb[43].mxu1  ;;  %v5288_v48 = vpack.c.bf16 %v5279_v20, %v5279_v20  ;;  %v8621_v25 = vld [vmem:[#allocation40 + $0x10] sm:$0xff]  }
0x1ded   : > { %v12068_v33 = vpack.c.bf16 %v5281_v22, %v5281_v22  ;;  %v8620_v22 = vld [vmem:[#allocation40 + $0x8] sm:$0xff]   ;;  %v8622_v30 = vld [vmem:[#allocation40 + $0x18] sm:$0xff]   ;;  %v7144_v20 = vld [vmem:[#allocation26] ss:$0 sm:$0xff] }
0x1dee   : > { %v5304_v50 = vmul.bf16 %v12062_v29, %v5288_v48  ;;  %v5305_v53 = vmul.bf16 %v12065_v58, %v5288_v48 }
0x1def   : > { %v5306_v34 = vmul.bf16 %v12062_v29, %v12068_v33  ;;  %v5307_v36 = vmul.bf16 %v12065_v58, %v12068_v33  ;;  %v8619_v29 = vld [vmem:[#allocation40] sm:$0xff]  }
0x1df0   : > { %7784 = vmatpush3.bf16.msra.mxu1 %v8619_v29 }
0x1df1   : > { %v5416_v54 = vsel %vm3290_vm3, %v5306_v34, 0  ;;  %7785 = vmatprep.subr.bf16.mxu1 %v10475_v2  ;;  %v8624_v34 = vld [vmem:[#allocation40 + $0x28] sm:$0xff]   ;;  %v5462_v40 = vsel %vm3290_vm3, %v5307_v36, 0 }
0x1df4   : > { %7786 = vmatpush3.bf16.msra.mxu1 %v8620_v22 }
0x1df5   : > { %7787 = vmatprep.subr.bf16.mxu1 %v10475_v2 }
0x1df8   : > { %7788 = vmatpush3.bf16.msra.mxu1 %v8621_v25 }
0x1df9   : > { %7789 = vmatprep.subr.bf16.mxu1 %v10475_v2 }
0x1dfc   : > { %7790 = vmatpush3.bf16.msra.mxu1 %v8622_v30 }
0x1dfd   : > { %7791 = vmatprep.subr.bf16.mxu1 %v10475_v2 }
0x1e00   : > { %7792 = vmatpush3.bf16.msra.mxu1 %v8623_v62 }
0x1e01   : > { %7793 = vmatprep.subr.bf16.mxu1 %v10475_v2 }
0x1e04   : > { %7794 = vmatpush3.bf16.msra.mxu1 %v8624_v34 }
0x1e05   : > { %7795 = vmatprep.subr.bf16.mxu1 %v10475_v2 }
0x1e5b   : > { %v4998_v37 = vpop.xlane.xlu1 %4997 }
0x1e5c   : > { %v4999_v13 = vmul.f32 0.03125, %v4998_v37  ;;  %v8625_v37 = vld [vmem:[#allocation40 + $0x30] sm:$0xff]  }
0x1e5d   : > { %7796 = vmatpush3.bf16.msra.mxu1 %v8625_v37 }
0x1e5e   : > { %v5000_v24 = vsub.f32 %v12054_v5, %v4999_v13  ;;  %7797 = vmatprep.subr.bf16.mxu1 %v10475_v2 }
0x1e60   : > { %v5001_v35 = vmul.f32 %v11765_v41, %v5000_v24 }
0x1e62   : > { %v5002_v38 = vmul.f32 %v5001_v35, %v5001_v35 }
0x1e64   : > { %5003 = vadd.xlane.f32.xlu1 %v5002_v38 }
0x1ef1   : > { %v5004_v44 = vpop.xlane.xlu1 %5003 }
0x1ef2   : > { %v5005_v45 = vmul.f32 0.03125, %v5004_v44 }
0x1ef4   : > { %v5006_v6 = vadd.f32 1e-05, %v5005_v45  ;;  %v8626_v45 = vld [vmem:[#allocation40 + $0x38] sm:$0xff]  }
0x1ef5   : > { %7798 = vmatpush3.bf16.msra.mxu1 %v8626_v45 }
0x1ef6   : > { %8693 = vrsqrt.f32 %v5006_v6  ;;  %7823 = vmatprep.subr.bf16.mxu1 %v10475_v2 }
0x1f00   : > { %v8694_v17 = vpop.eup %8693 }
0x1f01   : > { %v5008_v47 = vmul.f32 %v8694_v17, %v5001_v35 }
0x1f03   : > { %v5015_v26 = vmul.f32 %v7107_v23, %v5008_v47 }
0x1f05   : > { %v5022_v31 = vadd.f32 %v7108_v27, %v5015_v26 }
0x1f07   : > { %v5039_v49 = vpack.c.bf16 %v5022_v31, %v5022_v31  ;;  %v8627_v31 = vld [vmem:[#allocation35] sm:$0xff]  }
0x1f09   : > { %7756 = vmatmul.mubr.bf16.vlgmr.msra.gmra.mrb[44].mxu0 %v5039_v49  ;;  %v8628_v49 = vld [vmem:[#allocation35 + $0x8] sm:$0xff]  }
0x1f0a   : > { %7760 = vmatpush3.bf16.xpose.msra.mxu0 %v5304_v50  ;;  %7761 = vmatprep.mubr.msk.bf16.mxu0 %vm10476_vm0, %v10475_v2 }
0x1f0b   : > { %7765 = vmatprep.subr.bf16.mxu0 %v10475_v2 }
0x1fdc   : > { %v5129_v10 = vpop.f32.mrb[44].mxu0 }
0x1fdd   : > { %v5130_v46 = vadd.f32 %v7109_v59, %v5129_v10  ;;  %v7757_v51 = vpop.f32.mrb[45].mxu0 }
0x1fde   : > { %v5132_v32 = vpop.f32.mrb[46].mxu0  ;;  %v8629_v51 = vld [vmem:[#allocation35 + $0x10] sm:$0xff]  }
0x1fdf   : > { %v5287_v52 = vpack.c.bf16 %v5130_v46, %v5130_v46  ;;  %v7758_v0 = vpop.f32.mrb[47].mxu0  ;;  %v8630_v32 = vld [vmem:[#allocation35 + $0x18] sm:$0xff]  }
0x1fe0   : > { %v8632_v0 = vld [vmem:[#allocation35 + $0x28] sm:$0xff]  }
0x1fe1   : > { %7762 = vmatmul.mubr.bf16.vlgmr.msra.gmra.mrb[48].mxu0 %v5287_v52 }
0x1fe2   : > { %7766 = vmatpush3.bf16.xpose.msra.mxu0 %v5305_v53  ;;  %7767 = vmatprep.mubr.msk.bf16.mxu0 %vm10476_vm0, %v10475_v2  ;;  %v8633_v53 = vld [vmem:[#allocation35 + $0x30] sm:$0xff]  }
0x1fe3   : > { %7771 = vmatprep.subr.bf16.mxu0 %v10475_v2 }
0x1fe9   : > { %7768 = vmatmul.mubr.bf16.vlgmr.msra.gmra.mrb[52].mxu0 %v5287_v52  ;;  %v8631_v52 = vld [vmem:[#allocation35 + $0x20] sm:$0xff]  }
0x1fea   : > { %7772 = vmatpush3.bf16.msra.mxu0 %v5416_v54  ;;  %7773 = vmatprep.mubr.msk.bf16.mxu0 %vm10476_vm0, %v10475_v2  ;;  %v8634_v54 = vld [vmem:[#allocation35 + $0x38] sm:$0xff]  }
0x1feb   : > { %7777 = vmatprep.subr.bf16.mxu0 %v10475_v2 }
0x20b4   : > { %v5342_v55 = vpop.f32.mrb[48].mxu0 }
0x20b5   : > { %v7763_v56 = vpop.f32.mrb[49].mxu0  ;;  %v5388_v57 = vsel %vm3262_vm4, %v5342_v55, -inf }
0x20b6   : > { %5389 = vmax.xlane.f32.xlu0 %v5388_v57  ;;  %v5345_v60 = vpop.f32.mrb[50].mxu0  ;;  %v8636_v56 = vld [vmem:[#allocation38 + $0x8] sm:$0xff]   ;;  %v8637_v57 = vld [vmem:[#allocation38 + $0x10] sm:$0xff]  }
0x20b7   : > { %v7764_v1 = vpop.f32.mrb[51].mxu0 }
0x20bc   : > { %v5382_v61 = vpop.f32.mrb[52].mxu0 }
0x20bd   : > { %v7769_v3 = vpop.f32.mrb[53].mxu0  ;;  %v5391_v4 = vsel %vm3262_vm4, %v5382_v61, -inf }
0x20be   : > { %5392 = vmax.xlane.f32.xlu1 %v5391_v4  ;;  %v5385_v9 = vpop.f32.mrb[54].mxu0  ;;  %v7145_v4 = vld [vmem:[#allocation34] ss:$0 sm:$0xff] }
0x20bf   : > { %v7770_v7 = vpop.f32.mrb[55].mxu0 }
0x20c0   : > { %v7146_v7 = vld [vmem:[#allocation32] ss:$0 sm:$0xff] }
0x2143   : > { %v5390_v8 = vpop.xlane.xlu0 %5389 }
0x2144   : > { %v5394_v28 = vsub.f32 %v5342_v55, %v5390_v8  ;;  %v8635_v55 = vld [vmem:[#allocation38] sm:$0xff]  }
0x2146   : > { %v5396_v11 = vmul.f32 1.442695, %v5394_v28 }
0x2148   : > { %8695 = vpow2.f32 %v5396_v11 }
0x214b   : > { %v5393_v12 = vpop.xlane.xlu1 %5392 }
0x214c   : > { %v5395_v15 = vsub.f32 %v5382_v61, %v5393_v12  ;;  %v8638_v12 = vld [vmem:[#allocation38 + $0x18] sm:$0xff]  }
0x214e   : > { %v5398_v16 = vmul.f32 1.442695, %v5395_v15  ;;  %v8639_v15 = vld [vmem:[#allocation38 + $0x20] sm:$0xff]  }
0x2150   : > { %8697 = vpow2.f32 %v5398_v16  ;;  %v8640_v16 = vld [vmem:[#allocation38 + $0x28] sm:$0xff]  }
0x2152   : > { %v8696_v18 = vpop.eup %8695 }
0x2153   : > { %v5400_v63 = vsel %vm3262_vm4, %v8696_v18, 0.0 }
0x2154   : > { %5401 = vadd.xlane.f32.xlu0 %v5400_v63  ;;  %v8642_v63 = vld [vmem:[#allocation38 + $0x38] sm:$0xff]  }
0x215a   : > { %v8698_v19 = vpop.eup %8697 }
0x215b   : > { %v5403_v21 = vsel %vm3262_vm4, %v8698_v19, 0.0 }
0x215c   : > { %5404 = vadd.xlane.f32.xlu1 %v5403_v21 }
0x21e1   : > { %v5402_v13 = vpop.xlane.xlu0 %5401 }
0x21e2   : > { %8699 = vrcp.f32 %v5402_v13 }
0x21e9   : > { %v5405_v24 = vpop.xlane.xlu1 %5404 }
0x21ea   : > { %8701 = vrcp.f32 %v5405_v24 }
0x21ec   : > { %v8700_v35 = vpop.eup %8699 }
0x21ed   : > { %v5407_v38 = vmul.f32 %v8700_v35, %v8696_v18  ;;  %v8641_v18 = vld [vmem:[#allocation38 + $0x30] sm:$0xff]  }
0x21ef   : > { %v5410_v39 = vpack.c.bf16 %v5407_v38, %v5407_v38 }
0x21f1   : > { %7774 = vmatmul.mubr.msk.bf16.vlgmr.msra.gmra.mrb[56].mxu0 %vm3262_vm4, %v5410_v39  ;;  %v7164_v39 = vld [vmem:[#allocation25] ss:$0 sm:$0xff] }
0x21f2   : > { %7778 = vmatpush3.bf16.msra.mxu0 %v5462_v40  ;;  %7779 = vmatprep.mubr.msk.bf16.mxu0 %vm10476_vm0, %v10475_v2 }
0x21f3   : > { %7803 = vmatprep.subr.bf16.mxu0 %v10475_v2 }
0x21f4   : > { %v8702_v42 = vpop.eup %8701 }
0x21f5   : > { %v5409_v43 = vmul.f32 %v8702_v42, %v8698_v19  ;;  %v7147_v19 = vld [vmem:[#allocation22] ss:$0 sm:$0xff] }
0x21f7   : > { %v5411_v44 = vpack.c.bf16 %v5409_v43, %v5409_v43 }
0x21fd   : > { %7780 = vmatmul.mubr.msk.bf16.vlgmr.msra.gmra.mrb[56].mxu0 %vm3262_vm4, %v5411_v44 }
0x21fe   : > { %7819 = vmatprep.mubr.msk.bf16.mxu0 %vm10476_vm0, %v10475_v2  ;;  %7804 = vmatpush3.bf16.msra.mxu0 %v8627_v31  ;;  %v8650_v31 = vld [vmem:[#allocation56 + $0x38] sm:$0xff]  }
0x21ff   : > { %7805 = vmatprep.subr.bf16.mxu0 %v10475_v2 }
0x2202   : > { %7806 = vmatpush3.bf16.msra.mxu0 %v8628_v49 }
0x2203   : > { %7807 = vmatprep.subr.bf16.mxu0 %v10475_v2 }
0x2206   : > { %7808 = vmatpush3.bf16.msra.mxu0 %v8629_v51  ;;  %v7166_v51 = vld [vmem:[#allocation49] ss:$0 sm:$0xff] }
0x2207   : > { %7809 = vmatprep.subr.bf16.mxu0 %v10475_v2 }
0x220a   : > { %7810 = vmatpush3.bf16.msra.mxu0 %v8630_v32 }
0x220b   : > { %7811 = vmatprep.subr.bf16.mxu0 %v10475_v2 }
0x220e   : > { %7812 = vmatpush3.bf16.msra.mxu0 %v8631_v52 }
0x220f   : > { %7813 = vmatprep.subr.bf16.mxu0 %v10475_v2 }
0x2212   : > { %7814 = vmatpush3.bf16.msra.mxu0 %v8632_v0 }
0x2213   : > { %7815 = vmatprep.subr.bf16.mxu0 %v10475_v2 }
0x2216   : > { %7816 = vmatpush3.bf16.msra.mxu0 %v8633_v53  ;;  %v7167_v53 = vld [vmem:[#allocation52] ss:$0 sm:$0xff] }
0x2217   : > { %7817 = vmatprep.subr.bf16.mxu0 %v10475_v2 }
0x221a   : > { %7818 = vmatpush3.bf16.msra.mxu0 %v8634_v54 }
0x221b   : > { %7843 = vmatprep.subr.bf16.mxu0 %v10475_v2 }
0x22d0   : > { %v5498_v58 = vpop.f32.mrb[56].mxu0 }
0x22d1   : > { %v5521_v33 = vpack.c.bf16 %v5498_v58, %v5498_v58  ;;  %v7781_v36 = vpop.f32.mrb[57].mxu0  ;;  %v8643_v58 = vld [vmem:[#allocation56] sm:$0xff]  }
0x22d2   : > { %v5501_v6 = vpop.f32.mrb[58].mxu0 }
0x22d3   : > { %v7782_v14 = vpop.f32.mrb[59].mxu0  ;;  %7800 = vmatmul.mubr.bf16.vlgmr.msra.gmra.mrb[44].mxu1 %v5521_v33  ;;  %v8644_v33 = vld [vmem:[#allocation56 + $0x8] sm:$0xff]  }
0x22d4   : > { %7839 = vmatprep.mubr.msk.bf16.mxu1 %vm10476_vm0, %v10475_v2  ;;  %7824 = vmatpush3.bf16.msra.mxu1 %v8635_v55 }
0x22d5   : > { %7825 = vmatprep.subr.bf16.mxu1 %v10475_v2 }
0x22d8   : > { %7826 = vmatpush3.bf16.msra.mxu1 %v8636_v56 }
0x22d9   : > { %7827 = vmatprep.subr.bf16.mxu1 %v10475_v2 }
0x22dc   : > { %7828 = vmatpush3.bf16.msra.mxu1 %v8637_v57 }
0x22dd   : > { %7829 = vmatprep.subr.bf16.mxu1 %v10475_v2 }
0x22e0   : > { %7830 = vmatpush3.bf16.msra.mxu1 %v8638_v12  ;;  %v8655_v12 = vld [vmem:[#allocation85 + $0x20] sm:$0xff]  }
0x22e1   : > { %7831 = vmatprep.subr.bf16.mxu1 %v10475_v2 }
0x22e4   : > { %7832 = vmatpush3.bf16.msra.mxu1 %v8639_v15  ;;  %v8656_v15 = vld [vmem:[#allocation85 + $0x28] sm:$0xff]  }
0x22e5   : > { %7833 = vmatprep.subr.bf16.mxu1 %v10475_v2 }
0x22e8   : > { %7834 = vmatpush3.bf16.msra.mxu1 %v8640_v16  ;;  %v8657_v16 = vld [vmem:[#allocation85 + $0x30] sm:$0xff]  }
0x22e9   : > { %7835 = vmatprep.subr.bf16.mxu1 %v10475_v2 }
0x22ec   : > { %7836 = vmatpush3.bf16.msra.mxu1 %v8641_v18 }
0x22ed   : > { %7837 = vmatprep.subr.bf16.mxu1 %v10475_v2 }
0x22f0   : > { %7838 = vmatpush3.bf16.msra.mxu1 %v8642_v63 }
0x22f1   : > { %7863 = vmatprep.subr.bf16.mxu1 %v10475_v2 }
0x23a6   : > { %v5604_v17 = vpop.f32.mrb[44].mxu1 }
0x23a7   : > { %v5610_v23 = vadd.f32 %v5604_v17, %v12054_v5  ;;  %v7801_v47 = vpop.f32.mrb[45].mxu1 }
0x23a8   : > { %v5607_v27 = vpop.f32.mrb[46].mxu1  ;;  %v8646_v47 = vld [vmem:[#allocation56 + $0x18] sm:$0xff]  }
0x23a9   : > { %v12121_v26 = vadd.f32 %v7144_v20, %v5610_v23  ;;  %v7802_v48 = vpop.f32.mrb[47].mxu1  ;;  %v8645_v23 = vld [vmem:[#allocation56 + $0x10] sm:$0xff]   ;;  %v8647_v27 = vld [vmem:[#allocation56 + $0x20] sm:$0xff]  }
0x23aa   : > { %v8649_v48 = vld [vmem:[#allocation56 + $0x30] sm:$0xff]  }
0x23ab   : > { %5621 = vadd.xlane.f32.xlu0 %v12121_v26 }
0x2438   : > { %v5622_v50 = vpop.xlane.xlu0 %5621 }
0x2439   : > { %v5623_v59 = vmul.f32 0.03125, %v5622_v50 }
0x243b   : > { %v5624_v10 = vsub.f32 %v12121_v26, %v5623_v59 }
0x243d   : > { %v5625_v5 = vmul.f32 %v11765_v41, %v5624_v10 }
0x243f   : > { %v5626_v46 = vmul.f32 %v5625_v5, %v5625_v5 }
0x2441   : > { %5627 = vadd.xlane.f32.xlu1 %v5626_v46 }
0x24ce   : > { %v5628_v60 = vpop.xlane.xlu1 %5627 }
0x24cf   : > { %v5629_v1 = vmul.f32 0.03125, %v5628_v60 }
0x24d1   : > { %v5630_v61 = vadd.f32 1e-05, %v5629_v1  ;;  %v8651_v1 = vld [vmem:[#allocation85] sm:$0xff]  }
0x24d3   : > { %8703 = vrsqrt.f32 %v5630_v61  ;;  %v8652_v61 = vld [vmem:[#allocation85 + $0x8] sm:$0xff]  }
0x24dd   : > { %v8704_v3 = vpop.eup %8703 }
0x24de   : > { %v5632_v9 = vmul.f32 %v8704_v3, %v5625_v5  ;;  %v7165_v5 = vld [vmem:[#allocation53] ss:$0 sm:$0xff] }
0x24e0   : > { %v5639_v8 = vmul.f32 %v7145_v4, %v5632_v9 }
0x24e2   : > { %v5646_v28 = vadd.f32 %v7146_v7, %v5639_v8 }
0x24e4   : > { %v5663_v11 = vpack.c.bf16 %v5646_v28, %v5646_v28  ;;  %v8653_v28 = vld [vmem:[#allocation85 + $0x10] sm:$0xff]  }
0x24e6   : > { %7820 = vmatmul.mubr.bf16.vlgmr.msra.gmra.mrb[60].mxu0 %v5663_v11  ;;  %v8654_v11 = vld [vmem:[#allocation85 + $0x18] sm:$0xff]  }
0x24e7   : > { %7859 = vmatprep.mubr.msk.bf16.mxu0 %vm10476_vm0, %v10475_v2  ;;  %7844 = vmatpush3.bf16.msra.mxu0 %v8643_v58 }
0x24e8   : > { %7845 = vmatprep.subr.bf16.mxu0 %v10475_v2 }
0x24eb   : > { %7846 = vmatpush3.bf16.msra.mxu0 %v8644_v33 }
0x24ec   : > { %7847 = vmatprep.subr.bf16.mxu0 %v10475_v2 }
0x24ef   : > { %7848 = vmatpush3.bf16.msra.mxu0 %v8645_v23 }
0x24f0   : > { %7849 = vmatprep.subr.bf16.mxu0 %v10475_v2 }
0x24f3   : > { %7850 = vmatpush3.bf16.msra.mxu0 %v8646_v47 }
0x24f4   : > { %7851 = vmatprep.subr.bf16.mxu0 %v10475_v2 }
0x24f7   : > { %7852 = vmatpush3.bf16.msra.mxu0 %v8647_v27 }
0x24f8   : > { %7853 = vmatprep.subr.bf16.mxu0 %v10475_v2 }
0x25b9   : > { %v5753_v21 = vpop.f32.mrb[60].mxu0 }
0x25ba   : > { %v5754_v29 = vadd.f32 %v7147_v19, %v5753_v21  ;;  %v7821_v22 = vpop.f32.mrb[61].mxu0 }
0x25bb   : > { %v5756_v25 = vpop.f32.mrb[62].mxu0 }
0x25bc   : > { %v5760_v30 = vmul.f32 0.70710677, %v5754_v29  ;;  %v7822_v62 = vpop.f32.mrb[63].mxu0  ;;  %v5759_v37 = vmul.f32 0.5, %v5754_v29  ;;  %v7176_v29 = vld [vmem:[#allocation55] ss:$0 sm:$0xff] }
0x25bd   : > { %v7177_v25 = vld [vmem:[#allocation50] ss:$0 sm:$0xff] }
0x25be   : > { %8705 = verf.f32 %v5760_v30 }
0x25c8   : > { %v8706_v34 = vpop.eup %8705 }
0x25c9   : > { %v5762_v13 = vadd.f32 1.0, %v8706_v34 }
0x25cb   : > { %v5763_v24 = vmul.f32 %v5762_v13, %v5759_v37 }
0x25cd   : > { %v5780_v35 = vpack.c.bf16 %v5763_v24, %v5763_v24 }
0x25cf   : > { %7840 = vmatmul.mubr.bf16.vlgmr.msra.gmra.mrb[48].mxu1 %v5780_v35 }
0x25d0   : > { %7879 = vmatprep.mubr.msk.bf16.mxu1 %vm10476_vm0, %v10475_v2  ;;  %7864 = vmatpush3.bf16.msra.mxu1 %v8651_v1 }
0x25d1   : > { %7865 = vmatprep.subr.bf16.mxu1 %v10475_v2 }
0x25d4   : > { %7866 = vmatpush3.bf16.msra.mxu1 %v8652_v61 }
0x25d5   : > { %7867 = vmatprep.subr.bf16.mxu1 %v10475_v2 }
0x25d8   : > { %7868 = vmatpush3.bf16.msra.mxu1 %v8653_v28 }
0x25d9   : > { %7869 = vmatprep.subr.bf16.mxu1 %v10475_v2 }
0x25dc   : > { %7870 = vmatpush3.bf16.msra.mxu1 %v8654_v11 }
0x25dd   : > { %7871 = vmatprep.subr.bf16.mxu1 %v10475_v2 }
0x25e0   : > { %7872 = vmatpush3.bf16.msra.mxu1 %v8655_v12 }
0x25e1   : > { %7873 = vmatprep.subr.bf16.mxu1 %v10475_v2 }
0x25e4   : > { %7874 = vmatpush3.bf16.msra.mxu1 %v8656_v15 }
0x25e5   : > { %7875 = vmatprep.subr.bf16.mxu1 %v10475_v2 }
0x25e8   : > { %7876 = vmatpush3.bf16.msra.mxu1 %v8657_v16 }
0x25e9   : > { %7877 = vmatprep.subr.bf16.mxu1 %v10475_v2 }
0x26a2   : > { %v5863_v38 = vpop.f32.mrb[48].mxu1 }
0x26a3   : > { %v5869_v40 = vadd.f32 %v5863_v38, %v12121_v26  ;;  %v7841_v42 = vpop.f32.mrb[49].mxu1  ;;  %v8648_v26 = vld [vmem:[#allocation56 + $0x28] sm:$0xff]  }
0x26a4   : > { %v5866_v43 = vpop.f32.mrb[50].mxu1  ;;  %7854 = vmatpush3.bf16.msra.mxu0 %v8648_v26 }
0x26a5   : > { %v7842_v44 = vpop.f32.mrb[51].mxu1  ;;  %v5877_v45 = vadd.f32 %v7164_v39, %v5869_v40  ;;  %7855 = vmatprep.subr.bf16.mxu0 %v10475_v2 }
0x26a7   : > { %5880 = vadd.xlane.f32.xlu0 %v5877_v45 }
0x26a8   : > { %7856 = vmatpush3.bf16.msra.mxu0 %v8649_v48 }
0x26a9   : > { %7857 = vmatprep.subr.bf16.mxu0 %v10475_v2 }
0x26ac   : > { %7858 = vmatpush3.bf16.msra.mxu0 %v8650_v31 }
0x2734   : > { %v5881_v36 = vpop.xlane.xlu0 %5880 }
0x2735   : > { %v5882_v6 = vmul.f32 0.03125, %v5881_v36 }
0x2737   : > { %v5883_v14 = vsub.f32 %v5877_v45, %v5882_v6 }
0x2739   : > { %v5884_v17 = vmul.f32 %v11765_v41, %v5883_v14 }
0x273b   : > { %v5885_v20 = vmul.f32 %v5884_v17, %v5884_v17 }
0x273d   : > { %5886 = vadd.xlane.f32.xlu1 %v5885_v20 }
0x27ca   : > { %v5887_v49 = vpop.xlane.xlu1 %5886 }
0x27cb   : > { %v5888_v50 = vmul.f32 0.03125, %v5887_v49 }
0x27cd   : > { %v5889_v59 = vadd.f32 1e-05, %v5888_v50 }
0x27cf   : > { %8707 = vrsqrt.f32 %v5889_v59 }
0x27d9   : > { %v8708_v10 = vpop.eup %8707 }
0x27da   : > { %v5891_v46 = vmul.f32 %v8708_v10, %v5884_v17 }
0x27dc   : > { %v5898_v32 = vmul.f32 %v7165_v5, %v5891_v46 }
0x27de   : > { %v5905_v52 = vadd.f32 %v7166_v51, %v5898_v32 }
0x27e0   : > { %v5922_v0 = vpack.c.bf16 %v5905_v52, %v5905_v52 }
0x27e2   : > { %7860 = vmatmul.mubr.bf16.vlgmr.msra.gmra.mrb[64].mxu0 %v5922_v0 }
0x28b5   : > { %v6012_v54 = vpop.f32.mrb[64].mxu0 }
0x28b6   : > { %v6013_v55 = vadd.f32 %v7167_v53, %v6012_v54  ;;  %v7861_v56 = vpop.f32.mrb[65].mxu0 }
0x28b7   : > { %v6015_v57 = vpop.f32.mrb[66].mxu0 }
0x28b8   : > { %6020 = vadd.xlane.f32.xlu0 %v6013_v55  ;;  %v7862_v60 = vpop.f32.mrb[67].mxu0 }
0x2945   : > { %v6021_v3 = vpop.xlane.xlu0 %6020 }
0x2946   : > { %v6022_v4 = vmul.f32 0.03125, %v6021_v3 }
0x2948   : > { %v6023_v9 = vsub.f32 %v6013_v55, %v6022_v4 }
0x294a   : > { %v6024_v7 = vmul.f32 %v11765_v41, %v6023_v9  ;;  %v8658_v41 = vld [vmem:[#allocation85 + $0x38] sm:$0xff]  }
0x294b   : > { %7878 = vmatpush3.bf16.msra.mxu1 %v8658_v41 }
0x294c   : > { %v6025_v8 = vmul.f32 %v6024_v7, %v6024_v7 }
0x294e   : > { %6026 = vadd.xlane.f32.xlu1 %v6025_v8 }
0x29db   : > { %v6027_v18 = vpop.xlane.xlu1 %6026 }
0x29dc   : > { %v6028_v63 = vmul.f32 0.03125, %v6027_v18 }
0x29de   : > { %v6029_v19 = vadd.f32 1e-05, %v6028_v63 }
0x29e0   : > { %8709 = vrsqrt.f32 %v6029_v19 }
0x29ea   : > { %v8710_v21 = vpop.eup %8709 }
0x29eb   : > { %v6031_v22 = vmul.f32 %v8710_v21, %v6024_v7 }
0x29ed   : > { %v6038_v30 = vmul.f32 %v7176_v29, %v6031_v22 }
0x29ef   : > { %v6045_v62 = vadd.f32 %v7177_v25, %v6038_v30 }
0x29f1   : > { %v6062_v34 = vpack.c.bf16 %v6045_v62, %v6045_v62 }
0x29f3   : > { %7880 = vmatmul.mubr.bf16.vlgmr.msra.gmra.mrb[52].mxu1 %v6062_v34 }
0x2ac6   : > { %v6145_v2 = vpop.f32.mrb[52].mxu1 }
0x2ac7   : > { %6151 = vst [vmem:[%s2623_s15] sm:$0xff] %v6145_v2  ;;  %v7881_v37 = vpop.f32.mrb[53].mxu1 }
0x2ac8   : > { %v6148_v13 = vpop.f32.mrb[54].mxu1 }
0x2ac9   : > { %10180 = shalt.err (!%p10177_p2)
}
0x2aca   : > { %s10181_s11 = scalar_lea.hbm %s12168_s5, 128  ;;  %s10185_s15 = scalar_lea.hbm %s10808_s13, 256 }
0x2acb   : > { %p10182_p3 = scmp.ne.s32.totalorder %s12168_s5, %s10181_s11  ;;  %p10186_p8 = scmp.lt.u32.totalorder %s12168_s5, %s10808_s13 }
0x2acc   : > { %p10187_p11 = scmp.lt.u32.totalorder %s10185_s15, %s10181_s11  ;;  %p10189_p10 = scmp.lt.u32.totalorder %s10181_s11, %s12168_s5 }
0x2acd   : > { %p10183_p4 = pnand %p10182_p3, %p12428_p12 }
0x2ace   : > { %p10188_p9 = por %p10187_p11, %p10186_p8 }
0x2acf   : > { %p10184_p7 = pneg %p10183_p4 }
0x2ad0   : > { %p10190_p13 = por %p10189_p10, %p10188_p9 }
0x2ad2   : > { %p10191_p0 = pnand %p10190_p13, %p10184_p7 }
0x2ad4   : > { %10194 = shalt.err (!%p10191_p0)
}
0x2ad5   : > { %8167 = dma.vmem_to_hbm [thread:$0]  (%p12428_p12), %s12165_s1, 128, %s12168_s5, %s6153_s6   ;;  %v7882_v24 = vpop.f32.mrb[55].mxu1 }
0x2ad6 PF: > { %s12429_s3 = sld [smem:[#allocation177_spill]]  ;;  %p8285_p1 = scmp.ge.s32.totalorder %s10345_s2, 2 }
0x2ad7   : > { %s6178_s12 = sand.u32 1, %s10333_s0  }
0x2ad8   : > { %s6179_s17 = scalar_lea.sflag [#allocation4], %s6178_s12 }
0x2adc   : > { %p12430_p5 = scmp.ne.s32.totalorder %s12429_s3, 0 }
0x2ade   : > { %p8170_p6 = pnand %p8285_p1, %p12430_p5 }
0x2ae0   : > { %10328 = dma.done.wait (!%p8170_p6), %s6179_s17, 128  }
0x2ae1   : > { %10330 = vsyncadd (!%p8170_p6), %s6179_s17, 4294967168  ;;  %s12431_s2 = sld [smem:[#allocation175_spill]]  ;;  %s12432_s26 = sld [smem:[#allocation174_spill]] }
0x2ae2   : > { %s12433_s1 = sld [smem:[#allocation176_spill]]  ;;  %s12434_s0 = smov %s10337_s28 }
0x2ae7   : > { %p168_p2 = scmp.ge.s32.totalorder %s12431_s2, 4   ;;  %s12435_s28 = smov %s12432_s26 }
0x2ae9   :  { %170 = sbr.rel (!%p168_p2) target bundleno = 159 (0x9f), region = 603 }
0x2af0   :  { %6184 = vsyncpa [#allocation3], 1 }
0x2af1   :  { %6186 = vsyncpa [#allocation3 + $0x1], 1 }
0x2af2   :  { %6187 = vsyncpa [#allocation6], 1 }
0x2af3   :  { %6188 = vsyncpa [#allocation9], 1 }
0x2af4   :  { %6189 = vsyncpa [#allocation12], 1 }
0x2af5   :  { %6190 = vsyncpa [#allocation15], 1 }
0x2af6   :  { %6191 = vsyncpa [#allocation18], 1 }
0x2af7   :  { %6192 = vsyncpa [#allocation21], 1 }
0x2af8   :  { %6193 = vsyncpa [#allocation24], 1 }
0x2af9   :  { %6194 = vsyncpa [#allocation27], 1 }
0x2afa   :  { %6195 = vsyncpa [#allocation30], 1 }
0x2afb   :  { %6196 = vsyncpa [#allocation33], 1 }
0x2afc   :  { %6197 = vsyncpa [#allocation36], 1 }
0x2afd   :  { %6198 = vsyncpa [#allocation39], 1 }
0x2afe   :  { %6199 = vsyncpa [#allocation42], 1 }
0x2aff   :  { %6200 = vsyncpa [#allocation45], 1 }
0x2b00   :  { %6201 = vsyncpa [#allocation48], 1 }
0x2b01   :  { %6202 = vsyncpa [#allocation51], 1 }
0x2b02   :  { %6203 = vsyncpa [#allocation54], 1 }
0x2b03   :  { %6204 = vsyncpa [#allocation57], 1 }
0x2b04   :  { %6205 = vsyncpa [#allocation60], 1 }
0x2b05   :  { %6206 = vsyncpa [#allocation63], 1 }
0x2b06   :  { %6207 = vsyncpa [#allocation66], 1 }
0x2b07   :  { %6208 = vsyncpa [#allocation69], 1 }
0x2b08   :  { %6209 = vsyncpa [#allocation72], 1 }
0x2b09   :  { %6210 = vsyncpa [#allocation75], 1 }
0x2b0a   :  { %6211 = vsyncpa [#allocation78], 1 }
0x2b0b   :  { %6212 = vsyncpa [#allocation81], 1 }
0x2b0c   :  { %6213 = vsyncpa [#allocation84], 1 }
0x2b0d   :  { %6214 = vsyncpa [#allocation87], 1 }
0x2b0e   :  { %6215 = vsyncpa [#allocation4], 1 }
0x2b0f   :  { %6217 = vsyncpa [#allocation4 + $0x1], 1 }

</bundles_post_ra>
